<compile_context>
chip_gen: v5e
topology: v5e:2x2
jax: 0.10.0
libtpu: 0.0.40
codegen_flags: <defaults>
</compile_context>

<pallas_src>
import functools

import jax
import jax.numpy as jnp
from jax.experimental import pallas as pl
from jax.experimental.pallas import tpu as pltpu

_LANE = 128                    # lane width: pad feature dims to multiples of this
_TM_MAX = 512                  # dst-row tile cap
_TK_MAX = 2048                 # src / reduction tile cap
_VMEM_LIMIT = 32 * 1024 * 1024  # above v5e's 16 MiB default, = v6e/v7x default


def _round_up(x, m):
    return (x + m - 1) // m * m


def _pad2d(x, rows, cols):
    return jnp.pad(x, ((0, rows - x.shape[0]), (0, cols - x.shape[1])))


def _pick_tiles(n):
    """Pick (n_pad, tm, tk).

    Large tiles amortize the ~0.35 us per-grid-step overhead; keep >= 2 row
    tiles when possible so the 'parallel' axis feeds both megacore TCs.
    """
    n256 = _round_up(max(n, 256), 256)
    tm = min(_TM_MAX, n256)
    tk = min(_TK_MAX, n256)
    n_pad = _round_up(n256, max(tm, tk))
    if n_pad // tm < 2 and tm > 256:
        tm //= 2  # give the megacore parallel axis at least two tiles
    return n_pad, tm, tk


def _gin_layer_kernel(a_ref, hsrc_ref, hdst_ref, invdeg_ref, w_ref, b_ref,
                      o_ref, acc_ref, *, apply_relu, eps):
    k = pl.program_id(1)

    @pl.when(k == 0)
    def _init():
        acc_ref[...] = jnp.zeros_like(acc_ref)

    # Binary adjacency: int8 in HBM (half/quarter the bytes), upcast to bf16 on
    # the VPU (exact 0/1), MXU matmul with f32 accumulate.
    a = a_ref[...].astype(jnp.bfloat16)
    acc_ref[...] += jnp.dot(a, hsrc_ref[...], preferred_element_type=jnp.float32)

    @pl.when(k == pl.num_programs(1) - 1)
    def _finalize():
        # Exact f32 mean (1/deg post-scale) + (1+eps) * h_dst  (GIN combine).
        z = (invdeg_ref[...] * acc_ref[...]
             + (1.0 + eps) * hdst_ref[...].astype(jnp.float32))
        # apply_func = nn.Linear: bf16 x bf16 MXU matmul, f32 accumulate, f32 bias.
        out = jnp.dot(z.astype(jnp.bfloat16), w_ref[...],
                      preferred_element_type=jnp.float32) + b_ref[...]
        if apply_relu:
            out = jnp.maximum(out, 0.0)
        o_ref[...] = out.astype(o_ref.dtype)


def gin_layer(a_i8, inv_deg, h, w_bf16, b_f32, *, apply_relu, tm, tk, eps=0.0,
              out_dtype=jnp.bfloat16):
    """One GINConv('mean') + Linear (+ReLU) layer.

    a_i8:    [Np, Np] binary adjacency, int8 (rows = dst, cols = src), padded.
    inv_deg: [Np, 1]  f32, 1/in_degree (0 for zero-degree / padded rows).
    h:       [Np, Dp_in]  bf16 node features (padded to lane multiples).
    w_bf16:  [Dp_in, Dp_out] bf16 Linear weight (zero-padded).
    b_f32:   [1, Dp_out]     f32  Linear bias   (zero-padded).
    """
    n = a_i8.shape[0]
    d_in = h.shape[1]
    d_out = w_bf16.shape[1]
    assert n % tm == 0 and n % tk == 0
    grid = (n // tm, n // tk)

    kernel = functools.partial(_gin_layer_kernel, apply_relu=apply_relu, eps=eps)

    flops = 2 * n * n * d_in + 2 * n * d_in * d_out
    bytes_accessed = (
        a_i8.size * 1                                     # adjacency (dominant, int8)
        + (grid[0] + 1) * h.size * h.dtype.itemsize       # H streamed per row-tile + dst
        + w_bf16.size * 2
        + n * d_out * jnp.dtype(out_dtype).itemsize
    )

    return pl.pallas_call(
        kernel,
        out_shape=jax.ShapeDtypeStruct((n, d_out), out_dtype),
        grid_spec=pltpu.PrefetchScalarGridSpec(
            num_scalar_prefetch=0,
            grid=grid,
            in_specs=[
                pl.BlockSpec((tm, tk), lambda i, k: (i, k)),        # A (binary, int8)
                pl.BlockSpec((tk, d_in), lambda i, k: (k, 0)),      # H src tiles (K-streamed)
                pl.BlockSpec((tm, d_in), lambda i, k: (i, 0)),      # H dst tile (resident over k)
                pl.BlockSpec((tm, 1), lambda i, k: (i, 0)),         # 1/deg rows
                pl.BlockSpec((d_in, d_out), lambda i, k: (0, 0)),   # W  (bf16, resident)
                pl.BlockSpec((1, d_out), lambda i, k: (0, 0)),      # b  (f32, resident)
            ],
            out_specs=pl.BlockSpec((tm, d_out), lambda i, k: (i, 0)),
            scratch_shapes=[pltpu.VMEM((tm, d_in), jnp.float32)],   # A@H accumulator
        ),
        compiler_params=pltpu.CompilerParams(
            dimension_semantics=("parallel", "arbitrary"),
            vmem_limit_bytes=_VMEM_LIMIT),
        cost_estimate=pl.CostEstimate(
            flops=flops, transcendentals=0, bytes_accessed=bytes_accessed),
    )(a_i8, h, h, inv_deg, w_bf16, b_f32)


def init_ginemb_params(key, in_feats, n_hidden, n_output_dim, n_layers):
    """nn.Linear-style params, same shapes as the PyTorch module's layers."""
    dims = [in_feats] + [n_hidden] * (n_layers - 1) + [n_output_dim]
    params = []
    for i in range(n_layers):
        key, kw, kb = jax.random.split(key, 3)
        bound = float(dims[i]) ** -0.5
        w = jax.random.uniform(kw, (dims[i], dims[i + 1]), jnp.float32, -bound, bound)
        b = jax.random.uniform(kb, (1, dims[i + 1]), jnp.float32, -bound, bound)
        params.append((w, b))
    return params


def prepare_params(params):
    """One-time: pad Linear params to lane multiples; W in bf16 for the MXU epilogue.

    Zero-padded cols/rows keep padded feature lanes at exactly 0.
    """
    out = []
    for w, b in params:
        dpi = _round_up(max(w.shape[0], _LANE), _LANE)
        dpo = _round_up(max(w.shape[1], _LANE), _LANE)
        out.append((_pad2d(w, dpi, dpo).astype(jnp.bfloat16),
                    _pad2d(b, 1, dpo).astype(jnp.float32)))
    return out


def prepare_blocks(blocks, n_pad):
    """One-time per graph: binary int8 padded adjacency + exact f32 1/in-degree.

    Hoisted out of the forward hot path: cache and reuse across layers and
    forward calls (otherwise the N^2 pad/cast traffic rivals the kernel's own
    adjacency read). Padded rows/cols are zero, which keeps results exact.
    """
    out = []
    for a in blocks:
        deg = jnp.sum(a, axis=1, keepdims=True)
        inv_deg = jnp.where(deg > 0, 1.0 / jnp.maximum(deg, 1.0), 0.0).astype(jnp.float32)
        a_i8 = _pad2d((a != 0).astype(jnp.int8), n_pad, n_pad)
        out.append((a_i8, _pad2d(inv_deg, n_pad, 1)))
    return out


def ginemb_forward_prepared(blocks_p, x_p, params_p, *, tm, tk, eps=0.0):
    """Hot path. x_p is already padded bf16 [n_pad, d_in_pad]; blocks_p/params_p
    come from prepare_blocks / prepare_params."""
    n_layers = len(params_p)
    h = x_p
    for l, ((w_p, b_p), (a_p, inv_p)) in enumerate(zip(params_p, blocks_p)):
        is_last = l == n_layers - 1
        h = gin_layer(a_p, inv_p, h, w_p, b_p,
                      apply_relu=not is_last, eps=eps, tm=tm, tk=tk,
                      out_dtype=jnp.float32 if is_last else jnp.bfloat16)
        # TODO(synk): nn.Dropout modeled in eval/inference mode (identity); no RNG masking.
    return h


if __name__ == "__main__":
    key = jax.random.PRNGKey(0)
    k_adj, k_x, k_p = jax.random.split(key, 3)

    # Small, module-consistent shapes (N not a tile multiple -> exercises padding).
    N = 320
    in_feats = 16
    n_hidden = 32
    n_output_dim = 16
    n_layers = 3

    # Random sparse-ish graph; kept BINARY (mean normalization done in-kernel).
    adj = (jax.random.uniform(k_adj, (N, N)) < 0.05).astype(jnp.float32)
    blocks = [adj] * n_layers  # same full-neighbor block at every layer

    x = jax.random.normal(k_x, (N, in_feats), jnp.float32)
    params = init_ginemb_params(k_p, in_feats, n_hidden, n_output_dim, n_layers)

    # One-time preprocessing, hoisted out of the (jitted) forward hot path.
    n_pad, tm, tk = _pick_tiles(N)
    params_p = prepare_params(params)
    blocks_p = prepare_blocks(blocks, n_pad)
    d_in_pad = params_p[0][0].shape[0]
    x_p = _pad2d(x, n_pad, d_in_pad).astype(jnp.bfloat16)

    fwd = jax.jit(functools.partial(ginemb_forward_prepared, tm=tm, tk=tk))
    out_pad = fwd(blocks_p, x_p, params_p)
    jax.block_until_ready(out_pad)
    out = out_pad[:N, :n_output_dim]
    assert out.shape == (N, n_output_dim)

    # Plain-JAX f32 reference: h = relu((mean_agg(h) + h) @ W + b), no relu on last.
    deg = adj.sum(axis=1, keepdims=True)
    a_norm = jnp.where(deg > 0, adj / jnp.maximum(deg, 1.0), 0.0)
    h_ref = x
    for l, (w, b) in enumerate(params):
        h_ref = (a_norm @ h_ref + h_ref) @ w + b
        if l != n_layers - 1:
            h_ref = jnp.maximum(h_ref, 0.0)
    err = float(jnp.max(jnp.abs(out - h_ref)))
    # bf16 inter-layer features + bf16 epilogue matmul vs f32 reference -> loose tol.
    assert err < 0.15, f"max abs error {err}"

    print("KERNEL_OK")
</pallas_src>

<mosaic_0001>
module attributes {stable_mosaic.version = 11 : i64} {
  func.func @_gin_layer_kernel(%arg0: i32, %arg1: i32, %arg2: memref<256x512xi8, #tpu.memory_space<vmem>>, %arg3: memref<512x128xbf16, #tpu.memory_space<vmem>>, %arg4: memref<256x128xbf16, #tpu.memory_space<vmem>>, %arg5: memref<256x1xf32, #tpu.memory_space<vmem>>, %arg6: memref<128x128xbf16, #tpu.memory_space<vmem>>, %arg7: memref<1x128xf32, #tpu.memory_space<vmem>>, %arg8: memref<256x128xbf16, #tpu.memory_space<vmem>>, %arg9: memref<256x128xf32, #tpu.memory_space<vmem>>) attributes {dimension_semantics = [#tpu.dimension_semantics<parallel>, #tpu.dimension_semantics<arbitrary>], iteration_bounds = array<i64: 2, 1>, scalar_prefetch = 0 : i64, scratch_operands = 1 : i64, tpu.core_type = #tpu.core_type<tc>, window_params = [{transform_indices = @transform_0, window_bounds = array<i64: 256, 512>}, {transform_indices = @transform_1, window_bounds = array<i64: 512, 128>}, {transform_indices = @transform_2, window_bounds = array<i64: 256, 128>}, {transform_indices = @transform_3, window_bounds = array<i64: 256, 1>}, {pipeline_mode = #tpu.pipeline_mode<synchronous>, transform_indices = @transform_4, window_bounds = array<i64: 128, 128>}, {pipeline_mode = #tpu.pipeline_mode<synchronous>, transform_indices = @transform_5, window_bounds = array<i64: 1, 128>}, {transform_indices = @transform_6, window_bounds = array<i64: 256, 128>}]} {
    %c0_i32 = arith.constant 0 : i32
    %0 = arith.cmpi eq, %arg1, %c0_i32 : i32
    %1 = arith.extui %0 : i1 to i32
    %c0_i32_0 = arith.constant 0 : i32
    %2 = arith.cmpi ne, %1, %c0_i32_0 : i32
    scf.if %2 {
      %cst_10 = arith.constant 0.000000e+00 : f32
      %13 = vector.broadcast %cst_10 : f32 to vector<256x128xf32>
      %c0_11 = arith.constant 0 : index
      %c0_12 = arith.constant 0 : index
      %14 = vector.load %arg9[%c0_11, %c0_12] : memref<256x128xf32, #tpu.memory_space<vmem>>, vector<256x128xf32>
      tpu.vector_store %arg9[%c0_11, %c0_12], %13 {strides = array<i32>} : memref<256x128xf32, #tpu.memory_space<vmem>>, vector<256x128xf32>,
    } else {
    }
    %c0 = arith.constant 0 : index
    %c0_1 = arith.constant 0 : index
    %3 = vector.load %arg2[%c0, %c0_1] : memref<256x512xi8, #tpu.memory_space<vmem>>, vector<256x512xi8>
    %4 = arith.sitofp %3 : vector<256x512xi8> to vector<256x512xbf16>
    %c0_2 = arith.constant 0 : index
    %c0_3 = arith.constant 0 : index
    %5 = vector.load %arg9[%c0_2, %c0_3] : memref<256x128xf32, #tpu.memory_space<vmem>>, vector<256x128xf32>
    %c0_4 = arith.constant 0 : index
    %c0_5 = arith.constant 0 : index
    %6 = vector.load %arg3[%c0_4, %c0_5] : memref<512x128xbf16, #tpu.memory_space<vmem>>, vector<512x128xbf16>
    %cst = arith.constant dense<0.000000e+00> : vector<256x128xf32>
    %7 = tpu.matmul %4, %6, %cst {dimension_numbers = #tpu.dot_dimension_numbers<[1], [0], [0], [1], [0, 0, 1, 1], [], []>} : vector<256x512xbf16>, vector<512x128xbf16>, vector<256x128xf32> -> vector<256x128xf32>
    %8 = arith.addf %5, %7 : vector<256x128xf32>
    %c0_6 = arith.constant 0 : index
    %c0_7 = arith.constant 0 : index
    %9 = vector.load %arg9[%c0_6, %c0_7] : memref<256x128xf32, #tpu.memory_space<vmem>>, vector<256x128xf32>
    tpu.vector_store %arg9[%c0_6, %c0_7], %8 {strides = array<i32>} : memref<256x128xf32, #tpu.memory_space<vmem>>, vector<256x128xf32>,
    %c0_i32_8 = arith.constant 0 : i32
    %10 = arith.cmpi eq, %arg1, %c0_i32_8 : i32
    %11 = arith.extui %10 : i1 to i32
    %c0_i32_9 = arith.constant 0 : i32
    %12 = arith.cmpi ne, %11, %c0_i32_9 : i32
    scf.if %12 {
      %c0_10 = arith.constant 0 : index
      %c0_11 = arith.constant 0 : index
      %13 = vector.load %arg5[%c0_10, %c0_11] : memref<256x1xf32, #tpu.memory_space<vmem>>, vector<256x1xf32>
      %c0_12 = arith.constant 0 : index
      %c0_13 = arith.constant 0 : index
      %14 = vector.load %arg9[%c0_12, %c0_13] : memref<256x128xf32, #tpu.memory_space<vmem>>, vector<256x128xf32>
      %15 = vector.broadcast %13 : vector<256x1xf32> to vector<256x128xf32>
      %16 = arith.mulf %15, %14 : vector<256x128xf32>
      %c0_14 = arith.constant 0 : index
      %c0_15 = arith.constant 0 : index
      %17 = vector.load %arg4[%c0_14, %c0_15] : memref<256x128xbf16, #tpu.memory_space<vmem>>, vector<256x128xbf16>
      %18 = arith.extf %17 : vector<256x128xbf16> to vector<256x128xf32>
      %cst_16 = arith.constant 1.000000e+00 : f32
      %19 = vector.broadcast %cst_16 : f32 to vector<256x128xf32>
      %20 = arith.mulf %19, %18 : vector<256x128xf32>
      %21 = arith.addf %16, %20 : vector<256x128xf32>
      %22 = arith.truncf %21 : vector<256x128xf32> to vector<256x128xbf16>
      %c0_17 = arith.constant 0 : index
      %c0_18 = arith.constant 0 : index
      %23 = vector.load %arg6[%c0_17, %c0_18] : memref<128x128xbf16, #tpu.memory_space<vmem>>, vector<128x128xbf16>
      %cst_19 = arith.constant dense<0.000000e+00> : vector<256x128xf32>
      %24 = tpu.matmul %22, %23, %cst_19 {dimension_numbers = #tpu.dot_dimension_numbers<[1], [0], [0], [1], [0, 0, 1, 1], [], []>} : vector<256x128xbf16>, vector<128x128xbf16>, vector<256x128xf32> -> vector<256x128xf32>
      %c0_20 = arith.constant 0 : index
      %c0_21 = arith.constant 0 : index
      %25 = vector.load %arg7[%c0_20, %c0_21] : memref<1x128xf32, #tpu.memory_space<vmem>>, vector<1x128xf32>
      %26 = vector.broadcast %25 : vector<1x128xf32> to vector<256x128xf32>
      %27 = arith.addf %24, %26 : vector<256x128xf32>
      %cst_22 = arith.constant 0.000000e+00 : f32
      %28 = vector.broadcast %cst_22 : f32 to vector<256x128xf32>
      %29 = arith.maximumf %27, %28 : vector<256x128xf32>
      %30 = arith.truncf %29 : vector<256x128xf32> to vector<256x128xbf16>
      %c0_23 = arith.constant 0 : index
      %c0_24 = arith.constant 0 : index
      %31 = vector.load %arg8[%c0_23, %c0_24] : memref<256x128xbf16, #tpu.memory_space<vmem>>, vector<256x128xbf16>
      tpu.vector_store %arg8[%c0_23, %c0_24], %30 {strides = array<i32>} : memref<256x128xbf16, #tpu.memory_space<vmem>>, vector<256x128xbf16>,
    } else {
    }
    return
  }
  func.func @transform_0(%arg0: i32, %arg1: i32) -> (i32, i32) {
    %c0_i32 = arith.constant 0 : i32
    return %arg0, %arg1 : i32, i32
  }
  func.func @transform_1(%arg0: i32, %arg1: i32) -> (i32, i32) {
    %c0_i32 = arith.constant 0 : i32
    %c0_i32_0 = arith.constant 0 : i32
    return %arg1, %c0_i32 : i32, i32
  }
  func.func @transform_2(%arg0: i32, %arg1: i32) -> (i32, i32) {
    %c0_i32 = arith.constant 0 : i32
    %c0_i32_0 = arith.constant 0 : i32
    return %arg0, %c0_i32 : i32, i32
  }
  func.func @transform_3(%arg0: i32, %arg1: i32) -> (i32, i32) {
    %c0_i32 = arith.constant 0 : i32
    %c0_i32_0 = arith.constant 0 : i32
    return %arg0, %c0_i32 : i32, i32
  }
  func.func @transform_4(%arg0: i32, %arg1: i32) -> (i32, i32) {
    %c0_i32 = arith.constant 0 : i32
    %c0_i32_0 = arith.constant 0 : i32
    %c0_i32_1 = arith.constant 0 : i32
    return %c0_i32, %c0_i32_0 : i32, i32
  }
  func.func @transform_5(%arg0: i32, %arg1: i32) -> (i32, i32) {
    %c0_i32 = arith.constant 0 : i32
    %c0_i32_0 = arith.constant 0 : i32
    %c0_i32_1 = arith.constant 0 : i32
    return %c0_i32, %c0_i32_0 : i32, i32
  }
  func.func @transform_6(%arg0: i32, %arg1: i32) -> (i32, i32) {
    %c0_i32 = arith.constant 0 : i32
    %c0_i32_0 = arith.constant 0 : i32
    return %arg0, %c0_i32 : i32, i32
  }
}

module attributes {stable_mosaic.version = 11 : i64} {
  func.func @_gin_layer_kernel(%arg0: i32, %arg1: i32, %arg2: memref<256x512xi8, #tpu.memory_space<vmem>>, %arg3: memref<512x128xbf16, #tpu.memory_space<vmem>>, %arg4: memref<256x128xbf16, #tpu.memory_space<vmem>>, %arg5: memref<256x1xf32, #tpu.memory_space<vmem>>, %arg6: memref<128x128xbf16, #tpu.memory_space<vmem>>, %arg7: memref<1x128xf32, #tpu.memory_space<vmem>>, %arg8: memref<256x128xbf16, #tpu.memory_space<vmem>>, %arg9: memref<256x128xf32, #tpu.memory_space<vmem>>) attributes {dimension_semantics = [#tpu.dimension_semantics<parallel>, #tpu.dimension_semantics<arbitrary>], iteration_bounds = array<i64: 2, 1>, scalar_prefetch = 0 : i64, scratch_operands = 1 : i64, tpu.core_type = #tpu.core_type<tc>, window_params = [{transform_indices = @transform_0, window_bounds = array<i64: 256, 512>}, {transform_indices = @transform_1, window_bounds = array<i64: 512, 128>}, {transform_indices = @transform_2, window_bounds = array<i64: 256, 128>}, {transform_indices = @transform_3, window_bounds = array<i64: 256, 1>}, {pipeline_mode = #tpu.pipeline_mode<synchronous>, transform_indices = @transform_4, window_bounds = array<i64: 128, 128>}, {pipeline_mode = #tpu.pipeline_mode<synchronous>, transform_indices = @transform_5, window_bounds = array<i64: 1, 128>}, {transform_indices = @transform_6, window_bounds = array<i64: 256, 128>}]} {
    %c0_i32 = arith.constant 0 : i32
    %0 = arith.cmpi eq, %arg1, %c0_i32 : i32
    %1 = arith.extui %0 : i1 to i32
    %c0_i32_0 = arith.constant 0 : i32
    %2 = arith.cmpi ne, %1, %c0_i32_0 : i32
    scf.if %2 {
      %cst_10 = arith.constant 0.000000e+00 : f32
      %13 = vector.broadcast %cst_10 : f32 to vector<256x128xf32>
      %c0_11 = arith.constant 0 : index
      %c0_12 = arith.constant 0 : index
      %14 = vector.load %arg9[%c0_11, %c0_12] : memref<256x128xf32, #tpu.memory_space<vmem>>, vector<256x128xf32>
      tpu.vector_store %arg9[%c0_11, %c0_12], %13 {strides = array<i32>} : memref<256x128xf32, #tpu.memory_space<vmem>>, vector<256x128xf32>,
    } else {
    }
    %c0 = arith.constant 0 : index
    %c0_1 = arith.constant 0 : index
    %3 = vector.load %arg2[%c0, %c0_1] : memref<256x512xi8, #tpu.memory_space<vmem>>, vector<256x512xi8>
    %4 = arith.sitofp %3 : vector<256x512xi8> to vector<256x512xbf16>
    %c0_2 = arith.constant 0 : index
    %c0_3 = arith.constant 0 : index
    %5 = vector.load %arg9[%c0_2, %c0_3] : memref<256x128xf32, #tpu.memory_space<vmem>>, vector<256x128xf32>
    %c0_4 = arith.constant 0 : index
    %c0_5 = arith.constant 0 : index
    %6 = vector.load %arg3[%c0_4, %c0_5] : memref<512x128xbf16, #tpu.memory_space<vmem>>, vector<512x128xbf16>
    %cst = arith.constant dense<0.000000e+00> : vector<256x128xf32>
    %7 = tpu.matmul %4, %6, %cst {dimension_numbers = #tpu.dot_dimension_numbers<[1], [0], [0], [1], [0, 0, 1, 1], [], []>} : vector<256x512xbf16>, vector<512x128xbf16>, vector<256x128xf32> -> vector<256x128xf32>
    %8 = arith.addf %5, %7 : vector<256x128xf32>
    %c0_6 = arith.constant 0 : index
    %c0_7 = arith.constant 0 : index
    %9 = vector.load %arg9[%c0_6, %c0_7] : memref<256x128xf32, #tpu.memory_space<vmem>>, vector<256x128xf32>
    tpu.vector_store %arg9[%c0_6, %c0_7], %8 {strides = array<i32>} : memref<256x128xf32, #tpu.memory_space<vmem>>, vector<256x128xf32>,
    %c0_i32_8 = arith.constant 0 : i32
    %10 = arith.cmpi eq, %arg1, %c0_i32_8 : i32
    %11 = arith.extui %10 : i1 to i32
    %c0_i32_9 = arith.constant 0 : i32
    %12 = arith.cmpi ne, %11, %c0_i32_9 : i32
    scf.if %12 {
      %c0_10 = arith.constant 0 : index
      %c0_11 = arith.constant 0 : index
      %13 = vector.load %arg5[%c0_10, %c0_11] : memref<256x1xf32, #tpu.memory_space<vmem>>, vector<256x1xf32>
      %c0_12 = arith.constant 0 : index
      %c0_13 = arith.constant 0 : index
      %14 = vector.load %arg9[%c0_12, %c0_13] : memref<256x128xf32, #tpu.memory_space<vmem>>, vector<256x128xf32>
      %15 = vector.broadcast %13 : vector<256x1xf32> to vector<256x128xf32>
      %16 = arith.mulf %15, %14 : vector<256x128xf32>
      %c0_14 = arith.constant 0 : index
      %c0_15 = arith.constant 0 : index
      %17 = vector.load %arg4[%c0_14, %c0_15] : memref<256x128xbf16, #tpu.memory_space<vmem>>, vector<256x128xbf16>
      %18 = arith.extf %17 : vector<256x128xbf16> to vector<256x128xf32>
      %cst_16 = arith.constant 1.000000e+00 : f32
      %19 = vector.broadcast %cst_16 : f32 to vector<256x128xf32>
      %20 = arith.mulf %19, %18 : vector<256x128xf32>
      %21 = arith.addf %16, %20 : vector<256x128xf32>
      %22 = arith.truncf %21 : vector<256x128xf32> to vector<256x128xbf16>
      %c0_17 = arith.constant 0 : index
      %c0_18 = arith.constant 0 : index
      %23 = vector.load %arg6[%c0_17, %c0_18] : memref<128x128xbf16, #tpu.memory_space<vmem>>, vector<128x128xbf16>
      %cst_19 = arith.constant dense<0.000000e+00> : vector<256x128xf32>
      %24 = tpu.matmul %22, %23, %cst_19 {dimension_numbers = #tpu.dot_dimension_numbers<[1], [0], [0], [1], [0, 0, 1, 1], [], []>} : vector<256x128xbf16>, vector<128x128xbf16>, vector<256x128xf32> -> vector<256x128xf32>
      %c0_20 = arith.constant 0 : index
      %c0_21 = arith.constant 0 : index
      %25 = vector.load %arg7[%c0_20, %c0_21] : memref<1x128xf32, #tpu.memory_space<vmem>>, vector<1x128xf32>
      %26 = vector.broadcast %25 : vector<1x128xf32> to vector<256x128xf32>
      %27 = arith.addf %24, %26 : vector<256x128xf32>
      %cst_22 = arith.constant 0.000000e+00 : f32
      %28 = vector.broadcast %cst_22 : f32 to vector<256x128xf32>
      %29 = arith.maximumf %27, %28 : vector<256x128xf32>
      %30 = arith.truncf %29 : vector<256x128xf32> to vector<256x128xbf16>
      %c0_23 = arith.constant 0 : index
      %c0_24 = arith.constant 0 : index
      %31 = vector.load %arg8[%c0_23, %c0_24] : memref<256x128xbf16, #tpu.memory_space<vmem>>, vector<256x128xbf16>
      tpu.vector_store %arg8[%c0_23, %c0_24], %30 {strides = array<i32>} : memref<256x128xbf16, #tpu.memory_space<vmem>>, vector<256x128xbf16>,
    } else {
    }
    return
  }
  func.func @transform_0(%arg0: i32, %arg1: i32) -> (i32, i32) {
    %c0_i32 = arith.constant 0 : i32
    return %arg0, %arg1 : i32, i32
  }
  func.func @transform_1(%arg0: i32, %arg1: i32) -> (i32, i32) {
    %c0_i32 = arith.constant 0 : i32
    %c0_i32_0 = arith.constant 0 : i32
    return %arg1, %c0_i32 : i32, i32
  }
  func.func @transform_2(%arg0: i32, %arg1: i32) -> (i32, i32) {
    %c0_i32 = arith.constant 0 : i32
    %c0_i32_0 = arith.constant 0 : i32
    return %arg0, %c0_i32 : i32, i32
  }
  func.func @transform_3(%arg0: i32, %arg1: i32) -> (i32, i32) {
    %c0_i32 = arith.constant 0 : i32
    %c0_i32_0 = arith.constant 0 : i32
    return %arg0, %c0_i32 : i32, i32
  }
  func.func @transform_4(%arg0: i32, %arg1: i32) -> (i32, i32) {
    %c0_i32 = arith.constant 0 : i32
    %c0_i32_0 = arith.constant 0 : i32
    %c0_i32_1 = arith.constant 0 : i32
    return %c0_i32, %c0_i32_0 : i32, i32
  }
  func.func @transform_5(%arg0: i32, %arg1: i32) -> (i32, i32) {
    %c0_i32 = arith.constant 0 : i32
    %c0_i32_0 = arith.constant 0 : i32
    %c0_i32_1 = arith.constant 0 : i32
    return %c0_i32, %c0_i32_0 : i32, i32
  }
  func.func @transform_6(%arg0: i32, %arg1: i32) -> (i32, i32) {
    %c0_i32 = arith.constant 0 : i32
    %c0_i32_0 = arith.constant 0 : i32
    return %arg0, %c0_i32 : i32, i32
  }
}

module attributes {stable_mosaic.version = 11 : i64} {
  func.func @_gin_layer_kernel(%arg0: i32, %arg1: i32, %arg2: memref<256x512xi8, #tpu.memory_space<vmem>>, %arg3: memref<512x128xbf16, #tpu.memory_space<vmem>>, %arg4: memref<256x128xbf16, #tpu.memory_space<vmem>>, %arg5: memref<256x1xf32, #tpu.memory_space<vmem>>, %arg6: memref<128x128xbf16, #tpu.memory_space<vmem>>, %arg7: memref<1x128xf32, #tpu.memory_space<vmem>>, %arg8: memref<256x128xf32, #tpu.memory_space<vmem>>, %arg9: memref<256x128xf32, #tpu.memory_space<vmem>>) attributes {dimension_semantics = [#tpu.dimension_semantics<parallel>, #tpu.dimension_semantics<arbitrary>], iteration_bounds = array<i64: 2, 1>, scalar_prefetch = 0 : i64, scratch_operands = 1 : i64, tpu.core_type = #tpu.core_type<tc>, window_params = [{transform_indices = @transform_0, window_bounds = array<i64: 256, 512>}, {transform_indices = @transform_1, window_bounds = array<i64: 512, 128>}, {transform_indices = @transform_2, window_bounds = array<i64: 256, 128>}, {transform_indices = @transform_3, window_bounds = array<i64: 256, 1>}, {pipeline_mode = #tpu.pipeline_mode<synchronous>, transform_indices = @transform_4, window_bounds = array<i64: 128, 128>}, {pipeline_mode = #tpu.pipeline_mode<synchronous>, transform_indices = @transform_5, window_bounds = array<i64: 1, 128>}, {transform_indices = @transform_6, window_bounds = array<i64: 256, 128>}]} {
    %c0_i32 = arith.constant 0 : i32
    %0 = arith.cmpi eq, %arg1, %c0_i32 : i32
    %1 = arith.extui %0 : i1 to i32
    %c0_i32_0 = arith.constant 0 : i32
    %2 = arith.cmpi ne, %1, %c0_i32_0 : i32
    scf.if %2 {
      %cst_10 = arith.constant 0.000000e+00 : f32
      %13 = vector.broadcast %cst_10 : f32 to vector<256x128xf32>
      %c0_11 = arith.constant 0 : index
      %c0_12 = arith.constant 0 : index
      %14 = vector.load %arg9[%c0_11, %c0_12] : memref<256x128xf32, #tpu.memory_space<vmem>>, vector<256x128xf32>
      tpu.vector_store %arg9[%c0_11, %c0_12], %13 {strides = array<i32>} : memref<256x128xf32, #tpu.memory_space<vmem>>, vector<256x128xf32>,
    } else {
    }
    %c0 = arith.constant 0 : index
    %c0_1 = arith.constant 0 : index
    %3 = vector.load %arg2[%c0, %c0_1] : memref<256x512xi8, #tpu.memory_space<vmem>>, vector<256x512xi8>
    %4 = arith.sitofp %3 : vector<256x512xi8> to vector<256x512xbf16>
    %c0_2 = arith.constant 0 : index
    %c0_3 = arith.constant 0 : index
    %5 = vector.load %arg9[%c0_2, %c0_3] : memref<256x128xf32, #tpu.memory_space<vmem>>, vector<256x128xf32>
    %c0_4 = arith.constant 0 : index
    %c0_5 = arith.constant 0 : index
    %6 = vector.load %arg3[%c0_4, %c0_5] : memref<512x128xbf16, #tpu.memory_space<vmem>>, vector<512x128xbf16>
    %cst = arith.constant dense<0.000000e+00> : vector<256x128xf32>
    %7 = tpu.matmul %4, %6, %cst {dimension_numbers = #tpu.dot_dimension_numbers<[1], [0], [0], [1], [0, 0, 1, 1], [], []>} : vector<256x512xbf16>, vector<512x128xbf16>, vector<256x128xf32> -> vector<256x128xf32>
    %8 = arith.addf %5, %7 : vector<256x128xf32>
    %c0_6 = arith.constant 0 : index
    %c0_7 = arith.constant 0 : index
    %9 = vector.load %arg9[%c0_6, %c0_7] : memref<256x128xf32, #tpu.memory_space<vmem>>, vector<256x128xf32>
    tpu.vector_store %arg9[%c0_6, %c0_7], %8 {strides = array<i32>} : memref<256x128xf32, #tpu.memory_space<vmem>>, vector<256x128xf32>,
    %c0_i32_8 = arith.constant 0 : i32
    %10 = arith.cmpi eq, %arg1, %c0_i32_8 : i32
    %11 = arith.extui %10 : i1 to i32
    %c0_i32_9 = arith.constant 0 : i32
    %12 = arith.cmpi ne, %11, %c0_i32_9 : i32
    scf.if %12 {
      %c0_10 = arith.constant 0 : index
      %c0_11 = arith.constant 0 : index
      %13 = vector.load %arg5[%c0_10, %c0_11] : memref<256x1xf32, #tpu.memory_space<vmem>>, vector<256x1xf32>
      %c0_12 = arith.constant 0 : index
      %c0_13 = arith.constant 0 : index
      %14 = vector.load %arg9[%c0_12, %c0_13] : memref<256x128xf32, #tpu.memory_space<vmem>>, vector<256x128xf32>
      %15 = vector.broadcast %13 : vector<256x1xf32> to vector<256x128xf32>
      %16 = arith.mulf %15, %14 : vector<256x128xf32>
      %c0_14 = arith.constant 0 : index
      %c0_15 = arith.constant 0 : index
      %17 = vector.load %arg4[%c0_14, %c0_15] : memref<256x128xbf16, #tpu.memory_space<vmem>>, vector<256x128xbf16>
      %18 = arith.extf %17 : vector<256x128xbf16> to vector<256x128xf32>
      %cst_16 = arith.constant 1.000000e+00 : f32
      %19 = vector.broadcast %cst_16 : f32 to vector<256x128xf32>
      %20 = arith.mulf %19, %18 : vector<256x128xf32>
      %21 = arith.addf %16, %20 : vector<256x128xf32>
      %22 = arith.truncf %21 : vector<256x128xf32> to vector<256x128xbf16>
      %c0_17 = arith.constant 0 : index
      %c0_18 = arith.constant 0 : index
      %23 = vector.load %arg6[%c0_17, %c0_18] : memref<128x128xbf16, #tpu.memory_space<vmem>>, vector<128x128xbf16>
      %cst_19 = arith.constant dense<0.000000e+00> : vector<256x128xf32>
      %24 = tpu.matmul %22, %23, %cst_19 {dimension_numbers = #tpu.dot_dimension_numbers<[1], [0], [0], [1], [0, 0, 1, 1], [], []>} : vector<256x128xbf16>, vector<128x128xbf16>, vector<256x128xf32> -> vector<256x128xf32>
      %c0_20 = arith.constant 0 : index
      %c0_21 = arith.constant 0 : index
      %25 = vector.load %arg7[%c0_20, %c0_21] : memref<1x128xf32, #tpu.memory_space<vmem>>, vector<1x128xf32>
      %26 = vector.broadcast %25 : vector<1x128xf32> to vector<256x128xf32>
      %27 = arith.addf %24, %26 : vector<256x128xf32>
      %c0_22 = arith.constant 0 : index
      %c0_23 = arith.constant 0 : index
      %28 = vector.load %arg8[%c0_22, %c0_23] : memref<256x128xf32, #tpu.memory_space<vmem>>, vector<256x128xf32>
      tpu.vector_store %arg8[%c0_22, %c0_23], %27 {strides = array<i32>} : memref<256x128xf32, #tpu.memory_space<vmem>>, vector<256x128xf32>,
    } else {
    }
    return
  }
  func.func @transform_0(%arg0: i32, %arg1: i32) -> (i32, i32) {
    %c0_i32 = arith.constant 0 : i32
    return %arg0, %arg1 : i32, i32
  }
  func.func @transform_1(%arg0: i32, %arg1: i32) -> (i32, i32) {
    %c0_i32 = arith.constant 0 : i32
    %c0_i32_0 = arith.constant 0 : i32
    return %arg1, %c0_i32 : i32, i32
  }
  func.func @transform_2(%arg0: i32, %arg1: i32) -> (i32, i32) {
    %c0_i32 = arith.constant 0 : i32
    %c0_i32_0 = arith.constant 0 : i32
    return %arg0, %c0_i32 : i32, i32
  }
  func.func @transform_3(%arg0: i32, %arg1: i32) -> (i32, i32) {
    %c0_i32 = arith.constant 0 : i32
    %c0_i32_0 = arith.constant 0 : i32
    return %arg0, %c0_i32 : i32, i32
  }
  func.func @transform_4(%arg0: i32, %arg1: i32) -> (i32, i32) {
    %c0_i32 = arith.constant 0 : i32
    %c0_i32_0 = arith.constant 0 : i32
    %c0_i32_1 = arith.constant 0 : i32
    return %c0_i32, %c0_i32_0 : i32, i32
  }
  func.func @transform_5(%arg0: i32, %arg1: i32) -> (i32, i32) {
    %c0_i32 = arith.constant 0 : i32
    %c0_i32_0 = arith.constant 0 : i32
    %c0_i32_1 = arith.constant 0 : i32
    return %c0_i32, %c0_i32_0 : i32, i32
  }
  func.func @transform_6(%arg0: i32, %arg1: i32) -> (i32, i32) {
    %c0_i32 = arith.constant 0 : i32
    %c0_i32_0 = arith.constant 0 : i32
    return %arg0, %c0_i32 : i32, i32
  }
}

</mosaic_0001>

<bundles_post_ra>
// kernel: ginemb_forward_prepared.4
= control target key start
LH: loop header
LB: loop body
LE: loop exit
PB: predicated region body
PF: predicated region fallthrough
CT: control target
= control target key end

     0   :  { %s2687_s21 = smov 0   ;;  %s2689_s22 = smov 0   ;;  %s3119_s0 = inlined_call_operand.vmem [shape: s8[512,512], index: 0, kind: input, shape index: {}]   ;;  %s3120_s1 = inlined_call_operand.vmem [shape: bf16[512,128], index: 1, kind: input, shape index: {}, may-alias: {1,2}]   ;;  %s3121_s2 = inlined_call_operand.vmem [shape: bf16[512,128], index: 2, kind: input, shape index: {}, may-alias: {1,2}]   ;;  %s3122_s3 = inlined_call_operand.vmem [shape: f32[512,1], index: 3, kind: input, shape index: {}]   ;;  %s3123_s4 = inlined_call_operand.vmem [shape: bf16[128,128], index: 4, kind: input, shape index: {}]   ;;  %s3124_s5 = inlined_call_operand.vmem [shape: f32[1,128], index: 5, kind: input, shape index: {}]   ;;  %s3125_s6 = inlined_call_operand.vmem [shape: bf16[512,128], index: 6, kind: output, shape index: {}]  }
   0x1   :  { %s2691_s23 = smov 0  }
   0x2 LB: > { %s28_s24 = sadd.s32 1, %s2645_s22  ;;  %p2187_p0 = scmp.ge.s32.totalorder %s2649_s23, 1  ;;  %s2649_s23 = sphi %s2691_s23, %s16_s23   ;;  %s2645_s22 = sphi %s2689_s22, %s3127_s22   ;;  %s2641_s21 = sphi %s2687_s21, %s3126_s21  }
   0x3   : > { %p30_p1 = scmp.ge.s32.totalorder %s28_s24, 2  ;;  %p266_p2 = scmp.lt.s32.totalorder %s2649_s23, 3 }
   0x5   : > { %s3129_s24 = smov (%p30_p1, %s28_s24), 0  ;;  %p267_p3 = pnand %p2187_p0, %p266_p2 }
   0x6   : > { %s2188_s27 = sshll.u32 (!%p267_p3), %s2641_s21, 3  ;;  %s2191_s28 = sshll.u32 (!%p267_p3), %s2641_s21, 5 }
   0x7   : > { %270 = sbr.rel (%p267_p3) target bundleno = 640 (0x280), region = 44  ;;  %p335_p4 = scmp.lt.s32.totalorder (!%p267_p3), %s2191_s28, 63 }
   0x8   : > { %p318_p5 = scmp.lt.s32.totalorder (!%p267_p3), %s2188_s27, 15 }
   0xc   : > { %v2367_v0 = vld [vmem:[%s3120_s1 + $0x38] sm:$0xff]  ;;  %v2366_v1 = vld [vmem:[%s3120_s1 + $0x30] sm:$0xff]  ;;  %v2651_v2 = vmov 0   ;;  %s3131_s28 = smov (!%p335_p4, %s2191_s28), 63  ;;  %v2365_v3 = vld [vmem:[%s3120_s1 + $0x28] sm:$0xff]  ;;  %s3133_s27 = smov (!%p318_p5, %s2188_s27), 15 }
   0xd   : > { %2574 = vmatpush.bf16.msra.mxu1 %v2367_v0  ;;  %2575 = vmatpush.bf16.msra.mxu2 %v2367_v0  ;;  %s2194_s9 = sshll.u32 %s3131_s28, 3  ;;  %v2364_v5 = vld [vmem:[%s3120_s1 + $0x20] sm:$0xff]  ;;  %s2359_s15 = sshll.u32 %s3133_s27, 5  ;;  %v2363_v6 = vld [vmem:[%s3120_s1 + $0x18] sm:$0xff]  ;;  %v2362_v8 = vld [vmem:[%s3120_s1 + $0x10] sm:$0xff] }
   0xe   : > { %2576 = vmatpush.bf16.msra.mxu3 %v2367_v0  ;;  %2623 = vset.pattern.permute.xlu0 %v2651_v2  ;;  %s2724_s12 = scalar_lea.vmem %s3122_s3, %s2194_s9  ;;  %s2737_s20 = scalar_lea.vmem %s3119_s0, %s2359_s15  ;;  %v2361_v17 = vld [vmem:[%s3120_s1 + $0x8] sm:$0xff]  ;;  %v2360_v26 = vld [vmem:[%s3120_s1] sm:$0xff]  ;;  %v2383_v29 = vld [vmem:[%s3120_s1 + $0xb8] sm:$0xff] }
   0xf   : > { %2624 = vset.pattern.permute.xlu1 %v2651_v2  ;;  %1028 = vmatpush.bf16.msra.mxu0 %v2367_v0  ;;  %v1451_v4 = vld [vmem:[%s2724_s12] sm:$0xff]  ;;  %v1452_v7 = vld [vmem:[%s2724_s12 + $0x8] sm:$0xff]  ;;  %v1453_v12 = vld [vmem:[%s2724_s12 + $0x10] sm:$0xff]  ;;  %s2192_s17 = sshll.u32 %s3131_s28, 2 }
  0x10   : > { %2625 = vset.pattern.permute.xlu2 %v2651_v2  ;;  %1517 = vperm.xlu0 %2623, %v1451_v4   ;;  %v2743_v9 = vld [vmem:[%s2737_s20 + $0x40] sm:$0xff]  ;;  %v1457_v20 = vld [vmem:[%s2724_s12 + $0x30] sm:$0xff]  ;;  %v1454_v25 = vld [vmem:[%s2724_s12 + $0x18] sm:$0xff]  ;;  %s2987_s21 = scalar_lea.vmem %s3121_s2, %s2192_s17  ;;  %s3044_s27 = scalar_lea.vmem %s3125_s6, %s2192_s17 }
  0x11   : > { %2577 = vmatpush.bf16.msra.mxu1 %v2366_v1  ;;  %2578 = vmatpush.bf16.msra.mxu2 %v2366_v1  ;;  %v2746_v10 = vld [vmem:[%s2737_s20 + $0x80] sm:$0xff]  ;;  %v452_v13 = vunpack.c.0.s8 %v2743_v9  ;;  %v456_v14 = vunpack.c.1.s8 %v2743_v9  ;;  %v2391_v30 = vld [vmem:[%s3120_s1 + $0xf8] sm:$0xff]  ;;  %v2382_v35 = vld [vmem:[%s3120_s1 + $0xb0] sm:$0xff]  ;;  %v460_v43 = vunpack.c.2.s8 %v2743_v9  ;;  %v464_v44 = vunpack.c.3.s8 %v2743_v9 }
  0x12   : > { %2579 = vmatpush.bf16.msra.mxu3 %v2366_v1  ;;  %v2749_v11 = vld [vmem:[%s2737_s20 + $0xc0] sm:$0xff]  ;;  %1527 = vperm.xlu1 %2624, %v1453_v12   ;;  %v484_v15 = vunpack.c.0.s8 %v2746_v10  ;;  %v488_v16 = vunpack.c.1.s8 %v2746_v10  ;;  %v2375_v31 = vld [vmem:[%s3120_s1 + $0x78] sm:$0xff]  ;;  %v1460_v36 = vld [vmem:[%s2724_s12 + $0x48] sm:$0xff]  ;;  %v492_v45 = vunpack.c.2.s8 %v2746_v10  ;;  %v496_v46 = vunpack.c.3.s8 %v2746_v10 }
  0x13   : > { %1029 = vmatpush.bf16.msra.mxu0 %v2366_v1  ;;  %v516_v18 = vunpack.c.0.s8 %v2749_v11  ;;  %v520_v19 = vunpack.c.1.s8 %v2749_v11  ;;  %v580_v21 = vcvt.s32.f32 %v452_v13  ;;  %v584_v22 = vcvt.s32.f32 %v456_v14  ;;  %v2390_v37 = vld [vmem:[%s3120_s1 + $0xf0] sm:$0xff]  ;;  %v2381_v39 = vld [vmem:[%s3120_s1 + $0xa8] sm:$0xff]  ;;  %v1458_v40 = vld [vmem:[%s2724_s12 + $0x38] sm:$0xff] }
  0x14   : > { %v612_v23 = vcvt.s32.f32 %v484_v15  ;;  %v616_v24 = vcvt.s32.f32 %v488_v16  ;;  %v2374_v38 = vld [vmem:[%s3120_s1 + $0x70] sm:$0xff]  ;;  %v2389_v41 = vld [vmem:[%s3120_s1 + $0xe8] sm:$0xff]  ;;  %v524_v47 = vunpack.c.2.s8 %v2749_v11  ;;  %v528_v48 = vunpack.c.3.s8 %v2749_v11  ;;  %v2380_v49 = vld [vmem:[%s3120_s1 + $0xa0] sm:$0xff] }
  0x15   : > { %2580 = vmatpush.bf16.msra.mxu1 %v2365_v3  ;;  %2581 = vmatpush.bf16.msra.mxu2 %v2365_v3  ;;  %v644_v27 = vcvt.s32.f32 %v516_v18  ;;  %v648_v28 = vcvt.s32.f32 %v520_v19  ;;  %v692_v32 = vpack.c.bf16 %v584_v22, %v580_v21  ;;  %v2373_v42 = vld [vmem:[%s3120_s1 + $0x68] sm:$0xff]  ;;  %v1463_v50 = vld [vmem:[%s2724_s12 + $0x60] sm:$0xff]  ;;  %v588_v53 = vcvt.s32.f32 %v460_v43  ;;  %v1461_v59 = vld [vmem:[%s2724_s12 + $0x50] sm:$0xff] }
  0x16   : > { %2582 = vmatpush.bf16.msra.mxu3 %v2365_v3  ;;  %v708_v33 = vpack.c.bf16 %v616_v24, %v612_v23  ;;  %v2388_v51 = vld [vmem:[%s3120_s1 + $0xe0] sm:$0xff]  ;;  %v592_v54 = vcvt.s32.f32 %v464_v44  ;;  %v620_v55 = vcvt.s32.f32 %v492_v45  ;;  %v624_v56 = vcvt.s32.f32 %v496_v46  ;;  %v2379_v60 = vld [vmem:[%s3120_s1 + $0x98] sm:$0xff]  ;;  %v2378_v2 = vld [vmem:[%s3120_s1 + $0x90] sm:$0xff] }
  0x17   : > { %1030 = vmatpush.bf16.msra.mxu0 %v2365_v3  ;;  %v724_v34 = vpack.c.bf16 %v648_v28, %v644_v27  ;;  %v2372_v52 = vld [vmem:[%s3120_s1 + $0x60] sm:$0xff]  ;;  %v652_v57 = vcvt.s32.f32 %v524_v47  ;;  %v656_v58 = vcvt.s32.f32 %v528_v48  ;;  %v2387_v61 = vld [vmem:[%s3120_s1 + $0xd8] sm:$0xff]  ;;  %v2386_v4 = vld [vmem:[%s3120_s1 + $0xd0] sm:$0xff] }
  0x18   : > { %1522 = vperm.xlu0 %2623, %v1452_v7   ;;  %v2371_v62 = vld [vmem:[%s3120_s1 + $0x58] sm:$0xff]  ;;  %v696_v63 = vpack.c.bf16 %v592_v54, %v588_v53  ;;  %v712_v0 = vpack.c.bf16 %v624_v56, %v620_v55  ;;  %v2835_v7 = vld [vmem:[%s2737_s20 + $0xa0] sm:$0xff]  ;;  %v2377_v9 = vld [vmem:[%s3120_s1 + $0x88] sm:$0xff] }
  0x19   : > { %2583 = vmatpush.bf16.msra.mxu1 %v2364_v5  ;;  %2584 = vmatpush.bf16.msra.mxu2 %v2364_v5  ;;  %v728_v1 = vpack.c.bf16 %v656_v58, %v652_v57  ;;  %v1466_v3 = vld [vmem:[%s2724_s12 + $0x78] sm:$0xff]  ;;  %v1464_v10 = vld [vmem:[%s2724_s12 + $0x68] sm:$0xff]  ;;  %v388_v15 = vld [vmem:[%s2737_s20] sm:$0xff]  ;;  %v500_v16 = vunpack.c.0.s8 %v2835_v7  ;;  %v508_v48 = vunpack.c.2.s8 %v2835_v7 }
  0x1a   : > { %2585 = vmatpush.bf16.msra.mxu3 %v2364_v5  ;;  %1532 = vperm.xlu1 %2624, %v1454_v25   ;;  %v2385_v13 = vld [vmem:[%s3120_s1 + $0xc8] sm:$0xff]  ;;  %v420_v18 = vunpack.c.0.s8 %v388_v15  ;;  %v424_v19 = vunpack.c.1.s8 %v388_v15  ;;  %v1469_v22 = vld [vmem:[%s2724_s12 + $0x90] sm:$0xff]  ;;  %v2376_v23 = vld [vmem:[%s3120_s1 + $0x80] sm:$0xff]  ;;  %v432_v43 = vunpack.c.3.s8 %v388_v15 }
  0x1b   : > { %1031 = vmatpush.bf16.msra.mxu0 %v2364_v5  ;;  %v2370_v5 = vld [vmem:[%s3120_s1 + $0x50] sm:$0xff]  ;;  %v2369_v14 = vld [vmem:[%s3120_s1 + $0x48] sm:$0xff]  ;;  %v2384_v27 = vld [vmem:[%s3120_s1 + $0xc0] sm:$0xff]  ;;  %v636_v57 = vcvt.s32.f32 %v508_v48 }
  0x1c   : > { %v548_v24 = vcvt.s32.f32 %v420_v18  ;;  %v552_v25 = vcvt.s32.f32 %v424_v19  ;;  %v2368_v28 = vld [vmem:[%s3120_s1 + $0x40] sm:$0xff]  ;;  %v560_v45 = vcvt.s32.f32 %v432_v43  ;;  %v1456_v54 = vld [vmem:[%s2724_s12 + $0x28] sm:$0xff]  ;;  %v1481_v18 = vld [vmem:[%s2724_s12 + $0xf0] sm:$0xff] }
  0x1d   : > { %2586 = vmatpush.bf16.msra.mxu1 %v2363_v6  ;;  %2587 = vmatpush.bf16.msra.mxu2 %v2363_v6 }
  0x1e   : > { %2588 = vmatpush.bf16.msra.mxu3 %v2363_v6 }
  0x1f   : > { %1032 = vmatpush.bf16.msra.mxu0 %v2363_v6  ;;  %v2832_v6 = vld [vmem:[%s2737_s20 + $0x60] sm:$0xff] }
  0x20   : > { %1547 = vperm.xlu0 %2623, %v1457_v20   ;;  %v468_v11 = vunpack.c.0.s8 %v2832_v6  ;;  %v472_v12 = vunpack.c.1.s8 %v2832_v6  ;;  %v476_v46 = vunpack.c.2.s8 %v2832_v6  ;;  %v480_v47 = vunpack.c.3.s8 %v2832_v6  ;;  %v391_v6 = vld [vmem:[%s2737_s20 + $0x18] sm:$0xff] }
  0x21   : > { %2589 = vmatpush.bf16.msra.mxu1 %v2362_v8  ;;  %2590 = vmatpush.bf16.msra.mxu2 %v2362_v8 }
  0x22   : > { %2591 = vmatpush.bf16.msra.mxu3 %v2362_v8  ;;  %1552 = vperm.xlu1 %2624, %v1458_v40   ;;  %v1455_v40 = vld [vmem:[%s2724_s12 + $0x20] sm:$0xff]  ;;  %v604_v55 = vcvt.s32.f32 %v476_v46  ;;  %v608_v56 = vcvt.s32.f32 %v480_v47 }
  0x23   : > { %1033 = vmatpush.bf16.msra.mxu0 %v2362_v8  ;;  %v2838_v8 = vld [vmem:[%s2737_s20 + $0xe0] sm:$0xff]  ;;  %1537 = vperm.xlu2 %2625, %v1455_v40  }
  0x24   : > { %v532_v20 = vunpack.c.0.s8 %v2838_v8  ;;  %v536_v21 = vunpack.c.1.s8 %v2838_v8 }
  0x25   : > { %2592 = vmatpush.bf16.msra.mxu1 %v2361_v17  ;;  %2593 = vmatpush.bf16.msra.mxu2 %v2361_v17 }
  0x26   : > { %2594 = vmatpush.bf16.msra.mxu3 %v2361_v17 }
  0x27   : > { %1034 = vmatpush.bf16.msra.mxu0 %v2361_v17  ;;  %v504_v17 = vunpack.c.1.s8 %v2835_v7 }
  0x28   : > { %1562 = vperm.xlu0 %2623, %v1460_v36  }
  0x29   : > { %2595 = vmatpush.bf16.msra.mxu1 %v2360_v26  ;;  %2596 = vmatpush.bf16.msra.mxu2 %v2360_v26 }
  0x2a   : > { %2597 = vmatpush.bf16.msra.mxu3 %v2360_v26  ;;  %1567 = vperm.xlu1 %2624, %v1461_v59  }
  0x2b   : > { %1035 = vmatpush.bf16.msra.mxu0 %v2360_v26  ;;  %v596_v26 = vcvt.s32.f32 %v468_v11  ;;  %1542 = vperm.xlu2 %2625, %v1456_v54   ;;  %v393_v54 = vld [vmem:[%s2737_s20 + $0x28] sm:$0xff] }
  0x2c   : > { %1056 = vmatmul.bf16.vlgmr.msra.gmra.mxu1 %v692_v32  ;;  %1076 = vmatmul.bf16.vlgmr.msra.gmra.mxu2 %v708_v33  ;;  %v676_v32 = vpack.c.bf16 %v552_v25, %v548_v24  ;;  %v660_v33 = vcvt.s32.f32 %v532_v20  ;;  %v1462_v20 = vld [vmem:[%s2724_s12 + $0x58] sm:$0xff] }
  0x2d   : > { %1206 = vmatpush.bf16.msrb.mxu2 %v2383_v29  ;;  %1117 = vmatpush.bf16.msrb.mxu1 %v2375_v31  ;;  %v600_v29 = vcvt.s32.f32 %v472_v12  ;;  %v632_v31 = vcvt.s32.f32 %v504_v17 }
  0x2e   : > { %1295 = vmatpush.bf16.msrb.mxu3 %v2391_v30  ;;  %v628_v30 = vcvt.s32.f32 %v500_v16  ;;  %1036 = vmatmul.bf16.vlgmr.msra.gmra.mxu0 %v676_v32  ;;  %v1482_v32 = vld [vmem:[%s2724_s12 + $0xf8] sm:$0xff] }
  0x2f   : > { %1096 = vmatmul.bf16.vlgmr.msra.gmra.mxu3 %v724_v34  ;;  %v664_v34 = vcvt.s32.f32 %v536_v21  ;;  %v700_v36 = vpack.c.bf16 %v600_v29, %v596_v26 }
  0x30   : > { %1577 = vperm.xlu0 %2623, %v1463_v50   ;;  %v540_v50 = vunpack.c.2.s8 %v2838_v8 }
  0x31   : > { %1207 = vmatpush.bf16.msrb.mxu2 %v2382_v35  ;;  %1118 = vmatpush.bf16.msrb.mxu1 %v2374_v38  ;;  %v1467_v35 = vld [vmem:[%s2724_s12 + $0x80] sm:$0xff]  ;;  %v732_v38 = vpack.c.bf16 %v664_v34, %v660_v33 }
  0x32   : > { %1296 = vmatpush.bf16.msrb.mxu3 %v2390_v37  ;;  %1582 = vperm.xlu1 %2624, %v1464_v10   ;;  %v716_v37 = vpack.c.bf16 %v632_v31, %v628_v30  ;;  %v668_v59 = vcvt.s32.f32 %v540_v50  ;;  %v1465_v31 = vld [vmem:[%s2724_s12 + $0x70] sm:$0xff] }
  0x35   : > { %1208 = vmatpush.bf16.msrb.mxu2 %v2381_v39  ;;  %1119 = vmatpush.bf16.msrb.mxu1 %v2373_v42  ;;  %v1472_v39 = vld [vmem:[%s2724_s12 + $0xa8] sm:$0xff]  ;;  %v428_v42 = vunpack.c.2.s8 %v388_v15  ;;  %v427_v15 = vunpack.c.1.s8 %v391_v6 }
  0x36   : > { %1297 = vmatpush.bf16.msrb.mxu3 %v2389_v41  ;;  %v1470_v41 = vld [vmem:[%s2724_s12 + $0x98] sm:$0xff] }
  0x37   : > { %v556_v44 = vcvt.s32.f32 %v428_v42  ;;  %v555_v26 = vcvt.s32.f32 %v427_v15  ;;  %v435_v42 = vunpack.c.3.s8 %v391_v6 }
  0x38   : > { %1592 = vperm.xlu0 %2623, %v1466_v3   ;;  %v390_v3 = vld [vmem:[%s2737_s20 + $0x10] sm:$0xff] }
  0x39   : > { %1209 = vmatpush.bf16.msrb.mxu2 %v2380_v49  ;;  %1120 = vmatpush.bf16.msrb.mxu1 %v2372_v52  ;;  %v512_v49 = vunpack.c.3.s8 %v2835_v7  ;;  %v1475_v52 = vld [vmem:[%s2724_s12 + $0xc0] sm:$0xff]  ;;  %v680_v53 = vpack.c.bf16 %v560_v45, %v556_v44  ;;  %v422_v12 = vunpack.c.0.s8 %v390_v3  ;;  %v434_v40 = vunpack.c.3.s8 %v390_v3  ;;  %v1468_v44 = vld [vmem:[%s2724_s12 + $0x88] sm:$0xff] }
  0x3a   : > { %1298 = vmatpush.bf16.msrb.mxu3 %v2388_v51  ;;  %1597 = vperm.xlu1 %2624, %v1467_v35   ;;  %v544_v51 = vunpack.c.3.s8 %v2838_v8  ;;  %v392_v7 = vld [vmem:[%s2737_s20 + $0x20] sm:$0xff]  ;;  %v563_v50 = vcvt.s32.f32 %v435_v42 }
  0x3b   : > { %v640_v58 = vcvt.s32.f32 %v512_v49  ;;  %v436_v8 = vunpack.c.0.s8 %v392_v7  ;;  %v444_v33 = vunpack.c.2.s8 %v392_v7  ;;  %v448_v34 = vunpack.c.3.s8 %v392_v7 }
  0x3c   : > { %1061 = vmatmul.bf16.gmra.mxu1 %v696_v63  ;;  %1081 = vmatmul.bf16.gmra.mxu2 %v712_v0  ;;  %v562_v48 = vcvt.s32.f32 %v434_v40 }
  0x3d   : > { %1210 = vmatpush.bf16.msrb.mxu2 %v2379_v60  ;;  %1121 = vmatpush.bf16.msrb.mxu1 %v2371_v62  ;;  %v672_v60 = vcvt.s32.f32 %v544_v51  ;;  %v704_v62 = vpack.c.bf16 %v608_v56, %v604_v55  ;;  %v720_v63 = vpack.c.bf16 %v640_v58, %v636_v57  ;;  %v564_v16 = vcvt.s32.f32 %v436_v8  ;;  %v394_v55 = vld [vmem:[%s2737_s20 + $0x30] sm:$0xff]  ;;  %v1471_v56 = vld [vmem:[%s2724_s12 + $0xa0] sm:$0xff]  ;;  %v395_v57 = vld [vmem:[%s2737_s20 + $0x38] sm:$0xff] }
  0x3e   : > { %1299 = vmatpush.bf16.msrb.mxu3 %v2387_v61  ;;  %v1473_v61 = vld [vmem:[%s2724_s12 + $0xb0] sm:$0xff]  ;;  %1041 = vmatmul.bf16.gmra.mxu0 %v680_v53  ;;  %v572_v35 = vcvt.s32.f32 %v444_v33  ;;  %v437_v58 = vunpack.c.0.s8 %v393_v54  ;;  %v447_v15 = vunpack.c.2.s8 %v395_v57 }
  0x3f   : > { %1101 = vmatmul.bf16.gmra.mxu3 %v728_v1  ;;  %v736_v0 = vpack.c.bf16 %v672_v60, %v668_v59  ;;  %v1478_v1 = vld [vmem:[%s2724_s12 + $0xd8] sm:$0xff]  ;;  %v441_v59 = vunpack.c.1.s8 %v393_v54  ;;  %v438_v60 = vunpack.c.0.s8 %v394_v55 }
  0x40   : > { %1607 = vperm.xlu0 %2623, %v1469_v22  }
  0x41   : > { %1211 = vmatpush.bf16.msrb.mxu2 %v2378_v2  ;;  %1122 = vmatpush.bf16.msrb.mxu1 %v2370_v5  ;;  %v389_v2 = vld [vmem:[%s2737_s20 + $0x8] sm:$0xff] }
  0x42   : > { %1300 = vmatpush.bf16.msrb.mxu3 %v2386_v4  ;;  %1612 = vperm.xlu1 %2624, %v1470_v41   ;;  %v1459_v4 = vld [vmem:[%s2724_s12 + $0x40] sm:$0xff]  ;;  %v1476_v5 = vld [vmem:[%s2724_s12 + $0xc8] sm:$0xff]  ;;  %v421_v10 = vunpack.c.0.s8 %v389_v2  ;;  %v425_v11 = vunpack.c.1.s8 %v389_v2  ;;  %v431_v41 = vunpack.c.2.s8 %v391_v6 }
  0x43   : > { %1557 = vperm.xlu2 %2625, %v1459_v4  }
  0x44   : > { %v549_v21 = vcvt.s32.f32 %v421_v10  ;;  %v553_v22 = vcvt.s32.f32 %v425_v11  ;;  %v559_v49 = vcvt.s32.f32 %v431_v41  ;;  %v445_v10 = vunpack.c.2.s8 %v393_v54 }
  0x45   : > { %1212 = vmatpush.bf16.msrb.mxu2 %v2377_v9  ;;  %1123 = vmatpush.bf16.msrb.mxu1 %v2369_v14  ;;  %v440_v9 = vunpack.c.1.s8 %v392_v7  ;;  %v423_v14 = vunpack.c.0.s8 %v391_v6  ;;  %v449_v11 = vunpack.c.3.s8 %v393_v54 }
  0x46   : > { %1301 = vmatpush.bf16.msrb.mxu3 %v2385_v13  ;;  %v426_v13 = vunpack.c.1.s8 %v390_v3  ;;  %v683_v53 = vpack.c.bf16 %v563_v50, %v559_v49 }
  0x47   : > { %v568_v17 = vcvt.s32.f32 %v440_v9  ;;  %v551_v25 = vcvt.s32.f32 %v423_v14  ;;  %v1477_v14 = vld [vmem:[%s2724_s12 + $0xd0] sm:$0xff] }
  0x48   : > { %1622 = vperm.xlu0 %2623, %v1472_v39   ;;  %v554_v24 = vcvt.s32.f32 %v426_v13  ;;  %v430_v39 = vunpack.c.2.s8 %v390_v3  ;;  %v566_v3 = vcvt.s32.f32 %v438_v60  ;;  %v450_v13 = vunpack.c.3.s8 %v394_v55 }
  0x49   : > { %1213 = vmatpush.bf16.msrb.mxu2 %v2376_v23  ;;  %1124 = vmatpush.bf16.msrb.mxu1 %v2368_v28  ;;  %v684_v19 = vpack.c.bf16 %v568_v17, %v564_v16  ;;  %v550_v23 = vcvt.s32.f32 %v422_v12  ;;  %v677_v28 = vpack.c.bf16 %v553_v22, %v549_v21  ;;  %v679_v30 = vpack.c.bf16 %v555_v26, %v551_v25  ;;  %v1480_v25 = vld [vmem:[%s2724_s12 + $0xe8] sm:$0xff] }
  0x4a   : > { %1302 = vmatpush.bf16.msrb.mxu3 %v2384_v27  ;;  %1627 = vperm.xlu1 %2624, %v1473_v61   ;;  %v1479_v27 = vld [vmem:[%s2724_s12 + $0xe0] sm:$0xff]  ;;  %v558_v47 = vcvt.s32.f32 %v430_v39  ;;  %v442_v61 = vunpack.c.1.s8 %v394_v55  ;;  %v446_v12 = vunpack.c.2.s8 %v394_v55  ;;  %v451_v16 = vunpack.c.3.s8 %v395_v57 }
  0x4b   : > { %1572 = vperm.xlu2 %2625, %v1462_v20   ;;  %v678_v29 = vpack.c.bf16 %v554_v24, %v550_v23  ;;  %v573_v17 = vcvt.s32.f32 %v445_v10  ;;  %v578_v20 = vcvt.s32.f32 %v450_v13  ;;  %v575_v21 = vcvt.s32.f32 %v447_v15 }
  0x4c   : > { %1066 = vmatmul.bf16.gmra.mxu1 %v700_v36  ;;  %1086 = vmatmul.bf16.gmra.mxu2 %v716_v37  ;;  %v576_v36 = vcvt.s32.f32 %v448_v34  ;;  %v429_v37 = vunpack.c.2.s8 %v389_v2  ;;  %v570_v4 = vcvt.s32.f32 %v442_v61  ;;  %v579_v22 = vcvt.s32.f32 %v451_v16 }
  0x4e   : > { %1046 = vmatmul.bf16.gmra.mxu0 %v684_v19  ;;  %v688_v43 = vpack.c.bf16 %v576_v36, %v572_v35  ;;  %v557_v45 = vcvt.s32.f32 %v429_v37  ;;  %v686_v8 = vpack.c.bf16 %v570_v4, %v566_v3  ;;  %v574_v19 = vcvt.s32.f32 %v446_v12  ;;  %v2399_v36 = vld [vmem:[%s3123_s4 + $0x38] sm:$0xff] }
  0x4f   : > { %1106 = vmatmul.bf16.gmra.mxu3 %v732_v38  ;;  %v433_v38 = vunpack.c.3.s8 %v389_v2  ;;  %v569_v2 = vcvt.s32.f32 %v441_v59  ;;  %v691_v26 = vpack.c.bf16 %v579_v22, %v575_v21  ;;  %1887 = vmatpush.bf16.msrb.mxu0 %v2399_v36 }
  0x50   : > { %1637 = vperm.xlu0 %2623, %v1475_v52   ;;  %v682_v52 = vpack.c.bf16 %v562_v48, %v558_v47  ;;  %v690_v24 = vpack.c.bf16 %v578_v20, %v574_v19  ;;  %v2398_v47 = vld [vmem:[%s3123_s4 + $0x30] sm:$0xff]  ;;  %v2395_v19 = vld [vmem:[%s3123_s4 + $0x18] sm:$0xff] }
  0x51   : > { %v561_v46 = vcvt.s32.f32 %v433_v38 }
  0x52   : > { %1642 = vperm.xlu1 %2624, %v1476_v5  }
  0x53   : > { %1587 = vperm.xlu2 %2625, %v1465_v31   ;;  %v681_v51 = vpack.c.bf16 %v561_v46, %v557_v45  ;;  %1888 = vmatpush.bf16.msrb.mxu0 %v2398_v47 }
  0x58   : > { %1652 = vperm.xlu0 %2623, %v1478_v1   ;;  %v565_v1 = vcvt.s32.f32 %v437_v58 }
  0x5a   : > { %1657 = vperm.xlu1 %2624, %v1479_v27   ;;  %v685_v7 = vpack.c.bf16 %v569_v2, %v565_v1  ;;  %v397_v27 = vld [vmem:[%s2737_s20 + $0x48] sm:$0xff] }
  0x5b   : > { %1602 = vperm.xlu2 %2625, %v1468_v44   ;;  %v457_v31 = vunpack.c.1.s8 %v397_v27  ;;  %v461_v50 = vunpack.c.2.s8 %v397_v27 }
  0x5c   : > { %1071 = vmatmul.bf16.gmra.mxu1 %v704_v62  ;;  %1091 = vmatmul.bf16.gmra.mxu2 %v720_v63  ;;  %v439_v62 = vunpack.c.0.s8 %v395_v57  ;;  %v443_v63 = vunpack.c.1.s8 %v395_v57  ;;  %v2397_v57 = vld [vmem:[%s3123_s4 + $0x28] sm:$0xff] }
  0x5d   : > { %v585_v38 = vcvt.s32.f32 %v457_v31  ;;  %1889 = vmatpush.bf16.msrb.mxu0 %v2397_v57  ;;  %v589_v58 = vcvt.s32.f32 %v461_v50 }
  0x5e   : > { %1051 = vmatmul.bf16.gmra.mxu0 %v688_v43  ;;  %v567_v5 = vcvt.s32.f32 %v439_v62  ;;  %v571_v6 = vcvt.s32.f32 %v443_v63 }
  0x5f   : > { %1111 = vmatmul.bf16.gmra.mxu3 %v736_v0  ;;  %v1474_v0 = vld [vmem:[%s2724_s12 + $0xb8] sm:$0xff] }
  0x60   : > { %1667 = vperm.xlu0 %2623, %v1481_v18   ;;  %v687_v9 = vpack.c.bf16 %v571_v6, %v567_v5  ;;  %v577_v18 = vcvt.s32.f32 %v449_v11  ;;  %v2396_v6 = vld [vmem:[%s3123_s4 + $0x20] sm:$0xff] }
  0x61   : > { %1890 = vmatpush.bf16.msrb.mxu0 %v2396_v6 }
  0x62   : > { %1672 = vperm.xlu1 %2624, %v1482_v32   ;;  %v689_v23 = vpack.c.bf16 %v577_v18, %v573_v17 }
  0x63   : > { %1617 = vperm.xlu2 %2625, %v1471_v56  }
  0x65   : > { %1891 = vmatpush.bf16.msrb.mxu0 %v2395_v19 }
  0x6b   : > { %1632 = vperm.xlu2 %2625, %v1474_v0  }
  0x6c   : > { %1125 = vmatmul.bf16.vlgmr.msrb.gmra.mxu1 %v677_v28  ;;  %1214 = vmatmul.bf16.vlgmr.msrb.gmra.mxu2 %v678_v29  ;;  %v398_v28 = vld [vmem:[%s2737_s20 + $0x50] sm:$0xff]  ;;  %v399_v29 = vld [vmem:[%s2737_s20 + $0x58] sm:$0xff] }
  0x6d   : > { %v454_v32 = vunpack.c.0.s8 %v398_v28  ;;  %v458_v33 = vunpack.c.1.s8 %v398_v28  ;;  %v455_v34 = vunpack.c.0.s8 %v399_v29  ;;  %v459_v35 = vunpack.c.1.s8 %v399_v29 }
  0x6e   : > { %v463_v55 = vunpack.c.2.s8 %v399_v29  ;;  %v467_v56 = vunpack.c.3.s8 %v399_v29 }
  0x6f   : > { %1303 = vmatmul.bf16.vlgmr.msrb.gmra.mxu3 %v679_v30  ;;  %v453_v30 = vunpack.c.0.s8 %v397_v27  ;;  %v582_v39 = vcvt.s32.f32 %v454_v32  ;;  %v586_v40 = vcvt.s32.f32 %v458_v33  ;;  %v583_v41 = vcvt.s32.f32 %v455_v34  ;;  %v2394_v32 = vld [vmem:[%s3123_s4 + $0x10] sm:$0xff] }
  0x70   : > { %v587_v42 = vcvt.s32.f32 %v459_v35  ;;  %v591_v62 = vcvt.s32.f32 %v463_v55  ;;  %v595_v63 = vcvt.s32.f32 %v467_v56  ;;  %1892 = vmatpush.bf16.msrb.mxu0 %v2394_v32 }
  0x71   : > { %v581_v37 = vcvt.s32.f32 %v453_v30  ;;  %v694_v44 = vpack.c.bf16 %v586_v40, %v582_v39 }
  0x72   : > { %v695_v46 = vpack.c.bf16 %v587_v42, %v583_v41  ;;  %v699_v5 = vpack.c.bf16 %v595_v63, %v591_v62  ;;  %v2392_v62 = vld [vmem:[%s3123_s4] sm:$0xff] }
  0x73   : > { %1647 = vperm.xlu2 %2625, %v1477_v14   ;;  %v693_v43 = vpack.c.bf16 %v585_v38, %v581_v37 }
  0x7b   : > { %1662 = vperm.xlu2 %2625, %v1480_v25  }
  0x7c   : > { %1130 = vmatmul.bf16.gmra.mxu1 %v681_v51  ;;  %1219 = vmatmul.bf16.gmra.mxu2 %v682_v52  ;;  %v465_v51 = vunpack.c.3.s8 %v397_v27  ;;  %v462_v52 = vunpack.c.2.s8 %v398_v28 }
  0x7e   : > { %v593_v59 = vcvt.s32.f32 %v465_v51  ;;  %v590_v60 = vcvt.s32.f32 %v462_v52  ;;  %v2393_v51 = vld [vmem:[%s3123_s4 + $0x8] sm:$0xff] }
  0x7f   : > { %1308 = vmatmul.bf16.gmra.mxu3 %v683_v53  ;;  %v466_v53 = vunpack.c.3.s8 %v398_v28  ;;  %1893 = vmatpush.bf16.msrb.mxu0 %v2393_v51 }
  0x80   : > { %v697_v2 = vpack.c.bf16 %v593_v59, %v589_v58  ;;  %v405_v59 = vld [vmem:[%s2737_s20 + $0x88] sm:$0xff] }
  0x81   : > { %v594_v61 = vcvt.s32.f32 %v466_v53  ;;  %v489_v6 = vunpack.c.1.s8 %v405_v59 }
  0x83   : > { %v698_v3 = vpack.c.bf16 %v594_v61, %v590_v60  ;;  %v406_v60 = vld [vmem:[%s2737_s20 + $0x90] sm:$0xff]  ;;  %v407_v61 = vld [vmem:[%s2737_s20 + $0x98] sm:$0xff]  ;;  %1894 = vmatpush.bf16.msrb.mxu0 %v2392_v62 }
  0x8c   : > { %1135 = vmatmul.bf16.gmra.mxu1 %v685_v7  ;;  %1224 = vmatmul.bf16.gmra.mxu2 %v686_v8  ;;  %v401_v7 = vld [vmem:[%s2737_s20 + $0x68] sm:$0xff]  ;;  %v402_v8 = vld [vmem:[%s2737_s20 + $0x70] sm:$0xff] }
  0x8d   : > { %v469_v12 = vunpack.c.0.s8 %v401_v7  ;;  %v473_v13 = vunpack.c.1.s8 %v401_v7  ;;  %v470_v14 = vunpack.c.0.s8 %v402_v8  ;;  %v474_v15 = vunpack.c.1.s8 %v402_v8 }
  0x8e   : > { %v477_v35 = vunpack.c.2.s8 %v401_v7  ;;  %v481_v36 = vunpack.c.3.s8 %v401_v7  ;;  %v478_v37 = vunpack.c.2.s8 %v402_v8  ;;  %v482_v38 = vunpack.c.3.s8 %v402_v8 }
  0x8f   : > { %1313 = vmatmul.bf16.gmra.mxu3 %v687_v9  ;;  %v403_v9 = vld [vmem:[%s2737_s20 + $0x78] sm:$0xff]  ;;  %v597_v20 = vcvt.s32.f32 %v469_v12  ;;  %v601_v21 = vcvt.s32.f32 %v473_v13  ;;  %v598_v22 = vcvt.s32.f32 %v470_v14  ;;  %v486_v7 = vunpack.c.0.s8 %v406_v60 }
  0x90   : > { %v471_v17 = vunpack.c.0.s8 %v403_v9  ;;  %v475_v18 = vunpack.c.1.s8 %v403_v9  ;;  %v479_v40 = vunpack.c.2.s8 %v403_v9  ;;  %v483_v41 = vunpack.c.3.s8 %v403_v9 }
  0x91   : > { %v701_v28 = vpack.c.bf16 %v601_v21, %v597_v20  ;;  %v605_v42 = vcvt.s32.f32 %v477_v35  ;;  %v490_v8 = vunpack.c.1.s8 %v406_v60  ;;  %v487_v12 = vunpack.c.0.s8 %v407_v61 }
  0x92   : > { %v603_v25 = vcvt.s32.f32 %v475_v18  ;;  %v607_v47 = vcvt.s32.f32 %v479_v40  ;;  %v611_v50 = vcvt.s32.f32 %v483_v41  ;;  %v491_v13 = vunpack.c.1.s8 %v407_v61  ;;  %v1518_v41 = vpop.permute.xlu0 %1517 }
  0x93   : > { %v618_v18 = vcvt.s32.f32 %v490_v8  ;;  %v615_v19 = vcvt.s32.f32 %v487_v12  ;;  %v498_v40 = vunpack.c.3.s8 %v406_v60 }
  0x94   : > { %v707_v58 = vpack.c.bf16 %v611_v50, %v607_v47  ;;  %v619_v20 = vcvt.s32.f32 %v491_v13 }
  0x9c   : > { %1140 = vmatmul.bf16.gmra.mxu1 %v689_v23  ;;  %1229 = vmatmul.bf16.gmra.mxu2 %v690_v24  ;;  %v602_v23 = vcvt.s32.f32 %v474_v15  ;;  %v599_v24 = vcvt.s32.f32 %v471_v17  ;;  %v617_v15 = vcvt.s32.f32 %v489_v6  ;;  %v614_v17 = vcvt.s32.f32 %v486_v7 }
  0x9e   : > { %v702_v29 = vpack.c.bf16 %v602_v23, %v598_v22  ;;  %v703_v31 = vpack.c.bf16 %v603_v25, %v599_v24  ;;  %v710_v24 = vpack.c.bf16 %v618_v18, %v614_v17 }
  0x9f   : > { %1318 = vmatmul.bf16.gmra.mxu3 %v691_v26 }
  0xa9   : > { %v2906_v45 = vpop.f32.mrf.mxu1 }
  0xac   : > { %1145 = vmatmul.bf16.gmra.mxu1 %v693_v43  ;;  %1234 = vmatmul.bf16.gmra.mxu2 %v694_v44  ;;  %v609_v43 = vcvt.s32.f32 %v481_v36  ;;  %v606_v44 = vcvt.s32.f32 %v478_v37  ;;  %v493_v36 = vunpack.c.2.s8 %v405_v59  ;;  %v497_v37 = vunpack.c.3.s8 %v405_v59 }
  0xae   : > { %v705_v55 = vpack.c.bf16 %v609_v43, %v605_v42  ;;  %v495_v43 = vunpack.c.2.s8 %v407_v61  ;;  %v621_v50 = vcvt.s32.f32 %v493_v36  ;;  %v625_v51 = vcvt.s32.f32 %v497_v37 }
  0xaf   : > { %1323 = vmatmul.bf16.gmra.mxu3 %v695_v46  ;;  %v2911_v48 = vpop.f32.mrf.mxu2  ;;  %v610_v46 = vcvt.s32.f32 %v482_v38  ;;  %v494_v38 = vunpack.c.2.s8 %v406_v60 }
  0xb0   : > { %v713_v7 = vpack.c.bf16 %v625_v51, %v621_v50 }
  0xb1   : > { %v2915_v54 = vpop.f32.mrf.mxu1  ;;  %v706_v56 = vpack.c.bf16 %v610_v46, %v606_v44  ;;  %v499_v44 = vunpack.c.3.s8 %v407_v61 }
  0xb2   : > { %v2913_v49 = vpop.f32.mrf.mxu3 }
  0xb7   : > { %v2920_v0 = vpop.f32.mrf.mxu2 }
  0xb9   : > { %v2924_v4 = vpop.f32.mrf.mxu1 }
  0xba   : > { %v2922_v1 = vpop.f32.mrf.mxu3 }
  0xbc   : > { %1150 = vmatmul.bf16.gmra.mxu1 %v697_v2  ;;  %1239 = vmatmul.bf16.gmra.mxu2 %v698_v3  ;;  %v1037_v2 = vpop.f32.mrf.mxu0 }
  0xbf   : > { %1328 = vmatmul.bf16.gmra.mxu3 %v699_v5  ;;  %v2932_v10 = vpop.f32.mrf.mxu2  ;;  %v485_v5 = vunpack.c.0.s8 %v405_v59  ;;  %v627_v59 = vcvt.s32.f32 %v499_v44 }
  0xc1   : > { %v2936_v16 = vpop.f32.mrf.mxu1  ;;  %v613_v14 = vcvt.s32.f32 %v485_v5 }
  0xc2   : > { %v2934_v11 = vpop.f32.mrf.mxu3 }
  0xc3   : > { %v709_v23 = vpack.c.bf16 %v617_v15, %v613_v14 }
  0xc7   : > { %v2941_v26 = vpop.f32.mrf.mxu2 }
  0xc9   : > { %v2945_v30 = vpop.f32.mrf.mxu1 }
  0xca   : > { %v2943_v27 = vpop.f32.mrf.mxu3 }
  0xcc   : > { %1155 = vmatmul.bf16.gmra.mxu1 %v701_v28  ;;  %1244 = vmatmul.bf16.gmra.mxu2 %v702_v29  ;;  %v711_v28 = vpack.c.bf16 %v619_v20, %v615_v19  ;;  %v1039_v29 = vpop.f32.mrf.mxu0  ;;  %v1523_v19 = vpop.permute.xlu0 %1522 }
  0xcf   : > { %1333 = vmatmul.bf16.gmra.mxu3 %v703_v31  ;;  %v2950_v33 = vpop.f32.mrf.mxu2 }
  0xd1   : > { %v2954_v39 = vpop.f32.mrf.mxu1 }
  0xd2   : > { %v2952_v34 = vpop.f32.mrf.mxu3 }
  0xd4   : > { %v1042_v47 = vpop.f32.mrf.mxu0 }
  0xd7   : > { %v2959_v52 = vpop.f32.mrf.mxu2 }
  0xd9   : > { %v2963_v57 = vpop.f32.mrf.mxu1 }
  0xda   : > { %v2961_v53 = vpop.f32.mrf.mxu3 }
  0xdc   : > { %1160 = vmatmul.bf16.gmra.mxu1 %v705_v55  ;;  %1249 = vmatmul.bf16.gmra.mxu2 %v706_v56  ;;  %v622_v55 = vcvt.s32.f32 %v494_v38  ;;  %v626_v56 = vcvt.s32.f32 %v498_v40 }
  0xde   : > { %v714_v8 = vpack.c.bf16 %v626_v56, %v622_v55 }
  0xdf   : > { %1338 = vmatmul.bf16.gmra.mxu3 %v707_v58  ;;  %v2971_v63 = vpop.f32.mrf.mxu2  ;;  %v623_v58 = vcvt.s32.f32 %v495_v43  ;;  %v1528_v43 = vpop.permute.xlu1 %1527 }
  0xe1   : > { %v2975_v9 = vpop.f32.mrf.mxu1  ;;  %v715_v13 = vpack.c.bf16 %v627_v59, %v623_v58 }
  0xe2   : > { %v2973_v3 = vpop.f32.mrf.mxu3 }
  0xe7   : > { %v2977_v21 = vpop.f32.mrf.mxu2 }
  0xe9   : > { %v1126_v25 = vpop.f32.mrf.mxu1 }
  0xea   : > { %v2979_v22 = vpop.f32.mrf.mxu3  ;;  %v1127_v31 = vadd.f32 %v1126_v25, %v1037_v2  ;;  %v2401_v2 = vld [vmem:[%s2987_s21] sm:$0xff]   ;;  %v2994_v25 = vld [vmem:[%s2737_s20 + $0xb0] sm:$0xff] }
  0xeb   : > { %v2402_v15 = vunpack.c.l.bf16 %v2401_v2  ;;  %v2403_v18 = vunpack.c.h.bf16 %v2401_v2 }
  0xec   : > { %1165 = vmatmul.bf16.gmra.mxu1 %v709_v23  ;;  %1254 = vmatmul.bf16.gmra.mxu2 %v710_v24  ;;  %v2991_v23 = vld [vmem:[%s2737_s20 + $0xa8] sm:$0xff]  ;;  %v1044_v24 = vpop.f32.mrf.mxu0 }
  0xed   : > { %v501_v36 = vunpack.c.0.s8 %v2991_v23  ;;  %v505_v40 = vunpack.c.1.s8 %v2991_v23 }
  0xef   : > { %1343 = vmatmul.bf16.gmra.mxu3 %v711_v28  ;;  %v1215_v32 = vpop.f32.mrf.mxu2  ;;  %v633_v55 = vcvt.s32.f32 %v505_v40 }
  0xf0   : > { %v1216_v46 = vadd.f32 %v1215_v32, %v1127_v31  ;;  %v411_v32 = vld [vmem:[%s2737_s20 + $0xb8] sm:$0xff] }
  0xf1   : > { %v1128_v42 = vpop.f32.mrf.mxu1  ;;  %v507_v50 = vunpack.c.1.s8 %v411_v32 }
  0xf2   : > { %v1304_v35 = vpop.f32.mrf.mxu3  ;;  %v1129_v62 = vadd.f32 %v1128_v42, %v1039_v29  ;;  %v506_v42 = vunpack.c.1.s8 %v2994_v25 }
  0xf3   : > { %v1305_v60 = vadd.f32 %v1304_v35, %v1216_v46  ;;  %v503_v46 = vunpack.c.0.s8 %v411_v32 }
  0xf4   : > { %v634_v58 = vcvt.s32.f32 %v506_v42  ;;  %v513_v42 = vunpack.c.3.s8 %v2991_v23 }
  0xf5   : > { %v1675_v14 = vmul.f32 %v1518_v41, %v1305_v60  ;;  %v502_v41 = vunpack.c.0.s8 %v2994_v25  ;;  %v631_v59 = vcvt.s32.f32 %v503_v46  ;;  %v635_v60 = vcvt.s32.f32 %v507_v50 }
  0xf7   : > { %v1217_v61 = vpop.f32.mrf.mxu2  ;;  %v1771_v28 = vadd.f32 %v2402_v15, %v1675_v14  ;;  %v630_v56 = vcvt.s32.f32 %v502_v41  ;;  %v719_v15 = vpack.c.bf16 %v635_v60, %v631_v59 }
  0xf8   : > { %v1218_v5 = vadd.f32 %v1217_v61, %v1129_v62  ;;  %v1047_v61 = vpop.f32.mrf.mxu0 }
  0xf9   : > { %v1131_v12 = vpop.f32.mrf.mxu1 }
  0xfa   : > { %v1306_v6 = vpop.f32.mrf.mxu3  ;;  %v1132_v31 = vadd.f32 %v1131_v12, %v1042_v47  ;;  %v629_v47 = vcvt.s32.f32 %v501_v36 }
  0xfb   : > { %v1307_v17 = vadd.f32 %v1306_v6, %v1218_v5  ;;  %v2544_v6 = vld [vmem:[%s2987_s21 + $0x8] sm:$0xff]  }
  0xfc   : > { %1170 = vmatmul.bf16.gmra.mxu1 %v713_v7  ;;  %1259 = vmatmul.bf16.gmra.mxu2 %v714_v8  ;;  %v717_v12 = vpack.c.bf16 %v633_v55, %v629_v47  ;;  %v515_v47 = vunpack.c.3.s8 %v411_v32 }
  0xfd   : > { %v1676_v20 = vmul.f32 %v1523_v19, %v1307_v17  ;;  %v2406_v19 = vunpack.c.l.bf16 %v2544_v6 }
  0xff   : > { %1348 = vmatmul.bf16.gmra.mxu3 %v715_v13  ;;  %v1772_v29 = vadd.f32 %v2403_v18, %v1676_v20  ;;  %v1220_v35 = vpop.f32.mrf.mxu2  ;;  %v718_v13 = vpack.c.bf16 %v634_v58, %v630_v56  ;;  %v2407_v20 = vunpack.c.h.bf16 %v2544_v6  ;;  %v641_v58 = vcvt.s32.f32 %v513_v42  ;;  %v2545_v6 = vld [vmem:[%s2987_s21 + $0x10] sm:$0xff]  }
 0x100   : > { %v1221_v51 = vadd.f32 %v1220_v35, %v1132_v31  ;;  %v1049_v46 = vpop.f32.mrf.mxu0 }
 0x101   : > { %v1803_v38 = vpack.c.bf16 %v1772_v29, %v1771_v28  ;;  %v1133_v44 = vpop.f32.mrf.mxu1  ;;  %v1533_v28 = vpop.permute.xlu1 %1532 }
 0x102   : > { %v1309_v37 = vpop.f32.mrf.mxu3  ;;  %v1134_v2 = vadd.f32 %v1133_v44, %v1044_v24  ;;  %v514_v44 = vunpack.c.3.s8 %v2994_v25 }
 0x103   : > { %1895 = vmatmul.bf16.vlgmr.msrb.gmra.mxu0 %v1803_v38  ;;  %v1310_v62 = vadd.f32 %v1309_v37, %v1221_v51  ;;  %v509_v37 = vunpack.c.2.s8 %v2991_v23  ;;  %v1538_v38 = vpop.permute.xlu2 %1537  ;;  %v511_v51 = vunpack.c.2.s8 %v411_v32 }
 0x104   : > { %v642_v60 = vcvt.s32.f32 %v514_v44 }
 0x105   : > { %v1677_v17 = vmul.f32 %v1528_v43, %v1310_v62  ;;  %v510_v43 = vunpack.c.2.s8 %v2994_v25  ;;  %v637_v56 = vcvt.s32.f32 %v509_v37  ;;  %v639_v62 = vcvt.s32.f32 %v511_v51  ;;  %v415_v37 = vld [vmem:[%s2737_s20 + $0xd8] sm:$0xff] }
 0x106   : > { %v519_v51 = vunpack.c.0.s8 %v415_v37 }
 0x107   : > { %v1222_v5 = vpop.f32.mrf.mxu2  ;;  %v1773_v24 = vadd.f32 %v2406_v19, %v1677_v17  ;;  %v638_v59 = vcvt.s32.f32 %v510_v43  ;;  %v2410_v17 = vunpack.c.l.bf16 %v2545_v6 }
 0x108   : > { %v1223_v7 = vadd.f32 %v1222_v5, %v1134_v2  ;;  %v643_v2 = vcvt.s32.f32 %v515_v47  ;;  %v523_v47 = vunpack.c.1.s8 %v415_v37 }
 0x109   : > { %v1136_v14 = vpop.f32.mrf.mxu1 }
 0x10a   : > { %v1311_v8 = vpop.f32.mrf.mxu3  ;;  %v1137_v31 = vadd.f32 %v1136_v14, %v1047_v61  ;;  %v723_v32 = vpack.c.bf16 %v643_v2, %v639_v62  ;;  %v647_v2 = vcvt.s32.f32 %v519_v51 }
 0x10b   : > { %v1312_v18 = vadd.f32 %v1311_v8, %v1223_v7  ;;  %v721_v8 = vpack.c.bf16 %v641_v58, %v637_v56  ;;  %v1543_v19 = vpop.permute.xlu2 %1542 }
 0x10c   : > { %1175 = vmatmul.bf16.gmra.mxu1 %v717_v12  ;;  %1264 = vmatmul.bf16.gmra.mxu2 %v718_v13  ;;  %v722_v12 = vpack.c.bf16 %v642_v60, %v638_v59 }
 0x10d   : > { %v1678_v29 = vmul.f32 %v1533_v28, %v1312_v18  ;;  %v2411_v18 = vunpack.c.h.bf16 %v2545_v6 }
 0x10f   : > { %1353 = vmatmul.bf16.gmra.mxu3 %v719_v15  ;;  %v1774_v35 = vadd.f32 %v2407_v20, %v1678_v29  ;;  %v1225_v36 = vpop.f32.mrf.mxu2  ;;  %v1052_v20 = vpop.f32.mrf.mxu0  ;;  %v413_v29 = vld [vmem:[%s2737_s20 + $0xc8] sm:$0xff] }
 0x110   : > { %v1226_v55 = vadd.f32 %v1225_v36, %v1137_v31  ;;  %v414_v31 = vld [vmem:[%s2737_s20 + $0xd0] sm:$0xff] }
 0x111   : > { %v1804_v41 = vpack.c.bf16 %v1774_v35, %v1773_v24  ;;  %v1138_v50 = vpop.f32.mrf.mxu1  ;;  %v518_v44 = vunpack.c.0.s8 %v414_v31 }
 0x112   : > { %v1314_v40 = vpop.f32.mrf.mxu3  ;;  %v1139_v5 = vadd.f32 %v1138_v50, %v1049_v46  ;;  %v522_v46 = vunpack.c.1.s8 %v414_v31 }
 0x113   : > { %1900 = vmatmul.bf16.gmra.mxu0 %v1804_v41  ;;  %v1315_v61 = vadd.f32 %v1314_v40, %v1226_v55  ;;  %v517_v41 = vunpack.c.0.s8 %v413_v29  ;;  %v646_v59 = vcvt.s32.f32 %v518_v44 }
 0x114   : > { %v650_v60 = vcvt.s32.f32 %v522_v46  ;;  %v526_v46 = vunpack.c.2.s8 %v414_v31 }
 0x115   : > { %v1679_v14 = vmul.f32 %v1538_v38, %v1315_v61  ;;  %v521_v38 = vunpack.c.1.s8 %v413_v29  ;;  %v645_v56 = vcvt.s32.f32 %v517_v41  ;;  %v651_v61 = vcvt.s32.f32 %v523_v47 }
 0x116   : > { %v525_v41 = vunpack.c.2.s8 %v413_v29  ;;  %v527_v47 = vunpack.c.2.s8 %v415_v37 }
 0x117   : > { %v1227_v23 = vpop.f32.mrf.mxu2  ;;  %v1775_v35 = vadd.f32 %v2410_v17, %v1679_v14  ;;  %v649_v58 = vcvt.s32.f32 %v521_v38  ;;  %v1054_v62 = vpop.f32.mrf.mxu0 }
 0x118   : > { %v1228_v7 = vadd.f32 %v1227_v23, %v1139_v5 }
 0x119   : > { %v1141_v13 = vpop.f32.mrf.mxu1 }
 0x11a   : > { %v1316_v25 = vpop.f32.mrf.mxu3  ;;  %v1142_v24 = vadd.f32 %v1141_v13, %v1052_v20  ;;  %v726_v13 = vpack.c.bf16 %v650_v60, %v646_v59  ;;  %v654_v60 = vcvt.s32.f32 %v526_v46 }
 0x11b   : > { %v1317_v15 = vadd.f32 %v1316_v25, %v1228_v7  ;;  %v2546_v7 = vld [vmem:[%s2987_s21 + $0x18] sm:$0xff]  }
 0x11c   : > { %1180 = vmatmul.bf16.gmra.mxu1 %v721_v8  ;;  %1269 = vmatmul.bf16.gmra.mxu2 %v722_v12  ;;  %v725_v12 = vpack.c.bf16 %v649_v58, %v645_v56  ;;  %v2415_v20 = vunpack.c.h.bf16 %v2546_v7  ;;  %v653_v58 = vcvt.s32.f32 %v525_v41 }
 0x11d   : > { %v1680_v28 = vmul.f32 %v1543_v19, %v1317_v15  ;;  %v727_v15 = vpack.c.bf16 %v651_v61, %v647_v2  ;;  %v2414_v19 = vunpack.c.l.bf16 %v2546_v7  ;;  %v655_v2 = vcvt.s32.f32 %v527_v47 }
 0x11f   : > { %1358 = vmatmul.bf16.gmra.mxu3 %v723_v32  ;;  %v1776_v36 = vadd.f32 %v2411_v18, %v1680_v28  ;;  %v1230_v40 = vpop.f32.mrf.mxu2  ;;  %v1548_v32 = vpop.permute.xlu0 %1547 }
 0x120   : > { %v1231_v55 = vadd.f32 %v1230_v40, %v1142_v24  ;;  %v1553_v28 = vpop.permute.xlu1 %1552 }
 0x121   : > { %v1805_v43 = vpack.c.bf16 %v1776_v36, %v1775_v35  ;;  %v1143_v50 = vpop.f32.mrf.mxu1 }
 0x122   : > { %v1319_v42 = vpop.f32.mrf.mxu3  ;;  %v1144_v23 = vadd.f32 %v1143_v50, %v1054_v62  ;;  %v530_v50 = vunpack.c.3.s8 %v414_v31 }
 0x123   : > { %1905 = vmatmul.bf16.gmra.mxu0 %v1805_v43  ;;  %v1320_v5 = vadd.f32 %v1319_v42, %v1231_v55  ;;  %v529_v42 = vunpack.c.3.s8 %v413_v29  ;;  %v531_v55 = vunpack.c.3.s8 %v415_v37  ;;  %v1558_v37 = vpop.permute.xlu2 %1557 }
 0x124   : > { %v658_v62 = vcvt.s32.f32 %v530_v50 }
 0x125   : > { %v1681_v17 = vmul.f32 %v1548_v32, %v1320_v5  ;;  %v657_v59 = vcvt.s32.f32 %v529_v42  ;;  %v659_v61 = vcvt.s32.f32 %v531_v55 }
 0x127   : > { %v1232_v6 = vpop.f32.mrf.mxu2  ;;  %v1777_v35 = vadd.f32 %v2414_v19, %v1681_v17  ;;  %v729_v31 = vpack.c.bf16 %v657_v59, %v653_v58  ;;  %v1563_v17 = vpop.permute.xlu0 %1562  ;;  %v418_v19 = vld [vmem:[%s2737_s20 + $0xf0] sm:$0xff] }
 0x128   : > { %v1233_v25 = vadd.f32 %v1232_v6, %v1144_v23  ;;  %v2547_v23 = vld [vmem:[%s2987_s21 + $0x20] sm:$0xff]  }
 0x129   : > { %v1146_v14 = vpop.f32.mrf.mxu1 }
 0x12a   : > { %v1321_v8 = vpop.f32.mrf.mxu3  ;;  %v1147_v43 = vadd.f32 %v1146_v14, %v2906_v45  ;;  %v2418_v14 = vunpack.c.l.bf16 %v2547_v23 }
 0x12b   : > { %v1322_v18 = vadd.f32 %v1321_v8, %v1233_v25  ;;  %v730_v25 = vpack.c.bf16 %v658_v62, %v654_v60 }
 0x12c   : > { %1185 = vmatmul.bf16.gmra.mxu1 %v725_v12  ;;  %1274 = vmatmul.bf16.gmra.mxu2 %v726_v13  ;;  %v731_v12 = vpack.c.bf16 %v659_v61, %v655_v2 }
 0x12d   : > { %v1682_v24 = vmul.f32 %v1553_v28, %v1322_v18 }
 0x12f   : > { %1363 = vmatmul.bf16.gmra.mxu3 %v727_v15  ;;  %v1778_v36 = vadd.f32 %v2415_v20, %v1682_v24  ;;  %v1235_v40 = vpop.f32.mrf.mxu2  ;;  %v2419_v15 = vunpack.c.h.bf16 %v2547_v23  ;;  %v419_v24 = vld [vmem:[%s2737_s20 + $0xf8] sm:$0xff] }
 0x130   : > { %v1236_v56 = vadd.f32 %v1235_v40, %v1147_v43  ;;  %v535_v50 = vunpack.c.0.s8 %v419_v24 }
 0x131   : > { %v1806_v44 = vpack.c.bf16 %v1778_v36, %v1777_v35  ;;  %v1148_v51 = vpop.f32.mrf.mxu1 }
 0x132   : > { %v1324_v38 = vpop.f32.mrf.mxu3  ;;  %v1149_v29 = vadd.f32 %v1148_v51, %v2915_v54  ;;  %v417_v54 = vld [vmem:[%s2737_s20 + $0xe8] sm:$0xff]  ;;  %v539_v51 = vunpack.c.1.s8 %v419_v24  ;;  %v663_v60 = vcvt.s32.f32 %v535_v50 }
 0x133   : > { %1910 = vmatmul.bf16.gmra.mxu0 %v1806_v44  ;;  %v1325_v5 = vadd.f32 %v1324_v38, %v1236_v56  ;;  %v533_v36 = vunpack.c.0.s8 %v417_v54  ;;  %v537_v40 = vunpack.c.1.s8 %v417_v54  ;;  %v534_v38 = vunpack.c.0.s8 %v418_v19 }
 0x134   : > { %v538_v44 = vunpack.c.1.s8 %v418_v19  ;;  %v667_v62 = vcvt.s32.f32 %v539_v51 }
 0x135   : > { %v1683_v13 = vmul.f32 %v1558_v37, %v1325_v5  ;;  %v661_v55 = vcvt.s32.f32 %v533_v36  ;;  %v665_v56 = vcvt.s32.f32 %v537_v40  ;;  %v662_v58 = vcvt.s32.f32 %v534_v38  ;;  %v2548_v5 = vld [vmem:[%s2987_s21 + $0x28] sm:$0xff]  }
 0x136   : > { %v666_v59 = vcvt.s32.f32 %v538_v44  ;;  %v542_v40 = vunpack.c.2.s8 %v418_v19  ;;  %v547_v38 = vunpack.c.3.s8 %v419_v24 }
 0x137   : > { %v1237_v45 = vpop.f32.mrf.mxu2  ;;  %v1779_v20 = vadd.f32 %v2418_v14, %v1683_v13  ;;  %v733_v23 = vpack.c.bf16 %v665_v56, %v661_v55  ;;  %v2423_v13 = vunpack.c.h.bf16 %v2548_v5 }
 0x138   : > { %v1238_v6 = vadd.f32 %v1237_v45, %v1149_v29  ;;  %v670_v51 = vcvt.s32.f32 %v542_v40  ;;  %v675_v56 = vcvt.s32.f32 %v547_v38 }
 0x139   : > { %v1151_v8 = vpop.f32.mrf.mxu1 }
 0x13a   : > { %v1326_v7 = vpop.f32.mrf.mxu3  ;;  %v1152_v41 = vadd.f32 %v1151_v8, %v2924_v4 }
 0x13b   : > { %v1327_v32 = vadd.f32 %v1326_v7, %v1238_v6  ;;  %v734_v6 = vpack.c.bf16 %v666_v59, %v662_v58  ;;  %v1568_v7 = vpop.permute.xlu1 %1567  ;;  %v2549_v59 = vld [vmem:[%s2987_s21 + $0x30] sm:$0xff]  }
 0x13c   : > { %1190 = vmatmul.bf16.gmra.mxu1 %v729_v31  ;;  %1279 = vmatmul.bf16.gmra.mxu2 %v730_v25  ;;  %v735_v25 = vpack.c.bf16 %v667_v62, %v663_v60 }
 0x13d   : > { %v1684_v18 = vmul.f32 %v1563_v17, %v1327_v32  ;;  %v1573_v32 = vpop.permute.xlu2 %1572 }
 0x13f   : > { %1368 = vmatmul.bf16.gmra.mxu3 %v731_v12  ;;  %v1780_v28 = vadd.f32 %v2419_v15, %v1684_v18  ;;  %v1240_v35 = vpop.f32.mrf.mxu2  ;;  %v2422_v12 = vunpack.c.l.bf16 %v2548_v5  ;;  %v541_v18 = vunpack.c.2.s8 %v417_v54 }
 0x140   : > { %v1241_v47 = vadd.f32 %v1240_v35, %v1152_v41  ;;  %v546_v41 = vunpack.c.3.s8 %v418_v19 }
 0x141   : > { %v1807_v43 = vpack.c.bf16 %v1780_v28, %v1779_v20  ;;  %v1153_v46 = vpop.f32.mrf.mxu1  ;;  %v545_v20 = vunpack.c.3.s8 %v417_v54 }
 0x142   : > { %v1329_v42 = vpop.f32.mrf.mxu3  ;;  %v1154_v61 = vadd.f32 %v1153_v46, %v2936_v16  ;;  %v669_v46 = vcvt.s32.f32 %v541_v18 }
 0x143   : > { %1915 = vmatmul.bf16.gmra.mxu0 %v1807_v43  ;;  %v1330_v2 = vadd.f32 %v1329_v42, %v1241_v47  ;;  %v543_v43 = vunpack.c.2.s8 %v419_v24  ;;  %v673_v50 = vcvt.s32.f32 %v545_v20  ;;  %v674_v47 = vcvt.s32.f32 %v546_v41 }
 0x145   : > { %v1685_v37 = vmul.f32 %v1568_v7, %v1330_v2  ;;  %v671_v55 = vcvt.s32.f32 %v543_v43  ;;  %v737_v2 = vpack.c.bf16 %v673_v50, %v669_v46  ;;  %v738_v19 = vpack.c.bf16 %v674_v47, %v670_v51 }
 0x147   : > { %v1242_v4 = vpop.f32.mrf.mxu2  ;;  %v1781_v15 = vadd.f32 %v2422_v12, %v1685_v37  ;;  %v739_v24 = vpack.c.bf16 %v675_v56, %v671_v55 }
 0x148   : > { %v1243_v29 = vadd.f32 %v1242_v4, %v1154_v61  ;;  %v1578_v61 = vpop.permute.xlu0 %1577 }
 0x149   : > { %v1156_v31 = vpop.f32.mrf.mxu1 }
 0x14a   : > { %v1331_v45 = vpop.f32.mrf.mxu3  ;;  %v1157_v28 = vadd.f32 %v1156_v31, %v2945_v30 }
 0x14b   : > { %v1332_v8 = vadd.f32 %v1331_v45, %v1243_v29  ;;  %v2426_v45 = vunpack.c.l.bf16 %v2549_v59 }
 0x14c   : > { %1195 = vmatmul.bf16.gmra.mxu1 %v733_v23  ;;  %1284 = vmatmul.bf16.gmra.mxu2 %v734_v6  ;;  %v2427_v23 = vunpack.c.h.bf16 %v2549_v59  ;;  %v1583_v6 = vpop.permute.xlu1 %1582 }
 0x14d   : > { %v1686_v14 = vmul.f32 %v1573_v32, %v1332_v8 }
 0x14f   : > { %1373 = vmatmul.bf16.gmra.mxu3 %v735_v25  ;;  %v1782_v16 = vadd.f32 %v2423_v13, %v1686_v14  ;;  %v1245_v17 = vpop.f32.mrf.mxu2 }
 0x150   : > { %v1246_v44 = vadd.f32 %v1245_v17, %v1157_v28  ;;  %v2550_v17 = vld [vmem:[%s2987_s21 + $0x38] sm:$0xff]   ;;  %v1588_v28 = vpop.permute.xlu2 %1587 }
 0x151   : > { %v1808_v36 = vpack.c.bf16 %v1782_v16, %v1781_v15  ;;  %v1158_v42 = vpop.f32.mrf.mxu1  ;;  %v2430_v41 = vunpack.c.l.bf16 %v2550_v17 }
 0x152   : > { %v1334_v35 = vpop.f32.mrf.mxu3  ;;  %v1159_v54 = vadd.f32 %v1158_v42, %v2954_v39  ;;  %v2431_v42 = vunpack.c.h.bf16 %v2550_v17 }
 0x153   : > { %1920 = vmatmul.bf16.gmra.mxu0 %v1808_v36  ;;  %v1335_v58 = vadd.f32 %v1334_v35, %v1246_v44 }
 0x155   : > { %v1687_v5 = vmul.f32 %v1578_v61, %v1335_v58 }
 0x157   : > { %v1247_v30 = vpop.f32.mrf.mxu2  ;;  %v1783_v39 = vadd.f32 %v2426_v45, %v1687_v5 }
 0x158   : > { %v1248_v60 = vadd.f32 %v1247_v30, %v1159_v54  ;;  %v2551_v54 = vld [vmem:[%s2987_s21 + $0x40] sm:$0xff]  }
 0x159   : > { %v1161_v4 = vpop.f32.mrf.mxu1  ;;  %v2434_v61 = vunpack.c.l.bf16 %v2551_v54 }
 0x15a   : > { %v1336_v62 = vpop.f32.mrf.mxu3  ;;  %v1162_v37 = vadd.f32 %v1161_v4, %v2963_v57  ;;  %v1593_v57 = vpop.permute.xlu0 %1592 }
 0x15b   : > { %v1337_v29 = vadd.f32 %v1336_v62, %v1248_v60  ;;  %v1598_v62 = vpop.permute.xlu1 %1597 }
 0x15c   : > { %1200 = vmatmul.bf16.gmra.mxu1 %v737_v2  ;;  %1289 = vmatmul.bf16.gmra.mxu2 %v738_v19 }
 0x15d   : > { %v1688_v7 = vmul.f32 %v1583_v6, %v1337_v29 }
 0x15f   : > { %1378 = vmatmul.bf16.gmra.mxu3 %v739_v24  ;;  %v1784_v31 = vadd.f32 %v2427_v23, %v1688_v7  ;;  %v1250_v25 = vpop.f32.mrf.mxu2  ;;  %v2435_v24 = vunpack.c.h.bf16 %v2551_v54  ;;  %v2553_v54 = vld [vmem:[%s2987_s21 + $0x50] sm:$0xff]  }
 0x160   : > { %v1251_v32 = vadd.f32 %v1250_v25, %v1162_v37  ;;  %v3033_v37 = vld [vmem:[%s3124_s5] ss:$0 sm:$0xff] }
 0x161   : > { %v1809_v12 = vpack.c.bf16 %v1784_v31, %v1783_v39  ;;  %v1163_v13 = vpop.f32.mrf.mxu1 }
 0x162   : > { %v1339_v8 = vpop.f32.mrf.mxu3  ;;  %v1164_v15 = vadd.f32 %v1163_v13, %v2975_v9 }
 0x163   : > { %1925 = vmatmul.bf16.gmra.mxu0 %v1809_v12  ;;  %v1340_v14 = vadd.f32 %v1339_v8, %v1251_v32  ;;  %v2552_v12 = vld [vmem:[%s2987_s21 + $0x48] sm:$0xff]  }
 0x165   : > { %v1689_v36 = vmul.f32 %v1588_v28, %v1340_v14  ;;  %v2439_v28 = vunpack.c.h.bf16 %v2552_v12 }
 0x167   : > { %v1252_v16 = vpop.f32.mrf.mxu2  ;;  %v1785_v38 = vadd.f32 %v2430_v41, %v1689_v36 }
 0x168   : > { %v1253_v18 = vadd.f32 %v1252_v16, %v1164_v15 }
 0x169   : > { %v1166_v35 = vpop.f32.mrf.mxu1 }
 0x16a   : > { %v1341_v20 = vpop.f32.mrf.mxu3  ;;  %v1167_v50 = vadd.f32 %v1166_v35, %v2911_v48  ;;  %v1603_v48 = vpop.permute.xlu2 %1602 }
 0x16b   : > { %v1342_v40 = vadd.f32 %v1341_v20, %v1253_v18  ;;  %v1608_v18 = vpop.permute.xlu0 %1607  ;;  %v2438_v20 = vunpack.c.l.bf16 %v2552_v12 }
 0x16d   : > { %v1690_v43 = vmul.f32 %v1593_v57, %v1342_v40  ;;  %v1613_v57 = vpop.permute.xlu1 %1612 }
 0x16f   : > { %v1786_v44 = vadd.f32 %v2431_v42, %v1690_v43  ;;  %v1255_v46 = vpop.f32.mrf.mxu2 }
 0x170   : > { %v1256_v55 = vadd.f32 %v1255_v46, %v1167_v50 }
 0x171   : > { %v1810_v9 = vpack.c.bf16 %v1786_v44, %v1785_v38  ;;  %v1168_v47 = vpop.f32.mrf.mxu1 }
 0x172   : > { %v1344_v51 = vpop.f32.mrf.mxu3  ;;  %v1169_v58 = vadd.f32 %v1168_v47, %v2920_v0 }
 0x173   : > { %1930 = vmatmul.bf16.gmra.mxu0 %v1810_v9  ;;  %v1345_v56 = vadd.f32 %v1344_v51, %v1256_v55 }
 0x175   : > { %v1691_v19 = vmul.f32 %v1598_v62, %v1345_v56 }
 0x177   : > { %v1257_v30 = vpop.f32.mrf.mxu2  ;;  %v1787_v29 = vadd.f32 %v2434_v61, %v1691_v19 }
 0x178   : > { %v1258_v59 = vadd.f32 %v1257_v30, %v1169_v58 }
 0x179   : > { %v1171_v2 = vpop.f32.mrf.mxu1 }
 0x17a   : > { %v1346_v60 = vpop.f32.mrf.mxu3  ;;  %v1172_v7 = vadd.f32 %v1171_v2, %v2932_v10 }
 0x17b   : > { %v1347_v4 = vadd.f32 %v1346_v60, %v1258_v59 }
 0x17d   : > { %v1692_v5 = vmul.f32 %v1603_v48, %v1347_v4  ;;  %v1618_v4 = vpop.permute.xlu2 %1617 }
 0x17f   : > { %v1788_v45 = vadd.f32 %v2435_v24, %v1692_v5  ;;  %v1260_v23 = vpop.f32.mrf.mxu2  ;;  %v2443_v24 = vunpack.c.h.bf16 %v2553_v54 }
 0x180   : > { %v1896_v6 = vpop.f32.mrf.mxu0  ;;  %v1261_v25 = vadd.f32 %v1260_v23, %v1172_v7 }
 0x181   : > { %v1811_v39 = vpack.c.bf16 %v1788_v45, %v1787_v29  ;;  %v1173_v31 = vpop.f32.mrf.mxu1  ;;  %v1897_v13 = vadd.f32 %v3033_v37, %v1896_v6  ;;  %v1623_v6 = vpop.permute.xlu0 %1622 }
 0x182   : > { %v1349_v0 = vpop.f32.mrf.mxu3  ;;  %v1174_v32 = vadd.f32 %v1173_v31, %v2941_v26 }
 0x183   : > { %1935 = vmatmul.bf16.gmra.mxu0 %v1811_v39  ;;  %v1350_v8 = vadd.f32 %v1349_v0, %v1261_v25  ;;  %v1976_v40 = vmax.f32 %v1897_v13, 0.0 }
 0x185   : > { %v1693_v36 = vmul.f32 %v1608_v18, %v1350_v8 }
 0x187   : > { %v1262_v14 = vpop.f32.mrf.mxu2  ;;  %v1789_v38 = vadd.f32 %v2438_v20, %v1693_v36 }
 0x188   : > { %v1898_v15 = vpop.f32.mrf.mxu0  ;;  %v1263_v10 = vadd.f32 %v1262_v14, %v1174_v32 }
 0x189   : > { %v1899_v17 = vadd.f32 %v3033_v37, %v1898_v15  ;;  %v1176_v35 = vpop.f32.mrf.mxu1 }
 0x18a   : > { %v1351_v16 = vpop.f32.mrf.mxu3  ;;  %v1177_v51 = vadd.f32 %v1176_v35, %v2950_v33  ;;  %v2442_v33 = vunpack.c.l.bf16 %v2553_v54 }
 0x18b   : > { %v1352_v41 = vadd.f32 %v1351_v16, %v1263_v10  ;;  %v1977_v42 = vmax.f32 %v1899_v17, 0.0  ;;  %v2554_v10 = vld [vmem:[%s2987_s21 + $0x58] sm:$0xff]  }
 0x18d   : > { %v1694_v26 = vmul.f32 %v1613_v57, %v1352_v41  ;;  %v2467_v43 = vpack.c.bf16 %v1977_v42, %v1976_v40  ;;  %v1628_v40 = vpop.permute.xlu1 %1627  ;;  %v2447_v41 = vunpack.c.h.bf16 %v2554_v10 }
 0x18f   : > { %v1790_v44 = vadd.f32 %v2439_v28, %v1694_v26  ;;  %2468 = vst [vmem:[%s3044_s27] sm:$0xff] %v2467_v43   ;;  %v1265_v46 = vpop.f32.mrf.mxu2 }
 0x190   : > { %v1901_v50 = vpop.f32.mrf.mxu0  ;;  %v1266_v56 = vadd.f32 %v1265_v46, %v1177_v51 }
 0x191   : > { %v1812_v47 = vpack.c.bf16 %v1790_v44, %v1789_v38  ;;  %v1178_v55 = vpop.f32.mrf.mxu1  ;;  %v1902_v30 = vadd.f32 %v3033_v37, %v1901_v50  ;;  %v1633_v44 = vpop.permute.xlu2 %1632 }
 0x192   : > { %v1354_v9 = vpop.f32.mrf.mxu3  ;;  %v1179_v59 = vadd.f32 %v1178_v55, %v2959_v52 }
 0x193   : > { %1940 = vmatmul.bf16.gmra.mxu0 %v1812_v47  ;;  %v1355_v58 = vadd.f32 %v1354_v9, %v1266_v56  ;;  %v1978_v29 = vmax.f32 %v1902_v30, 0.0 }
 0x195   : > { %v1695_v5 = vmul.f32 %v1618_v4, %v1355_v58 }
 0x197   : > { %v1267_v60 = vpop.f32.mrf.mxu2  ;;  %v1791_v52 = vadd.f32 %v2442_v33, %v1695_v5 }
 0x198   : > { %v1903_v62 = vpop.f32.mrf.mxu0  ;;  %v1268_v2 = vadd.f32 %v1267_v60, %v1179_v59  ;;  %v2555_v60 = vld [vmem:[%s2987_s21 + $0x60] sm:$0xff]  }
 0x199   : > { %v1904_v61 = vadd.f32 %v3033_v37, %v1903_v62  ;;  %v1181_v48 = vpop.f32.mrf.mxu1  ;;  %v2451_v5 = vunpack.c.h.bf16 %v2555_v60 }
 0x19a   : > { %v1356_v19 = vpop.f32.mrf.mxu3  ;;  %v1182_v8 = vadd.f32 %v1181_v48, %v2971_v63  ;;  %v2446_v63 = vunpack.c.l.bf16 %v2554_v10  ;;  %v1638_v48 = vpop.permute.xlu0 %1637 }
 0x19b   : > { %v1357_v45 = vadd.f32 %v1356_v19, %v1268_v2  ;;  %v1979_v23 = vmax.f32 %v1904_v61, 0.0 }
 0x19d   : > { %v1696_v7 = vmul.f32 %v1623_v6, %v1357_v45  ;;  %v2472_v0 = vpack.c.bf16 %v1979_v23, %v1978_v29 }
 0x19f   : > { %v1792_v39 = vadd.f32 %v2443_v24, %v1696_v7  ;;  %2559 = vst [vmem:[%s3044_s27 + $0x8] sm:$0xff] %v2472_v0   ;;  %v1270_v31 = vpop.f32.mrf.mxu2  ;;  %v1643_v0 = vpop.permute.xlu1 %1642 }
 0x1a0   : > { %v1906_v25 = vpop.f32.mrf.mxu0  ;;  %v1271_v14 = vadd.f32 %v1270_v31, %v1182_v8 }
 0x1a1   : > { %v1813_v13 = vpack.c.bf16 %v1792_v39, %v1791_v52  ;;  %v1183_v32 = vpop.f32.mrf.mxu1  ;;  %v1907_v16 = vadd.f32 %v3033_v37, %v1906_v25 }
 0x1a2   : > { %v1359_v12 = vpop.f32.mrf.mxu3  ;;  %v1184_v17 = vadd.f32 %v1183_v32, %v2977_v21 }
 0x1a3   : > { %1945 = vmatmul.bf16.gmra.mxu0 %v1813_v13  ;;  %v1360_v15 = vadd.f32 %v1359_v12, %v1271_v14  ;;  %v1980_v26 = vmax.f32 %v1907_v16, 0.0  ;;  %v2556_v16 = vld [vmem:[%s2987_s21 + $0x68] sm:$0xff]  }
 0x1a5   : > { %v1697_v57 = vmul.f32 %v1628_v40, %v1360_v15 }
 0x1a7   : > { %v1272_v18 = vpop.f32.mrf.mxu2  ;;  %v1793_v21 = vadd.f32 %v2446_v63, %v1697_v57  ;;  %v1648_v63 = vpop.permute.xlu2 %1647 }
 0x1a8   : > { %v1908_v20 = vpop.f32.mrf.mxu0  ;;  %v1273_v28 = vadd.f32 %v1272_v18, %v1184_v17 }
 0x1a9   : > { %v1909_v36 = vadd.f32 %v3033_v37, %v1908_v20  ;;  %v1186_v42 = vpop.f32.mrf.mxu1 }
 0x1aa   : > { %v1361_v35 = vpop.f32.mrf.mxu3  ;;  %v1187_v55 = vadd.f32 %v1186_v42, %v2913_v49  ;;  %v2450_v49 = vunpack.c.l.bf16 %v2555_v60 }
 0x1ab   : > { %v1362_v43 = vadd.f32 %v1361_v35, %v1273_v28  ;;  %v1981_v38 = vmax.f32 %v1909_v36, 0.0 }
 0x1ad   : > { %v1698_v46 = vmul.f32 %v1633_v44, %v1362_v43  ;;  %v2477_v50 = vpack.c.bf16 %v1981_v38, %v1980_v26  ;;  %v1653_v44 = vpop.permute.xlu0 %1652 }
 0x1af   : > { %v1794_v51 = vadd.f32 %v2447_v41, %v1698_v46  ;;  %2560 = vst [vmem:[%s3044_s27 + $0x10] sm:$0xff] %v2477_v50   ;;  %v1275_v9 = vpop.f32.mrf.mxu2  ;;  %v2455_v41 = vunpack.c.h.bf16 %v2556_v16 }
 0x1b0   : > { %v1911_v47 = vpop.f32.mrf.mxu0  ;;  %v1276_v30 = vadd.f32 %v1275_v9, %v1187_v55 }
 0x1b1   : > { %v1814_v58 = vpack.c.bf16 %v1794_v51, %v1793_v21  ;;  %v1188_v54 = vpop.f32.mrf.mxu1  ;;  %v1912_v62 = vadd.f32 %v3033_v37, %v1911_v47 }
 0x1b2   : > { %v1364_v56 = vpop.f32.mrf.mxu3  ;;  %v1189_v2 = vadd.f32 %v1188_v54, %v2922_v1 }
 0x1b3   : > { %1950 = vmatmul.bf16.gmra.mxu0 %v1814_v58  ;;  %v1365_v59 = vadd.f32 %v1364_v56, %v1276_v30  ;;  %v1982_v23 = vmax.f32 %v1912_v62, 0.0 }
 0x1b5   : > { %v1699_v45 = vmul.f32 %v1638_v48, %v1365_v59  ;;  %v2557_v59 = vld [vmem:[%s2987_s21 + $0x70] sm:$0xff]  }
 0x1b6   : > { %v2459_v48 = vunpack.c.h.bf16 %v2557_v59 }
 0x1b7   : > { %v1277_v19 = vpop.f32.mrf.mxu2  ;;  %v1795_v1 = vadd.f32 %v2450_v49, %v1699_v45 }
 0x1b8   : > { %v1913_v61 = vpop.f32.mrf.mxu0  ;;  %v1278_v4 = vadd.f32 %v1277_v19, %v1189_v2 }
 0x1b9   : > { %v1914_v24 = vadd.f32 %v3033_v37, %v1913_v61  ;;  %v1191_v29 = vpop.f32.mrf.mxu1 }
 0x1ba   : > { %v1366_v33 = vpop.f32.mrf.mxu3  ;;  %v1192_v12 = vadd.f32 %v1191_v29, %v2934_v11  ;;  %v2454_v11 = vunpack.c.l.bf16 %v2556_v16 }
 0x1bb   : > { %v1367_v6 = vadd.f32 %v1366_v33, %v1278_v4  ;;  %v1983_v7 = vmax.f32 %v1914_v24, 0.0  ;;  %v1658_v24 = vpop.permute.xlu1 %1657 }
 0x1bd   : > { %v1700_v52 = vmul.f32 %v1643_v0, %v1367_v6  ;;  %v2482_v39 = vpack.c.bf16 %v1983_v7, %v1982_v23  ;;  %v1663_v6 = vpop.permute.xlu2 %1662 }
 0x1bf   : > { %v1796_v31 = vadd.f32 %v2451_v5, %v1700_v52  ;;  %2561 = vst [vmem:[%s3044_s27 + $0x18] sm:$0xff] %v2482_v39   ;;  %v1280_v25 = vpop.f32.mrf.mxu2 }
 0x1c0   : > { %v1916_v8 = vpop.f32.mrf.mxu0  ;;  %v1281_v15 = vadd.f32 %v1280_v25, %v1192_v12 }
 0x1c1   : > { %v1815_v32 = vpack.c.bf16 %v1796_v31, %v1795_v1  ;;  %v1193_v14 = vpop.f32.mrf.mxu1  ;;  %v1917_v17 = vadd.f32 %v3033_v37, %v1916_v8 }
 0x1c2   : > { %v1369_v13 = vpop.f32.mrf.mxu3  ;;  %v1194_v18 = vadd.f32 %v1193_v14, %v2943_v27  ;;  %v2558_v14 = vld [vmem:[%s2987_s21 + $0x78] sm:$0xff]  }
 0x1c3   : > { %1955 = vmatmul.bf16.gmra.mxu0 %v1815_v32  ;;  %v1370_v10 = vadd.f32 %v1369_v13, %v1281_v15  ;;  %v1984_v26 = vmax.f32 %v1917_v17, 0.0 }
 0x1c5   : > { %v1701_v57 = vmul.f32 %v1648_v63, %v1370_v10 }
 0x1c7   : > { %v1282_v20 = vpop.f32.mrf.mxu2  ;;  %v1797_v27 = vadd.f32 %v2454_v11, %v1701_v57 }
 0x1c8   : > { %v1918_v28 = vpop.f32.mrf.mxu0  ;;  %v1283_v35 = vadd.f32 %v1282_v20, %v1194_v18 }
 0x1c9   : > { %v1919_v40 = vadd.f32 %v3033_v37, %v1918_v28  ;;  %v1196_v42 = vpop.f32.mrf.mxu1  ;;  %v1668_v28 = vpop.permute.xlu0 %1667 }
 0x1ca   : > { %v1371_v36 = vpop.f32.mrf.mxu3  ;;  %v1197_v47 = vadd.f32 %v1196_v42, %v2952_v34  ;;  %v2458_v34 = vunpack.c.l.bf16 %v2557_v59  ;;  %v1673_v42 = vpop.permute.xlu1 %1672 }
 0x1cb   : > { %v1372_v43 = vadd.f32 %v1371_v36, %v1283_v35  ;;  %v1985_v38 = vmax.f32 %v1919_v40, 0.0  ;;  %v2462_v35 = vunpack.c.l.bf16 %v2558_v14  ;;  %v2463_v36 = vunpack.c.h.bf16 %v2558_v14 }
 0x1cd   : > { %v1702_v46 = vmul.f32 %v1653_v44, %v1372_v43  ;;  %v2487_v50 = vpack.c.bf16 %v1985_v38, %v1984_v26 }
 0x1cf   : > { %v1798_v21 = vadd.f32 %v2455_v41, %v1702_v46  ;;  %2562 = vst [vmem:[%s3044_s27 + $0x20] sm:$0xff] %v2487_v50   ;;  %v1285_v51 = vpop.f32.mrf.mxu2 }
 0x1d0   : > { %v1921_v9 = vpop.f32.mrf.mxu0  ;;  %v1286_v54 = vadd.f32 %v1285_v51, %v1197_v47 }
 0x1d1   : > { %v1816_v56 = vpack.c.bf16 %v1798_v21, %v1797_v27  ;;  %v1198_v58 = vpop.f32.mrf.mxu1  ;;  %v1922_v60 = vadd.f32 %v3033_v37, %v1921_v9 }
 0x1d2   : > { %v1374_v55 = vpop.f32.mrf.mxu3  ;;  %v1199_v62 = vadd.f32 %v1198_v58, %v2961_v53 }
 0x1d3   : > { %1960 = vmatmul.bf16.gmra.mxu0 %v1816_v56  ;;  %v1375_v30 = vadd.f32 %v1374_v55, %v1286_v54  ;;  %v1986_v29 = vmax.f32 %v1922_v60, 0.0 }
 0x1d5   : > { %v1703_v5 = vmul.f32 %v1658_v24, %v1375_v30 }
 0x1d7   : > { %v1287_v2 = vpop.f32.mrf.mxu2  ;;  %v1799_v53 = vadd.f32 %v2458_v34, %v1703_v5 }
 0x1d8   : > { %v1923_v19 = vpop.f32.mrf.mxu0  ;;  %v1288_v61 = vadd.f32 %v1287_v2, %v1199_v62 }
 0x1d9   : > { %v1924_v33 = vadd.f32 %v3033_v37, %v1923_v19  ;;  %v1201_v49 = vpop.f32.mrf.mxu1 }
 0x1da   : > { %v1376_v4 = vpop.f32.mrf.mxu3  ;;  %v1202_v31 = vadd.f32 %v1201_v49, %v2973_v3 }
 0x1db   : > { %v1377_v45 = vadd.f32 %v1376_v4, %v1288_v61  ;;  %v1987_v23 = vmax.f32 %v1924_v33, 0.0 }
 0x1dd   : > { %v1704_v7 = vmul.f32 %v1663_v6, %v1377_v45  ;;  %v2492_v0 = vpack.c.bf16 %v1987_v23, %v1986_v29 }
 0x1df   : > { %v1800_v52 = vadd.f32 %v2459_v48, %v1704_v7  ;;  %2563 = vst [vmem:[%s3044_s27 + $0x28] sm:$0xff] %v2492_v0   ;;  %v1290_v39 = vpop.f32.mrf.mxu2 }
 0x1e0   : > { %v1926_v1 = vpop.f32.mrf.mxu0  ;;  %v1291_v12 = vadd.f32 %v1290_v39, %v1202_v31 }
 0x1e1   : > { %v1817_v8 = vpack.c.bf16 %v1800_v52, %v1799_v53  ;;  %v1203_v13 = vpop.f32.mrf.mxu1  ;;  %v1927_v15 = vadd.f32 %v3033_v37, %v1926_v1 }
 0x1e2   : > { %v1379_v25 = vpop.f32.mrf.mxu3  ;;  %v1204_v10 = vadd.f32 %v1203_v13, %v2979_v22 }
 0x1e3   : > { %1965 = vmatmul.bf16.gmra.mxu0 %v1817_v8  ;;  %v1380_v32 = vadd.f32 %v1379_v25, %v1291_v12  ;;  %v1988_v63 = vmax.f32 %v1927_v15, 0.0 }
 0x1e5   : > { %v1705_v40 = vmul.f32 %v1668_v28, %v1380_v32 }
 0x1e7   : > { %v1292_v16 = vpop.f32.mrf.mxu2  ;;  %v1801_v43 = vadd.f32 %v2462_v35, %v1705_v40 }
 0x1e8   : > { %v1928_v17 = vpop.f32.mrf.mxu0  ;;  %v1293_v18 = vadd.f32 %v1292_v16, %v1204_v10 }
 0x1e9   : > { %v1929_v20 = vadd.f32 %v3033_v37, %v1928_v17 }
 0x1ea   : > { %v1381_v3 = vpop.f32.mrf.mxu3 }
 0x1eb   : > { %v1382_v11 = vadd.f32 %v1381_v3, %v1293_v18  ;;  %v1989_v41 = vmax.f32 %v1929_v20, 0.0 }
 0x1ed   : > { %v1706_v57 = vmul.f32 %v1673_v42, %v1382_v11  ;;  %v2497_v26 = vpack.c.bf16 %v1989_v41, %v1988_v63 }
 0x1ef   : > { %v1802_v22 = vadd.f32 %v2463_v36, %v1706_v57  ;;  %2564 = vst [vmem:[%s3044_s27 + $0x30] sm:$0xff] %v2497_v26  }
 0x1f0   : > { %v1931_v38 = vpop.f32.mrf.mxu0 }
 0x1f1   : > { %v1818_v44 = vpack.c.bf16 %v1802_v22, %v1801_v43  ;;  %v1932_v46 = vadd.f32 %v3033_v37, %v1931_v38 }
 0x1f3   : > { %1970 = vmatmul.bf16.gmra.mxu0 %v1818_v44  ;;  %v1990_v21 = vmax.f32 %v1932_v46, 0.0 }
 0x1f8   : > { %v1933_v50 = vpop.f32.mrf.mxu0 }
 0x1f9   : > { %v1934_v27 = vadd.f32 %v3033_v37, %v1933_v50 }
 0x1fb   : > { %v1991_v51 = vmax.f32 %v1934_v27, 0.0 }
 0x1fd   : > { %v2502_v9 = vpack.c.bf16 %v1991_v51, %v1990_v21 }
 0x1ff   : > { %2565 = vst [vmem:[%s3044_s27 + $0x38] sm:$0xff] %v2502_v9  }
 0x200   : > { %v1936_v47 = vpop.f32.mrf.mxu0 }
 0x201   : > { %v1937_v55 = vadd.f32 %v3033_v37, %v1936_v47 }
 0x203   : > { %v1992_v54 = vmax.f32 %v1937_v55, 0.0 }
 0x208   : > { %v1938_v56 = vpop.f32.mrf.mxu0 }
 0x209   : > { %v1939_v58 = vadd.f32 %v3033_v37, %v1938_v56 }
 0x20b   : > { %v1993_v30 = vmax.f32 %v1939_v58, 0.0 }
 0x20d   : > { %v2507_v59 = vpack.c.bf16 %v1993_v30, %v1992_v54 }
 0x20f   : > { %2566 = vst [vmem:[%s3044_s27 + $0x40] sm:$0xff] %v2507_v59  }
 0x210   : > { %v1941_v60 = vpop.f32.mrf.mxu0 }
 0x211   : > { %v1942_v62 = vadd.f32 %v3033_v37, %v1941_v60 }
 0x213   : > { %v1994_v61 = vmax.f32 %v1942_v62, 0.0 }
 0x218   : > { %v1943_v2 = vpop.f32.mrf.mxu0 }
 0x219   : > { %v1944_v19 = vadd.f32 %v3033_v37, %v1943_v2 }
 0x21b   : > { %v1995_v4 = vmax.f32 %v1944_v19, 0.0 }
 0x21d   : > { %v2512_v33 = vpack.c.bf16 %v1995_v4, %v1994_v61 }
 0x21f   : > { %2567 = vst [vmem:[%s3044_s27 + $0x48] sm:$0xff] %v2512_v33  }
 0x220   : > { %v1946_v24 = vpop.f32.mrf.mxu0 }
 0x221   : > { %v1947_v34 = vadd.f32 %v3033_v37, %v1946_v24 }
 0x223   : > { %v1996_v5 = vmax.f32 %v1947_v34, 0.0 }
 0x228   : > { %v1948_v48 = vpop.f32.mrf.mxu0 }
 0x229   : > { %v1949_v49 = vadd.f32 %v3033_v37, %v1948_v48 }
 0x22b   : > { %v1997_v29 = vmax.f32 %v1949_v49, 0.0 }
 0x22d   : > { %v2517_v45 = vpack.c.bf16 %v1997_v29, %v1996_v5 }
 0x22f   : > { %2568 = vst [vmem:[%s3044_s27 + $0x50] sm:$0xff] %v2517_v45  }
 0x230   : > { %v1951_v23 = vpop.f32.mrf.mxu0 }
 0x231   : > { %v1952_v6 = vadd.f32 %v3033_v37, %v1951_v23 }
 0x233   : > { %v1998_v53 = vmax.f32 %v1952_v6, 0.0 }
 0x238   : > { %v1953_v7 = vpop.f32.mrf.mxu0 }
 0x239   : > { %v1954_v0 = vadd.f32 %v3033_v37, %v1953_v7 }
 0x23b   : > { %v1999_v52 = vmax.f32 %v1954_v0, 0.0 }
 0x23d   : > { %v2522_v39 = vpack.c.bf16 %v1999_v52, %v1998_v53 }
 0x23f   : > { %2569 = vst [vmem:[%s3044_s27 + $0x58] sm:$0xff] %v2522_v39  }
 0x240   : > { %v1956_v1 = vpop.f32.mrf.mxu0 }
 0x241   : > { %v1957_v31 = vadd.f32 %v3033_v37, %v1956_v1 }
 0x243   : > { %v2000_v12 = vmax.f32 %v1957_v31, 0.0 }
 0x248   : > { %v1958_v25 = vpop.f32.mrf.mxu0 }
 0x249   : > { %v1959_v8 = vadd.f32 %v3033_v37, %v1958_v25 }
 0x24b   : > { %v2001_v13 = vmax.f32 %v1959_v8, 0.0 }
 0x24d   : > { %v2527_v32 = vpack.c.bf16 %v2001_v13, %v2000_v12 }
 0x24f   : > { %2570 = vst [vmem:[%s3044_s27 + $0x60] sm:$0xff] %v2527_v32  }
 0x250   : > { %v1961_v14 = vpop.f32.mrf.mxu0 }
 0x251   : > { %v1962_v15 = vadd.f32 %v3033_v37, %v1961_v14 }
 0x253   : > { %v2002_v17 = vmax.f32 %v1962_v15, 0.0 }
 0x258   : > { %v1963_v10 = vpop.f32.mrf.mxu0 }
 0x259   : > { %v1964_v16 = vadd.f32 %v3033_v37, %v1963_v10 }
 0x25b   : > { %v2003_v18 = vmax.f32 %v1964_v16, 0.0 }
 0x25d   : > { %v2532_v20 = vpack.c.bf16 %v2003_v18, %v2002_v17 }
 0x25f   : > { %2571 = vst [vmem:[%s3044_s27 + $0x68] sm:$0xff] %v2532_v20  }
 0x260   : > { %v1966_v28 = vpop.f32.mrf.mxu0 }
 0x261   : > { %v1967_v35 = vadd.f32 %v3033_v37, %v1966_v28 }
 0x263   : > { %v2004_v40 = vmax.f32 %v1967_v35, 0.0 }
 0x268   : > { %v1968_v3 = vpop.f32.mrf.mxu0 }
 0x269   : > { %v1969_v36 = vadd.f32 %v3033_v37, %v1968_v3 }
 0x26b   : > { %v2005_v63 = vmax.f32 %v1969_v36, 0.0 }
 0x26d   : > { %v2537_v11 = vpack.c.bf16 %v2005_v63, %v2004_v40 }
 0x26f   : > { %2572 = vst [vmem:[%s3044_s27 + $0x70] sm:$0xff] %v2537_v11  }
 0x270   : > { %v1971_v41 = vpop.f32.mrf.mxu0 }
 0x271   : > { %v1972_v42 = vadd.f32 %v3033_v37, %v1971_v41 }
 0x273   : > { %v2006_v43 = vmax.f32 %v1972_v42, 0.0 }
 0x278   : > { %v1973_v57 = vpop.f32.mrf.mxu0 }
 0x279   : > { %v1974_v26 = vadd.f32 %v3033_v37, %v1973_v57 }
 0x27b   : > { %v2007_v22 = vmax.f32 %v1974_v26, 0.0 }
 0x27d   : > { %v2542_v38 = vpack.c.bf16 %v2007_v22, %v2006_v43 }
 0x27f   : > { %2573 = vst [vmem:[%s3044_s27 + $0x78] sm:$0xff] %v2542_v38  }
 0x280 PF: > { %s16_s23 = sadd.s32 1, %s2649_s23   ;;  %s3126_s21 = smov %s2645_s22 }
 0x281   : > { %p13_p6 = scmp.ge.s32.totalorder %s16_s23, 4   ;;  %s3127_s22 = smov %s3129_s24 }
 0x283   :  { %15 = sbr.rel (!%p13_p6) target bundleno = 2 (0x2), region = 91 }

// kernel: ginemb_forward_prepared.5
= control target key start
LH: loop header
LB: loop body
LE: loop exit
PB: predicated region body
PF: predicated region fallthrough
CT: control target
= control target key end

     0   :  { %11 = vsyncpa [#allocation4], 0  ;;  %s3150_s0 = inlined_call_operand.vmem [shape: s8[512,512], index: 0, kind: input, shape index: {}]   ;;  %s3151_s1 = inlined_call_operand.vmem [shape: bf16[512,128], index: 1, kind: input, shape index: {}, may-alias: {1,2}]   ;;  %s3152_s2 = inlined_call_operand.vmem [shape: bf16[512,128], index: 2, kind: input, shape index: {}, may-alias: {1,2}]   ;;  %s3153_s3 = inlined_call_operand.vmem [shape: f32[512,1], index: 3, kind: input, shape index: {}]   ;;  %s3154_s4 = inlined_call_operand.vmem [shape: bf16[128,128], index: 4, kind: input, shape index: {}]   ;;  %s3155_s5 = inlined_call_operand.vmem [shape: f32[1,128], index: 5, kind: input, shape index: {}]   ;;  %s3156_s6 = inlined_call_operand.hbm [shape: f32[512,128], index: 6, kind: output, shape index: {}]  }
   0x1   :  { %13 = vsyncpa [#allocation4 + $0x1], 0  ;;  %s2641_s21 = smov 0   ;;  %s2643_s22 = smov 0  }
   0x2   :  { %s2645_s23 = smov 0   ;;  %s2647_s24 = smov 0  }
   0x3   :  { %s2649_s25 = smov 0   ;;  %s2651_s26 = smov 0  }
   0x4 LB: > { %s2137_s27 = sadd.s32 4294967295, %s2601_s26   ;;  %s2138_s28 = sadd.s32 4294967294, %s2601_s26   ;;  %s2601_s26 = sphi %s2651_s26, %s19_s26   ;;  %s2597_s25 = sphi %s2649_s25, %s3163_s25   ;;  %s2593_s24 = sphi %s2647_s24, %s3162_s24   ;;  %s2589_s23 = sphi %s2645_s23, %s3161_s23   ;;  %s2585_s22 = sphi %s2643_s22, %s3160_s22   ;;  %s2581_s21 = sphi %s2641_s21, %s3159_s21  }
   0x5   : > { %s31_s29 = sadd.s32 1, %s2597_s25  ;;  %s186_s30 = sadd.s32 1, %s2589_s23 }
   0x6   : > { %p33_p0 = scmp.ge.s32.totalorder %s31_s29, 2  ;;  %p196_p1 = scmp.ne.s32.totalorder %s2589_s23, %s2585_s22 }
   0x7   : > { %p197_p2 = scmp.eq.s32.totalorder %s2137_s27, 1  ;;  %p202_p3 = scmp.ne.s32.totalorder %s2585_s22, %s2581_s21 }
   0x8   : > { %s3165_s29 = smov (%p33_p0, %s31_s29), 0  ;;  %p203_p5 = scmp.eq.s32.totalorder %s2138_s28, 1 }
   0x9   : > { %p2681_p4 = por %p197_p2, %p196_p1  ;;  %s183_s8 = ssub.s32 %s2597_s25, %s3165_s29 }
   0xa   : > { %p2142_p6 = scmp.ge.s32.totalorder %s2601_s26, 1  ;;  %p184_p7 = scmp.eq.s32.totalorder %s183_s8, 0 }
   0xb   : > { %p2688_p8 = por %p203_p5, %p202_p3  ;;  %p269_p9 = scmp.lt.s32.totalorder %s2601_s26, 3 }
   0xc   : > { %s2694_s10 = scalar_select %p184_p7, %s2589_s23, %s186_s30  }
   0xd   : > { %p270_p10 = pnand %p2142_p6, %p269_p9 }
   0xe   : > { %s2144_s13 = sshll.u32 (!%p270_p10), %s2593_s24, 3  ;;  %s2147_s14 = sshll.u32 (!%p270_p10), %s2593_s24, 5 }
   0xf   : > { %273 = sbr.rel (%p270_p10) target bundleno = 647 (0x287), region = 44  ;;  %p338_p11 = scmp.lt.s32.totalorder (!%p270_p10), %s2147_s14, 63 }
  0x10   : > { %p321_p12 = scmp.lt.s32.totalorder (!%p270_p10), %s2144_s13, 15  ;;  %s2357_s16 = sshll.u32 (!%p270_p10), %s2593_s24, 8 }
  0x14   : > { %v2324_v0 = vld [vmem:[%s3151_s1 + $0x38] sm:$0xff]  ;;  %v2323_v1 = vld [vmem:[%s3151_s1 + $0x30] sm:$0xff]  ;;  %v2603_v2 = vmov 0   ;;  %s3167_s14 = smov (!%p338_p11, %s2147_s14), 63  ;;  %v2322_v3 = vld [vmem:[%s3151_s1 + $0x28] sm:$0xff]  ;;  %s3169_s13 = smov (!%p321_p12, %s2144_s13), 15 }
  0x15   : > { %2437 = vmatpush.bf16.msra.mxu1 %v2324_v0  ;;  %2438 = vmatpush.bf16.msra.mxu2 %v2324_v0  ;;  %s2150_s19 = sshll.u32 %s3167_s14, 3  ;;  %v2321_v5 = vld [vmem:[%s3151_s1 + $0x20] sm:$0xff]  ;;  %s2316_s11 = sshll.u32 %s3169_s13, 5  ;;  %v2320_v6 = vld [vmem:[%s3151_s1 + $0x18] sm:$0xff]  ;;  %v2319_v8 = vld [vmem:[%s3151_s1 + $0x10] sm:$0xff] }
  0x16   : > { %2439 = vmatpush.bf16.msra.mxu3 %v2324_v0  ;;  %2519 = vset.pattern.permute.xlu0 %v2603_v2  ;;  %s2713_s28 = scalar_lea.vmem %s3153_s3, %s2150_s19  ;;  %s2726_s18 = scalar_lea.vmem %s3150_s0, %s2316_s11  ;;  %v2318_v17 = vld [vmem:[%s3151_s1 + $0x8] sm:$0xff]  ;;  %v2317_v26 = vld [vmem:[%s3151_s1] sm:$0xff]  ;;  %v2340_v29 = vld [vmem:[%s3151_s1 + $0xb8] sm:$0xff] }
  0x17   : > { %2520 = vset.pattern.permute.xlu1 %v2603_v2  ;;  %1026 = vmatpush.bf16.msra.mxu0 %v2324_v0  ;;  %v1449_v4 = vld [vmem:[%s2713_s28] sm:$0xff]  ;;  %v1450_v7 = vld [vmem:[%s2713_s28 + $0x8] sm:$0xff]  ;;  %v1451_v12 = vld [vmem:[%s2713_s28 + $0x10] sm:$0xff]  ;;  %s2148_s20 = sshll.u32 %s3167_s14, 2  ;;  %s316_s14 = sand.u32 1, %s2585_s22  }
  0x18   : > { %2521 = vset.pattern.permute.xlu2 %v2603_v2  ;;  %1515 = vperm.xlu0 %2519, %v1449_v4   ;;  %v2732_v9 = vld [vmem:[%s2726_s18 + $0x40] sm:$0xff]  ;;  %v1455_v20 = vld [vmem:[%s2713_s28 + $0x30] sm:$0xff]  ;;  %v1452_v25 = vld [vmem:[%s2713_s28 + $0x18] sm:$0xff]  ;;  %s2974_s8 = scalar_lea.vmem %s3152_s2, %s2148_s20  ;;  %s2007_s27 = scalar_lea.sflag [#allocation4], %s316_s14 }
  0x19   : > { %2440 = vmatpush.bf16.msra.mxu1 %v2323_v1  ;;  %2441 = vmatpush.bf16.msra.mxu2 %v2323_v1  ;;  %v2735_v10 = vld [vmem:[%s2726_s18 + $0x80] sm:$0xff]  ;;  %v450_v13 = vunpack.c.0.s8 %v2732_v9  ;;  %v454_v14 = vunpack.c.1.s8 %v2732_v9  ;;  %v2348_v30 = vld [vmem:[%s3151_s1 + $0xf8] sm:$0xff]  ;;  %v2339_v35 = vld [vmem:[%s3151_s1 + $0xb0] sm:$0xff]  ;;  %v458_v43 = vunpack.c.2.s8 %v2732_v9  ;;  %v462_v44 = vunpack.c.3.s8 %v2732_v9  ;;  %s2543_s11 = scalar_lea.hbm %s3156_s6, 512 }
  0x1a   : > { %2442 = vmatpush.bf16.msra.mxu3 %v2323_v1  ;;  %v2738_v11 = vld [vmem:[%s2726_s18 + $0xc0] sm:$0xff]  ;;  %1525 = vperm.xlu1 %2520, %v1451_v12   ;;  %v482_v15 = vunpack.c.0.s8 %v2735_v10  ;;  %v486_v16 = vunpack.c.1.s8 %v2735_v10  ;;  %v2332_v31 = vld [vmem:[%s3151_s1 + $0x78] sm:$0xff]  ;;  %v1458_v36 = vld [vmem:[%s2713_s28 + $0x48] sm:$0xff]  ;;  %v490_v45 = vunpack.c.2.s8 %v2735_v10  ;;  %v494_v46 = vunpack.c.3.s8 %v2735_v10 }
  0x1b   : > { %1027 = vmatpush.bf16.msra.mxu0 %v2323_v1  ;;  %v514_v18 = vunpack.c.0.s8 %v2738_v11  ;;  %v518_v19 = vunpack.c.1.s8 %v2738_v11  ;;  %v578_v21 = vcvt.s32.f32 %v450_v13  ;;  %v582_v22 = vcvt.s32.f32 %v454_v14  ;;  %v2347_v37 = vld [vmem:[%s3151_s1 + $0xf0] sm:$0xff]  ;;  %v2338_v39 = vld [vmem:[%s3151_s1 + $0xa8] sm:$0xff]  ;;  %v1456_v40 = vld [vmem:[%s2713_s28 + $0x38] sm:$0xff] }
  0x1c   : > { %v610_v23 = vcvt.s32.f32 %v482_v15  ;;  %v614_v24 = vcvt.s32.f32 %v486_v16  ;;  %v2331_v38 = vld [vmem:[%s3151_s1 + $0x70] sm:$0xff]  ;;  %v2346_v41 = vld [vmem:[%s3151_s1 + $0xe8] sm:$0xff]  ;;  %v522_v47 = vunpack.c.2.s8 %v2738_v11  ;;  %v526_v48 = vunpack.c.3.s8 %v2738_v11  ;;  %v2337_v49 = vld [vmem:[%s3151_s1 + $0xa0] sm:$0xff] }
  0x1d   : > { %2443 = vmatpush.bf16.msra.mxu1 %v2322_v3  ;;  %2444 = vmatpush.bf16.msra.mxu2 %v2322_v3  ;;  %v642_v27 = vcvt.s32.f32 %v514_v18  ;;  %v646_v28 = vcvt.s32.f32 %v518_v19  ;;  %v690_v32 = vpack.c.bf16 %v582_v22, %v578_v21  ;;  %v2330_v42 = vld [vmem:[%s3151_s1 + $0x68] sm:$0xff]  ;;  %v1461_v50 = vld [vmem:[%s2713_s28 + $0x60] sm:$0xff]  ;;  %v586_v53 = vcvt.s32.f32 %v458_v43  ;;  %v1459_v59 = vld [vmem:[%s2713_s28 + $0x50] sm:$0xff] }
  0x1e   : > { %2445 = vmatpush.bf16.msra.mxu3 %v2322_v3  ;;  %v706_v33 = vpack.c.bf16 %v614_v24, %v610_v23  ;;  %v2345_v51 = vld [vmem:[%s3151_s1 + $0xe0] sm:$0xff]  ;;  %v590_v54 = vcvt.s32.f32 %v462_v44  ;;  %v618_v55 = vcvt.s32.f32 %v490_v45  ;;  %v622_v56 = vcvt.s32.f32 %v494_v46  ;;  %v2336_v60 = vld [vmem:[%s3151_s1 + $0x98] sm:$0xff]  ;;  %v2335_v2 = vld [vmem:[%s3151_s1 + $0x90] sm:$0xff] }
  0x1f   : > { %1028 = vmatpush.bf16.msra.mxu0 %v2322_v3  ;;  %v722_v34 = vpack.c.bf16 %v646_v28, %v642_v27  ;;  %v2329_v52 = vld [vmem:[%s3151_s1 + $0x60] sm:$0xff]  ;;  %v650_v57 = vcvt.s32.f32 %v522_v47  ;;  %v654_v58 = vcvt.s32.f32 %v526_v48  ;;  %v2344_v61 = vld [vmem:[%s3151_s1 + $0xd8] sm:$0xff]  ;;  %v2343_v4 = vld [vmem:[%s3151_s1 + $0xd0] sm:$0xff] }
  0x20   : > { %1520 = vperm.xlu0 %2519, %v1450_v7   ;;  %v2328_v62 = vld [vmem:[%s3151_s1 + $0x58] sm:$0xff]  ;;  %v694_v63 = vpack.c.bf16 %v590_v54, %v586_v53  ;;  %v710_v0 = vpack.c.bf16 %v622_v56, %v618_v55  ;;  %v2824_v7 = vld [vmem:[%s2726_s18 + $0xa0] sm:$0xff]  ;;  %v2334_v9 = vld [vmem:[%s3151_s1 + $0x88] sm:$0xff] }
  0x21   : > { %2446 = vmatpush.bf16.msra.mxu1 %v2321_v5  ;;  %2447 = vmatpush.bf16.msra.mxu2 %v2321_v5  ;;  %v726_v1 = vpack.c.bf16 %v654_v58, %v650_v57  ;;  %v1464_v3 = vld [vmem:[%s2713_s28 + $0x78] sm:$0xff]  ;;  %v1462_v10 = vld [vmem:[%s2713_s28 + $0x68] sm:$0xff]  ;;  %v386_v15 = vld [vmem:[%s2726_s18] sm:$0xff]  ;;  %v498_v16 = vunpack.c.0.s8 %v2824_v7  ;;  %v506_v48 = vunpack.c.2.s8 %v2824_v7 }
  0x22   : > { %2448 = vmatpush.bf16.msra.mxu3 %v2321_v5  ;;  %1530 = vperm.xlu1 %2520, %v1452_v25   ;;  %v2342_v13 = vld [vmem:[%s3151_s1 + $0xc8] sm:$0xff]  ;;  %v418_v18 = vunpack.c.0.s8 %v386_v15  ;;  %v422_v19 = vunpack.c.1.s8 %v386_v15  ;;  %v1467_v22 = vld [vmem:[%s2713_s28 + $0x90] sm:$0xff]  ;;  %v2333_v23 = vld [vmem:[%s3151_s1 + $0x80] sm:$0xff]  ;;  %v430_v43 = vunpack.c.3.s8 %v386_v15 }
  0x23   : > { %1029 = vmatpush.bf16.msra.mxu0 %v2321_v5  ;;  %v2327_v5 = vld [vmem:[%s3151_s1 + $0x50] sm:$0xff]  ;;  %v2326_v14 = vld [vmem:[%s3151_s1 + $0x48] sm:$0xff]  ;;  %v2341_v27 = vld [vmem:[%s3151_s1 + $0xc0] sm:$0xff]  ;;  %v634_v57 = vcvt.s32.f32 %v506_v48 }
  0x24   : > { %v546_v24 = vcvt.s32.f32 %v418_v18  ;;  %v550_v25 = vcvt.s32.f32 %v422_v19  ;;  %v2325_v28 = vld [vmem:[%s3151_s1 + $0x40] sm:$0xff]  ;;  %v558_v45 = vcvt.s32.f32 %v430_v43  ;;  %v1454_v54 = vld [vmem:[%s2713_s28 + $0x28] sm:$0xff]  ;;  %v1479_v18 = vld [vmem:[%s2713_s28 + $0xf0] sm:$0xff] }
  0x25   : > { %2449 = vmatpush.bf16.msra.mxu1 %v2320_v6  ;;  %2450 = vmatpush.bf16.msra.mxu2 %v2320_v6 }
  0x26   : > { %2451 = vmatpush.bf16.msra.mxu3 %v2320_v6 }
  0x27   : > { %1030 = vmatpush.bf16.msra.mxu0 %v2320_v6  ;;  %v2821_v6 = vld [vmem:[%s2726_s18 + $0x60] sm:$0xff] }
  0x28   : > { %1545 = vperm.xlu0 %2519, %v1455_v20   ;;  %v466_v11 = vunpack.c.0.s8 %v2821_v6  ;;  %v470_v12 = vunpack.c.1.s8 %v2821_v6  ;;  %v474_v46 = vunpack.c.2.s8 %v2821_v6  ;;  %v478_v47 = vunpack.c.3.s8 %v2821_v6  ;;  %v389_v6 = vld [vmem:[%s2726_s18 + $0x18] sm:$0xff] }
  0x29   : > { %2452 = vmatpush.bf16.msra.mxu1 %v2319_v8  ;;  %2453 = vmatpush.bf16.msra.mxu2 %v2319_v8 }
  0x2a   : > { %2454 = vmatpush.bf16.msra.mxu3 %v2319_v8  ;;  %1550 = vperm.xlu1 %2520, %v1456_v40   ;;  %v1453_v40 = vld [vmem:[%s2713_s28 + $0x20] sm:$0xff]  ;;  %v602_v55 = vcvt.s32.f32 %v474_v46  ;;  %v606_v56 = vcvt.s32.f32 %v478_v47 }
  0x2b   : > { %1031 = vmatpush.bf16.msra.mxu0 %v2319_v8  ;;  %v2827_v8 = vld [vmem:[%s2726_s18 + $0xe0] sm:$0xff]  ;;  %1535 = vperm.xlu2 %2521, %v1453_v40  }
  0x2c   : > { %v530_v20 = vunpack.c.0.s8 %v2827_v8  ;;  %v534_v21 = vunpack.c.1.s8 %v2827_v8 }
  0x2d   : > { %2455 = vmatpush.bf16.msra.mxu1 %v2318_v17  ;;  %2456 = vmatpush.bf16.msra.mxu2 %v2318_v17 }
  0x2e   : > { %2457 = vmatpush.bf16.msra.mxu3 %v2318_v17 }
  0x2f   : > { %1032 = vmatpush.bf16.msra.mxu0 %v2318_v17  ;;  %v502_v17 = vunpack.c.1.s8 %v2824_v7 }
  0x30   : > { %1560 = vperm.xlu0 %2519, %v1458_v36  }
  0x31   : > { %2458 = vmatpush.bf16.msra.mxu1 %v2317_v26  ;;  %2459 = vmatpush.bf16.msra.mxu2 %v2317_v26 }
  0x32   : > { %2460 = vmatpush.bf16.msra.mxu3 %v2317_v26  ;;  %1565 = vperm.xlu1 %2520, %v1459_v59  }
  0x33   : > { %1033 = vmatpush.bf16.msra.mxu0 %v2317_v26  ;;  %v594_v26 = vcvt.s32.f32 %v466_v11  ;;  %1540 = vperm.xlu2 %2521, %v1454_v54   ;;  %v391_v54 = vld [vmem:[%s2726_s18 + $0x28] sm:$0xff] }
  0x34   : > { %1054 = vmatmul.bf16.vlgmr.msra.gmra.mxu1 %v690_v32  ;;  %1074 = vmatmul.bf16.vlgmr.msra.gmra.mxu2 %v706_v33  ;;  %v674_v32 = vpack.c.bf16 %v550_v25, %v546_v24  ;;  %v658_v33 = vcvt.s32.f32 %v530_v20  ;;  %v1460_v20 = vld [vmem:[%s2713_s28 + $0x58] sm:$0xff] }
  0x35   : > { %1204 = vmatpush.bf16.msrb.mxu2 %v2340_v29  ;;  %1115 = vmatpush.bf16.msrb.mxu1 %v2332_v31  ;;  %v598_v29 = vcvt.s32.f32 %v470_v12  ;;  %v630_v31 = vcvt.s32.f32 %v502_v17 }
  0x36   : > { %1293 = vmatpush.bf16.msrb.mxu3 %v2348_v30  ;;  %v626_v30 = vcvt.s32.f32 %v498_v16  ;;  %1034 = vmatmul.bf16.vlgmr.msra.gmra.mxu0 %v674_v32  ;;  %v1480_v32 = vld [vmem:[%s2713_s28 + $0xf8] sm:$0xff] }
  0x37   : > { %1094 = vmatmul.bf16.vlgmr.msra.gmra.mxu3 %v722_v34  ;;  %v662_v34 = vcvt.s32.f32 %v534_v21  ;;  %v698_v36 = vpack.c.bf16 %v598_v29, %v594_v26 }
  0x38   : > { %1575 = vperm.xlu0 %2519, %v1461_v50   ;;  %v538_v50 = vunpack.c.2.s8 %v2827_v8 }
  0x39   : > { %1205 = vmatpush.bf16.msrb.mxu2 %v2339_v35  ;;  %1116 = vmatpush.bf16.msrb.mxu1 %v2331_v38  ;;  %v1465_v35 = vld [vmem:[%s2713_s28 + $0x80] sm:$0xff]  ;;  %v730_v38 = vpack.c.bf16 %v662_v34, %v658_v33 }
  0x3a   : > { %1294 = vmatpush.bf16.msrb.mxu3 %v2347_v37  ;;  %1580 = vperm.xlu1 %2520, %v1462_v10   ;;  %v714_v37 = vpack.c.bf16 %v630_v31, %v626_v30  ;;  %v666_v59 = vcvt.s32.f32 %v538_v50  ;;  %v1463_v31 = vld [vmem:[%s2713_s28 + $0x70] sm:$0xff] }
  0x3d   : > { %1206 = vmatpush.bf16.msrb.mxu2 %v2338_v39  ;;  %1117 = vmatpush.bf16.msrb.mxu1 %v2330_v42  ;;  %v1470_v39 = vld [vmem:[%s2713_s28 + $0xa8] sm:$0xff]  ;;  %v426_v42 = vunpack.c.2.s8 %v386_v15  ;;  %v425_v15 = vunpack.c.1.s8 %v389_v6 }
  0x3e   : > { %1295 = vmatpush.bf16.msrb.mxu3 %v2346_v41  ;;  %v1468_v41 = vld [vmem:[%s2713_s28 + $0x98] sm:$0xff] }
  0x3f   : > { %v554_v44 = vcvt.s32.f32 %v426_v42  ;;  %v553_v26 = vcvt.s32.f32 %v425_v15  ;;  %v433_v42 = vunpack.c.3.s8 %v389_v6 }
  0x40   : > { %1590 = vperm.xlu0 %2519, %v1464_v3   ;;  %v388_v3 = vld [vmem:[%s2726_s18 + $0x10] sm:$0xff] }
  0x41   : > { %1207 = vmatpush.bf16.msrb.mxu2 %v2337_v49  ;;  %1118 = vmatpush.bf16.msrb.mxu1 %v2329_v52  ;;  %v510_v49 = vunpack.c.3.s8 %v2824_v7  ;;  %v1473_v52 = vld [vmem:[%s2713_s28 + $0xc0] sm:$0xff]  ;;  %v678_v53 = vpack.c.bf16 %v558_v45, %v554_v44  ;;  %v420_v12 = vunpack.c.0.s8 %v388_v3  ;;  %v432_v40 = vunpack.c.3.s8 %v388_v3  ;;  %v1466_v44 = vld [vmem:[%s2713_s28 + $0x88] sm:$0xff] }
  0x42   : > { %1296 = vmatpush.bf16.msrb.mxu3 %v2345_v51  ;;  %1595 = vperm.xlu1 %2520, %v1465_v35   ;;  %v542_v51 = vunpack.c.3.s8 %v2827_v8  ;;  %v390_v7 = vld [vmem:[%s2726_s18 + $0x20] sm:$0xff]  ;;  %v561_v50 = vcvt.s32.f32 %v433_v42 }
  0x43   : > { %v638_v58 = vcvt.s32.f32 %v510_v49  ;;  %v434_v8 = vunpack.c.0.s8 %v390_v7  ;;  %v442_v33 = vunpack.c.2.s8 %v390_v7  ;;  %v446_v34 = vunpack.c.3.s8 %v390_v7 }
  0x44   : > { %1059 = vmatmul.bf16.gmra.mxu1 %v694_v63  ;;  %1079 = vmatmul.bf16.gmra.mxu2 %v710_v0  ;;  %v560_v48 = vcvt.s32.f32 %v432_v40 }
  0x45   : > { %1208 = vmatpush.bf16.msrb.mxu2 %v2336_v60  ;;  %1119 = vmatpush.bf16.msrb.mxu1 %v2328_v62  ;;  %v670_v60 = vcvt.s32.f32 %v542_v51  ;;  %v702_v62 = vpack.c.bf16 %v606_v56, %v602_v55  ;;  %v718_v63 = vpack.c.bf16 %v638_v58, %v634_v57  ;;  %v562_v16 = vcvt.s32.f32 %v434_v8  ;;  %v392_v55 = vld [vmem:[%s2726_s18 + $0x30] sm:$0xff]  ;;  %v1469_v56 = vld [vmem:[%s2713_s28 + $0xa0] sm:$0xff]  ;;  %v393_v57 = vld [vmem:[%s2726_s18 + $0x38] sm:$0xff] }
  0x46   : > { %1297 = vmatpush.bf16.msrb.mxu3 %v2344_v61  ;;  %v1471_v61 = vld [vmem:[%s2713_s28 + $0xb0] sm:$0xff]  ;;  %1039 = vmatmul.bf16.gmra.mxu0 %v678_v53  ;;  %v570_v35 = vcvt.s32.f32 %v442_v33  ;;  %v435_v58 = vunpack.c.0.s8 %v391_v54  ;;  %v445_v15 = vunpack.c.2.s8 %v393_v57 }
  0x47   : > { %1099 = vmatmul.bf16.gmra.mxu3 %v726_v1  ;;  %v734_v0 = vpack.c.bf16 %v670_v60, %v666_v59  ;;  %v1476_v1 = vld [vmem:[%s2713_s28 + $0xd8] sm:$0xff]  ;;  %v439_v59 = vunpack.c.1.s8 %v391_v54  ;;  %v436_v60 = vunpack.c.0.s8 %v392_v55 }
  0x48   : > { %1605 = vperm.xlu0 %2519, %v1467_v22  }
  0x49   : > { %1209 = vmatpush.bf16.msrb.mxu2 %v2335_v2  ;;  %1120 = vmatpush.bf16.msrb.mxu1 %v2327_v5  ;;  %v387_v2 = vld [vmem:[%s2726_s18 + $0x8] sm:$0xff] }
  0x4a   : > { %1298 = vmatpush.bf16.msrb.mxu3 %v2343_v4  ;;  %1610 = vperm.xlu1 %2520, %v1468_v41   ;;  %v1457_v4 = vld [vmem:[%s2713_s28 + $0x40] sm:$0xff]  ;;  %v1474_v5 = vld [vmem:[%s2713_s28 + $0xc8] sm:$0xff]  ;;  %v419_v10 = vunpack.c.0.s8 %v387_v2  ;;  %v423_v11 = vunpack.c.1.s8 %v387_v2  ;;  %v429_v41 = vunpack.c.2.s8 %v389_v6 }
  0x4b   : > { %1555 = vperm.xlu2 %2521, %v1457_v4  }
  0x4c   : > { %v547_v21 = vcvt.s32.f32 %v419_v10  ;;  %v551_v22 = vcvt.s32.f32 %v423_v11  ;;  %v557_v49 = vcvt.s32.f32 %v429_v41  ;;  %v443_v10 = vunpack.c.2.s8 %v391_v54 }
  0x4d   : > { %1210 = vmatpush.bf16.msrb.mxu2 %v2334_v9  ;;  %1121 = vmatpush.bf16.msrb.mxu1 %v2326_v14  ;;  %v438_v9 = vunpack.c.1.s8 %v390_v7  ;;  %v421_v14 = vunpack.c.0.s8 %v389_v6  ;;  %v447_v11 = vunpack.c.3.s8 %v391_v54 }
  0x4e   : > { %1299 = vmatpush.bf16.msrb.mxu3 %v2342_v13  ;;  %v424_v13 = vunpack.c.1.s8 %v388_v3  ;;  %v681_v53 = vpack.c.bf16 %v561_v50, %v557_v49 }
  0x4f   : > { %v566_v17 = vcvt.s32.f32 %v438_v9  ;;  %v549_v25 = vcvt.s32.f32 %v421_v14  ;;  %v1475_v14 = vld [vmem:[%s2713_s28 + $0xd0] sm:$0xff] }
  0x50   : > { %1620 = vperm.xlu0 %2519, %v1470_v39   ;;  %v552_v24 = vcvt.s32.f32 %v424_v13  ;;  %v428_v39 = vunpack.c.2.s8 %v388_v3  ;;  %v564_v3 = vcvt.s32.f32 %v436_v60  ;;  %v448_v13 = vunpack.c.3.s8 %v392_v55 }
  0x51   : > { %1211 = vmatpush.bf16.msrb.mxu2 %v2333_v23  ;;  %1122 = vmatpush.bf16.msrb.mxu1 %v2325_v28  ;;  %v682_v19 = vpack.c.bf16 %v566_v17, %v562_v16  ;;  %v548_v23 = vcvt.s32.f32 %v420_v12  ;;  %v675_v28 = vpack.c.bf16 %v551_v22, %v547_v21  ;;  %v677_v30 = vpack.c.bf16 %v553_v26, %v549_v25  ;;  %v1478_v25 = vld [vmem:[%s2713_s28 + $0xe8] sm:$0xff] }
  0x52   : > { %1300 = vmatpush.bf16.msrb.mxu3 %v2341_v27  ;;  %1625 = vperm.xlu1 %2520, %v1471_v61   ;;  %v1477_v27 = vld [vmem:[%s2713_s28 + $0xe0] sm:$0xff]  ;;  %v556_v47 = vcvt.s32.f32 %v428_v39  ;;  %v440_v61 = vunpack.c.1.s8 %v392_v55  ;;  %v444_v12 = vunpack.c.2.s8 %v392_v55  ;;  %v449_v16 = vunpack.c.3.s8 %v393_v57 }
  0x53   : > { %1570 = vperm.xlu2 %2521, %v1460_v20   ;;  %v676_v29 = vpack.c.bf16 %v552_v24, %v548_v23  ;;  %v571_v17 = vcvt.s32.f32 %v443_v10  ;;  %v576_v20 = vcvt.s32.f32 %v448_v13  ;;  %v573_v21 = vcvt.s32.f32 %v445_v15 }
  0x54   : > { %1064 = vmatmul.bf16.gmra.mxu1 %v698_v36  ;;  %1084 = vmatmul.bf16.gmra.mxu2 %v714_v37  ;;  %v574_v36 = vcvt.s32.f32 %v446_v34  ;;  %v427_v37 = vunpack.c.2.s8 %v387_v2  ;;  %v568_v4 = vcvt.s32.f32 %v440_v61  ;;  %v577_v22 = vcvt.s32.f32 %v449_v16 }
  0x56   : > { %1044 = vmatmul.bf16.gmra.mxu0 %v682_v19  ;;  %v686_v43 = vpack.c.bf16 %v574_v36, %v570_v35  ;;  %v555_v45 = vcvt.s32.f32 %v427_v37  ;;  %v684_v8 = vpack.c.bf16 %v568_v4, %v564_v3  ;;  %v572_v19 = vcvt.s32.f32 %v444_v12  ;;  %v2356_v36 = vld [vmem:[%s3154_s4 + $0x38] sm:$0xff] }
  0x57   : > { %1104 = vmatmul.bf16.gmra.mxu3 %v730_v38  ;;  %v431_v38 = vunpack.c.3.s8 %v387_v2  ;;  %v567_v2 = vcvt.s32.f32 %v439_v59  ;;  %v689_v26 = vpack.c.bf16 %v577_v22, %v573_v21  ;;  %1885 = vmatpush.bf16.msrb.mxu0 %v2356_v36 }
  0x58   : > { %1635 = vperm.xlu0 %2519, %v1473_v52   ;;  %v680_v52 = vpack.c.bf16 %v560_v48, %v556_v47  ;;  %v688_v24 = vpack.c.bf16 %v576_v20, %v572_v19  ;;  %v2355_v47 = vld [vmem:[%s3154_s4 + $0x30] sm:$0xff]  ;;  %v2352_v19 = vld [vmem:[%s3154_s4 + $0x18] sm:$0xff] }
  0x59   : > { %v559_v46 = vcvt.s32.f32 %v431_v38 }
  0x5a   : > { %1640 = vperm.xlu1 %2520, %v1474_v5  }
  0x5b   : > { %1585 = vperm.xlu2 %2521, %v1463_v31   ;;  %v679_v51 = vpack.c.bf16 %v559_v46, %v555_v45  ;;  %1886 = vmatpush.bf16.msrb.mxu0 %v2355_v47 }
  0x60   : > { %1650 = vperm.xlu0 %2519, %v1476_v1   ;;  %v563_v1 = vcvt.s32.f32 %v435_v58 }
  0x62   : > { %1655 = vperm.xlu1 %2520, %v1477_v27   ;;  %v683_v7 = vpack.c.bf16 %v567_v2, %v563_v1  ;;  %v395_v27 = vld [vmem:[%s2726_s18 + $0x48] sm:$0xff] }
  0x63   : > { %1600 = vperm.xlu2 %2521, %v1466_v44   ;;  %v455_v31 = vunpack.c.1.s8 %v395_v27  ;;  %v459_v50 = vunpack.c.2.s8 %v395_v27 }
  0x64   : > { %1069 = vmatmul.bf16.gmra.mxu1 %v702_v62  ;;  %1089 = vmatmul.bf16.gmra.mxu2 %v718_v63  ;;  %v437_v62 = vunpack.c.0.s8 %v393_v57  ;;  %v441_v63 = vunpack.c.1.s8 %v393_v57  ;;  %v2354_v57 = vld [vmem:[%s3154_s4 + $0x28] sm:$0xff] }
  0x65   : > { %v583_v38 = vcvt.s32.f32 %v455_v31  ;;  %1887 = vmatpush.bf16.msrb.mxu0 %v2354_v57  ;;  %v587_v58 = vcvt.s32.f32 %v459_v50 }
  0x66   : > { %1049 = vmatmul.bf16.gmra.mxu0 %v686_v43  ;;  %v565_v5 = vcvt.s32.f32 %v437_v62  ;;  %v569_v6 = vcvt.s32.f32 %v441_v63 }
  0x67   : > { %1109 = vmatmul.bf16.gmra.mxu3 %v734_v0  ;;  %v1472_v0 = vld [vmem:[%s2713_s28 + $0xb8] sm:$0xff]  ;;  %s2018_s28 = scalar_lea.hbm %s3156_s6, %s2357_s16 }
  0x68   : > { %1665 = vperm.xlu0 %2519, %v1479_v18   ;;  %v685_v9 = vpack.c.bf16 %v569_v6, %v565_v5  ;;  %v575_v18 = vcvt.s32.f32 %v447_v11  ;;  %v2353_v6 = vld [vmem:[%s3154_s4 + $0x20] sm:$0xff]  ;;  %s2021_s20 = sshll.u32 %s2018_s28, 4  ;;  %s2022_s20 = int_to_ptr.hbm [resolvable:$true] %s2021_s20 }
  0x69   : > { %1888 = vmatpush.bf16.msrb.mxu0 %v2353_v6  ;;  %s2537_s24 = sshra.s32 %s2022_s20, 4  ;;  %s2538_s24 = int_to_ptr.hbm [resolvable:$true] %s2537_s24 }
  0x6a   : > { %1670 = vperm.xlu1 %2520, %v1480_v32   ;;  %v687_v23 = vpack.c.bf16 %v575_v18, %v571_v17  ;;  %s2539_s30 = scalar_lea.hbm %s2538_s24, 256  ;;  %p2544_p2 = scmp.lt.s32.totalorder %s2538_s24, %s3156_s6 }
  0x6b   : > { %1615 = vperm.xlu2 %2521, %v1469_v56   ;;  %p2540_p13 = scmp.ne.s32.totalorder %s2538_s24, %s2539_s30  ;;  %p2545_p3 = scmp.lt.s32.totalorder %s2543_s11, %s2539_s30 }
  0x6d   : > { %1889 = vmatpush.bf16.msrb.mxu0 %v2352_v19  ;;  %p2541_p0 = pnand %p2540_p13, %p2681_p4  ;;  %p2546_p5 = por %p2545_p3, %p2544_p2 }
  0x6f   : > { %p2542_p1 = pneg %p2541_p0 }
  0x71   : > { %p2547_p6 = pnand %p2546_p5, %p2542_p1 }
  0x73   : > { %1630 = vperm.xlu2 %2521, %v1472_v0  }
  0x74   : > { %1123 = vmatmul.bf16.vlgmr.msrb.gmra.mxu1 %v675_v28  ;;  %1212 = vmatmul.bf16.vlgmr.msrb.gmra.mxu2 %v676_v29  ;;  %v396_v28 = vld [vmem:[%s2726_s18 + $0x50] sm:$0xff]  ;;  %v397_v29 = vld [vmem:[%s2726_s18 + $0x58] sm:$0xff] }
  0x75   : > { %v452_v32 = vunpack.c.0.s8 %v396_v28  ;;  %v456_v33 = vunpack.c.1.s8 %v396_v28  ;;  %v453_v34 = vunpack.c.0.s8 %v397_v29  ;;  %v457_v35 = vunpack.c.1.s8 %v397_v29 }
  0x76   : > { %v461_v55 = vunpack.c.2.s8 %v397_v29  ;;  %v465_v56 = vunpack.c.3.s8 %v397_v29 }
  0x77   : > { %1301 = vmatmul.bf16.vlgmr.msrb.gmra.mxu3 %v677_v30  ;;  %v451_v30 = vunpack.c.0.s8 %v395_v27  ;;  %v580_v39 = vcvt.s32.f32 %v452_v32  ;;  %v584_v40 = vcvt.s32.f32 %v456_v33  ;;  %v581_v41 = vcvt.s32.f32 %v453_v34  ;;  %v2351_v32 = vld [vmem:[%s3154_s4 + $0x10] sm:$0xff] }
  0x78   : > { %v585_v42 = vcvt.s32.f32 %v457_v35  ;;  %v589_v62 = vcvt.s32.f32 %v461_v55  ;;  %v593_v63 = vcvt.s32.f32 %v465_v56  ;;  %1890 = vmatpush.bf16.msrb.mxu0 %v2351_v32 }
  0x79   : > { %v579_v37 = vcvt.s32.f32 %v451_v30  ;;  %v692_v44 = vpack.c.bf16 %v584_v40, %v580_v39 }
  0x7a   : > { %v693_v46 = vpack.c.bf16 %v585_v42, %v581_v41  ;;  %v697_v5 = vpack.c.bf16 %v593_v63, %v589_v62  ;;  %v2349_v62 = vld [vmem:[%s3154_s4] sm:$0xff] }
  0x7b   : > { %1645 = vperm.xlu2 %2521, %v1475_v14   ;;  %v691_v43 = vpack.c.bf16 %v583_v38, %v579_v37 }
  0x83   : > { %1660 = vperm.xlu2 %2521, %v1478_v25  }
  0x84   : > { %1128 = vmatmul.bf16.gmra.mxu1 %v679_v51  ;;  %1217 = vmatmul.bf16.gmra.mxu2 %v680_v52  ;;  %v463_v51 = vunpack.c.3.s8 %v395_v27  ;;  %v460_v52 = vunpack.c.2.s8 %v396_v28 }
  0x86   : > { %v591_v59 = vcvt.s32.f32 %v463_v51  ;;  %v588_v60 = vcvt.s32.f32 %v460_v52  ;;  %v2350_v51 = vld [vmem:[%s3154_s4 + $0x8] sm:$0xff] }
  0x87   : > { %1306 = vmatmul.bf16.gmra.mxu3 %v681_v53  ;;  %v464_v53 = vunpack.c.3.s8 %v396_v28  ;;  %1891 = vmatpush.bf16.msrb.mxu0 %v2350_v51 }
  0x88   : > { %v695_v2 = vpack.c.bf16 %v591_v59, %v587_v58  ;;  %v403_v59 = vld [vmem:[%s2726_s18 + $0x88] sm:$0xff] }
  0x89   : > { %v592_v61 = vcvt.s32.f32 %v464_v53  ;;  %v487_v6 = vunpack.c.1.s8 %v403_v59 }
  0x8b   : > { %v696_v3 = vpack.c.bf16 %v592_v61, %v588_v60  ;;  %v404_v60 = vld [vmem:[%s2726_s18 + $0x90] sm:$0xff]  ;;  %v405_v61 = vld [vmem:[%s2726_s18 + $0x98] sm:$0xff]  ;;  %1892 = vmatpush.bf16.msrb.mxu0 %v2349_v62 }
  0x94   : > { %1133 = vmatmul.bf16.gmra.mxu1 %v683_v7  ;;  %1222 = vmatmul.bf16.gmra.mxu2 %v684_v8  ;;  %v399_v7 = vld [vmem:[%s2726_s18 + $0x68] sm:$0xff]  ;;  %v400_v8 = vld [vmem:[%s2726_s18 + $0x70] sm:$0xff] }
  0x95   : > { %v467_v12 = vunpack.c.0.s8 %v399_v7  ;;  %v471_v13 = vunpack.c.1.s8 %v399_v7  ;;  %v468_v14 = vunpack.c.0.s8 %v400_v8  ;;  %v472_v15 = vunpack.c.1.s8 %v400_v8 }
  0x96   : > { %v475_v35 = vunpack.c.2.s8 %v399_v7  ;;  %v479_v36 = vunpack.c.3.s8 %v399_v7  ;;  %v476_v37 = vunpack.c.2.s8 %v400_v8  ;;  %v480_v38 = vunpack.c.3.s8 %v400_v8 }
  0x97   : > { %1311 = vmatmul.bf16.gmra.mxu3 %v685_v9  ;;  %v401_v9 = vld [vmem:[%s2726_s18 + $0x78] sm:$0xff]  ;;  %v595_v20 = vcvt.s32.f32 %v467_v12  ;;  %v599_v21 = vcvt.s32.f32 %v471_v13  ;;  %v596_v22 = vcvt.s32.f32 %v468_v14  ;;  %v484_v7 = vunpack.c.0.s8 %v404_v60 }
  0x98   : > { %v469_v17 = vunpack.c.0.s8 %v401_v9  ;;  %v473_v18 = vunpack.c.1.s8 %v401_v9  ;;  %v477_v40 = vunpack.c.2.s8 %v401_v9  ;;  %v481_v41 = vunpack.c.3.s8 %v401_v9 }
  0x99   : > { %v699_v28 = vpack.c.bf16 %v599_v21, %v595_v20  ;;  %v603_v42 = vcvt.s32.f32 %v475_v35  ;;  %v488_v8 = vunpack.c.1.s8 %v404_v60  ;;  %v485_v12 = vunpack.c.0.s8 %v405_v61 }
  0x9a   : > { %v601_v25 = vcvt.s32.f32 %v473_v18  ;;  %v605_v47 = vcvt.s32.f32 %v477_v40  ;;  %v609_v50 = vcvt.s32.f32 %v481_v41  ;;  %v489_v13 = vunpack.c.1.s8 %v405_v61  ;;  %v1516_v41 = vpop.permute.xlu0 %1515 }
  0x9b   : > { %v616_v18 = vcvt.s32.f32 %v488_v8  ;;  %v613_v19 = vcvt.s32.f32 %v485_v12  ;;  %v496_v40 = vunpack.c.3.s8 %v404_v60 }
  0x9c   : > { %v705_v58 = vpack.c.bf16 %v609_v50, %v605_v47  ;;  %v617_v20 = vcvt.s32.f32 %v489_v13 }
  0xa4   : > { %1138 = vmatmul.bf16.gmra.mxu1 %v687_v23  ;;  %1227 = vmatmul.bf16.gmra.mxu2 %v688_v24  ;;  %v600_v23 = vcvt.s32.f32 %v472_v15  ;;  %v597_v24 = vcvt.s32.f32 %v469_v17  ;;  %v615_v15 = vcvt.s32.f32 %v487_v6  ;;  %v612_v17 = vcvt.s32.f32 %v484_v7 }
  0xa6   : > { %v700_v29 = vpack.c.bf16 %v600_v23, %v596_v22  ;;  %v701_v31 = vpack.c.bf16 %v601_v25, %v597_v24  ;;  %v708_v24 = vpack.c.bf16 %v616_v18, %v612_v17 }
  0xa7   : > { %1316 = vmatmul.bf16.gmra.mxu3 %v689_v26 }
  0xb1   : > { %v2895_v45 = vpop.f32.mrf.mxu1 }
  0xb4   : > { %1143 = vmatmul.bf16.gmra.mxu1 %v691_v43  ;;  %1232 = vmatmul.bf16.gmra.mxu2 %v692_v44  ;;  %v607_v43 = vcvt.s32.f32 %v479_v36  ;;  %v604_v44 = vcvt.s32.f32 %v476_v37  ;;  %v491_v36 = vunpack.c.2.s8 %v403_v59  ;;  %v495_v37 = vunpack.c.3.s8 %v403_v59 }
  0xb6   : > { %v703_v55 = vpack.c.bf16 %v607_v43, %v603_v42  ;;  %v493_v43 = vunpack.c.2.s8 %v405_v61  ;;  %v619_v50 = vcvt.s32.f32 %v491_v36  ;;  %v623_v51 = vcvt.s32.f32 %v495_v37 }
  0xb7   : > { %1321 = vmatmul.bf16.gmra.mxu3 %v693_v46  ;;  %v2900_v48 = vpop.f32.mrf.mxu2  ;;  %v608_v46 = vcvt.s32.f32 %v480_v38  ;;  %v492_v38 = vunpack.c.2.s8 %v404_v60 }
  0xb8   : > { %v711_v7 = vpack.c.bf16 %v623_v51, %v619_v50 }
  0xb9   : > { %v2904_v54 = vpop.f32.mrf.mxu1  ;;  %v704_v56 = vpack.c.bf16 %v608_v46, %v604_v44  ;;  %v497_v44 = vunpack.c.3.s8 %v405_v61 }
  0xba   : > { %v2902_v49 = vpop.f32.mrf.mxu3 }
  0xbf   : > { %v2909_v0 = vpop.f32.mrf.mxu2 }
  0xc1   : > { %v2913_v4 = vpop.f32.mrf.mxu1 }
  0xc2   : > { %v2911_v1 = vpop.f32.mrf.mxu3 }
  0xc4   : > { %1148 = vmatmul.bf16.gmra.mxu1 %v695_v2  ;;  %1237 = vmatmul.bf16.gmra.mxu2 %v696_v3  ;;  %v1035_v2 = vpop.f32.mrf.mxu0 }
  0xc7   : > { %1326 = vmatmul.bf16.gmra.mxu3 %v697_v5  ;;  %v2921_v10 = vpop.f32.mrf.mxu2  ;;  %v483_v5 = vunpack.c.0.s8 %v403_v59  ;;  %v625_v59 = vcvt.s32.f32 %v497_v44 }
  0xc9   : > { %v2925_v16 = vpop.f32.mrf.mxu1  ;;  %v611_v14 = vcvt.s32.f32 %v483_v5 }
  0xca   : > { %v2923_v11 = vpop.f32.mrf.mxu3 }
  0xcb   : > { %v707_v23 = vpack.c.bf16 %v615_v15, %v611_v14 }
  0xcf   : > { %v2930_v26 = vpop.f32.mrf.mxu2 }
  0xd1   : > { %v2934_v30 = vpop.f32.mrf.mxu1 }
  0xd2   : > { %v2932_v27 = vpop.f32.mrf.mxu3 }
  0xd4   : > { %1153 = vmatmul.bf16.gmra.mxu1 %v699_v28  ;;  %1242 = vmatmul.bf16.gmra.mxu2 %v700_v29  ;;  %v709_v28 = vpack.c.bf16 %v617_v20, %v613_v19  ;;  %v1037_v29 = vpop.f32.mrf.mxu0  ;;  %v1521_v19 = vpop.permute.xlu0 %1520 }
  0xd7   : > { %1331 = vmatmul.bf16.gmra.mxu3 %v701_v31  ;;  %v2939_v33 = vpop.f32.mrf.mxu2 }
  0xd9   : > { %v2943_v39 = vpop.f32.mrf.mxu1 }
  0xda   : > { %v2941_v34 = vpop.f32.mrf.mxu3 }
  0xdc   : > { %v1040_v47 = vpop.f32.mrf.mxu0 }
  0xdf   : > { %v2948_v52 = vpop.f32.mrf.mxu2 }
  0xe1   : > { %v2952_v57 = vpop.f32.mrf.mxu1 }
  0xe2   : > { %v2950_v53 = vpop.f32.mrf.mxu3 }
  0xe4   : > { %1158 = vmatmul.bf16.gmra.mxu1 %v703_v55  ;;  %1247 = vmatmul.bf16.gmra.mxu2 %v704_v56  ;;  %v620_v55 = vcvt.s32.f32 %v492_v38  ;;  %v624_v56 = vcvt.s32.f32 %v496_v40 }
  0xe6   : > { %v712_v8 = vpack.c.bf16 %v624_v56, %v620_v55 }
  0xe7   : > { %1336 = vmatmul.bf16.gmra.mxu3 %v705_v58  ;;  %v2960_v63 = vpop.f32.mrf.mxu2  ;;  %v621_v58 = vcvt.s32.f32 %v493_v43  ;;  %v1526_v43 = vpop.permute.xlu1 %1525 }
  0xe9   : > { %v2964_v9 = vpop.f32.mrf.mxu1  ;;  %v713_v13 = vpack.c.bf16 %v625_v59, %v621_v58 }
  0xea   : > { %v2962_v3 = vpop.f32.mrf.mxu3 }
  0xef   : > { %v2966_v21 = vpop.f32.mrf.mxu2 }
  0xf1   : > { %v1124_v25 = vpop.f32.mrf.mxu1 }
  0xf2   : > { %v2968_v22 = vpop.f32.mrf.mxu3  ;;  %v1125_v31 = vadd.f32 %v1124_v25, %v1035_v2  ;;  %v2359_v2 = vld [vmem:[%s2974_s8] sm:$0xff]   ;;  %v2981_v25 = vld [vmem:[%s2726_s18 + $0xb0] sm:$0xff] }
  0xf3   : > { %v2360_v15 = vunpack.c.l.bf16 %v2359_v2  ;;  %v2361_v18 = vunpack.c.h.bf16 %v2359_v2 }
  0xf4   : > { %1163 = vmatmul.bf16.gmra.mxu1 %v707_v23  ;;  %1252 = vmatmul.bf16.gmra.mxu2 %v708_v24  ;;  %v2978_v23 = vld [vmem:[%s2726_s18 + $0xa8] sm:$0xff]  ;;  %v1042_v24 = vpop.f32.mrf.mxu0 }
  0xf5   : > { %v499_v36 = vunpack.c.0.s8 %v2978_v23  ;;  %v503_v40 = vunpack.c.1.s8 %v2978_v23 }
  0xf7   : > { %1341 = vmatmul.bf16.gmra.mxu3 %v709_v28  ;;  %v1213_v32 = vpop.f32.mrf.mxu2  ;;  %v631_v55 = vcvt.s32.f32 %v503_v40 }
  0xf8   : > { %v1214_v46 = vadd.f32 %v1213_v32, %v1125_v31  ;;  %v409_v32 = vld [vmem:[%s2726_s18 + $0xb8] sm:$0xff] }
  0xf9   : > { %v1126_v42 = vpop.f32.mrf.mxu1  ;;  %v505_v50 = vunpack.c.1.s8 %v409_v32 }
  0xfa   : > { %v1302_v35 = vpop.f32.mrf.mxu3  ;;  %v1127_v62 = vadd.f32 %v1126_v42, %v1037_v29  ;;  %v504_v42 = vunpack.c.1.s8 %v2981_v25 }
  0xfb   : > { %v1303_v60 = vadd.f32 %v1302_v35, %v1214_v46  ;;  %v501_v46 = vunpack.c.0.s8 %v409_v32 }
  0xfc   : > { %v632_v58 = vcvt.s32.f32 %v504_v42  ;;  %v511_v42 = vunpack.c.3.s8 %v2978_v23 }
  0xfd   : > { %v1673_v14 = vmul.f32 %v1516_v41, %v1303_v60  ;;  %v500_v41 = vunpack.c.0.s8 %v2981_v25  ;;  %v629_v59 = vcvt.s32.f32 %v501_v46  ;;  %v633_v60 = vcvt.s32.f32 %v505_v50 }
  0xff   : > { %v1215_v5 = vpop.f32.mrf.mxu2  ;;  %v1769_v28 = vadd.f32 %v2360_v15, %v1673_v14  ;;  %v628_v56 = vcvt.s32.f32 %v500_v41  ;;  %v717_v15 = vpack.c.bf16 %v633_v60, %v629_v59 }
 0x100   : > { %v1216_v61 = vadd.f32 %v1215_v5, %v1127_v62  ;;  %v1045_v5 = vpop.f32.mrf.mxu0 }
 0x101   : > { %v1129_v12 = vpop.f32.mrf.mxu1 }
 0x102   : > { %v1304_v6 = vpop.f32.mrf.mxu3  ;;  %v1130_v31 = vadd.f32 %v1129_v12, %v1040_v47  ;;  %v627_v47 = vcvt.s32.f32 %v499_v36 }
 0x103   : > { %v1305_v17 = vadd.f32 %v1304_v6, %v1216_v61  ;;  %v2422_v6 = vld [vmem:[%s2974_s8 + $0x8] sm:$0xff]  }
 0x104   : > { %1168 = vmatmul.bf16.gmra.mxu1 %v711_v7  ;;  %1257 = vmatmul.bf16.gmra.mxu2 %v712_v8  ;;  %v715_v12 = vpack.c.bf16 %v631_v55, %v627_v47  ;;  %v513_v47 = vunpack.c.3.s8 %v409_v32 }
 0x105   : > { %v1674_v20 = vmul.f32 %v1521_v19, %v1305_v17  ;;  %v2364_v19 = vunpack.c.l.bf16 %v2422_v6 }
 0x107   : > { %1346 = vmatmul.bf16.gmra.mxu3 %v713_v13  ;;  %v1770_v29 = vadd.f32 %v2361_v18, %v1674_v20  ;;  %v1218_v35 = vpop.f32.mrf.mxu2  ;;  %v716_v13 = vpack.c.bf16 %v632_v58, %v628_v56  ;;  %v2365_v20 = vunpack.c.h.bf16 %v2422_v6  ;;  %v639_v58 = vcvt.s32.f32 %v511_v42  ;;  %v2423_v6 = vld [vmem:[%s2974_s8 + $0x10] sm:$0xff]  }
 0x108   : > { %v1219_v51 = vadd.f32 %v1218_v35, %v1130_v31  ;;  %v1047_v46 = vpop.f32.mrf.mxu0 }
 0x109   : > { %v1801_v38 = vpack.c.bf16 %v1770_v29, %v1769_v28  ;;  %v1131_v44 = vpop.f32.mrf.mxu1  ;;  %v1531_v28 = vpop.permute.xlu1 %1530 }
 0x10a   : > { %v1307_v37 = vpop.f32.mrf.mxu3  ;;  %v1132_v2 = vadd.f32 %v1131_v44, %v1042_v24  ;;  %v512_v44 = vunpack.c.3.s8 %v2981_v25 }
 0x10b   : > { %1893 = vmatmul.bf16.vlgmr.msrb.gmra.mxu0 %v1801_v38  ;;  %v1308_v62 = vadd.f32 %v1307_v37, %v1219_v51  ;;  %v507_v37 = vunpack.c.2.s8 %v2978_v23  ;;  %v1536_v38 = vpop.permute.xlu2 %1535  ;;  %v509_v51 = vunpack.c.2.s8 %v409_v32 }
 0x10c   : > { %v640_v60 = vcvt.s32.f32 %v512_v44 }
 0x10d   : > { %v1675_v17 = vmul.f32 %v1526_v43, %v1308_v62  ;;  %v508_v43 = vunpack.c.2.s8 %v2981_v25  ;;  %v635_v56 = vcvt.s32.f32 %v507_v37  ;;  %v637_v62 = vcvt.s32.f32 %v509_v51  ;;  %v413_v37 = vld [vmem:[%s2726_s18 + $0xd8] sm:$0xff] }
 0x10e   : > { %v517_v51 = vunpack.c.0.s8 %v413_v37 }
 0x10f   : > { %v1220_v61 = vpop.f32.mrf.mxu2  ;;  %v1771_v24 = vadd.f32 %v2364_v19, %v1675_v17  ;;  %v636_v59 = vcvt.s32.f32 %v508_v43  ;;  %v2368_v17 = vunpack.c.l.bf16 %v2423_v6 }
 0x110   : > { %v1221_v7 = vadd.f32 %v1220_v61, %v1132_v2  ;;  %v641_v2 = vcvt.s32.f32 %v513_v47  ;;  %v521_v47 = vunpack.c.1.s8 %v413_v37 }
 0x111   : > { %v1134_v14 = vpop.f32.mrf.mxu1 }
 0x112   : > { %v1309_v8 = vpop.f32.mrf.mxu3  ;;  %v1135_v31 = vadd.f32 %v1134_v14, %v1045_v5  ;;  %v721_v32 = vpack.c.bf16 %v641_v2, %v637_v62  ;;  %v645_v2 = vcvt.s32.f32 %v517_v51 }
 0x113   : > { %v1310_v18 = vadd.f32 %v1309_v8, %v1221_v7  ;;  %v719_v8 = vpack.c.bf16 %v639_v58, %v635_v56  ;;  %v1541_v19 = vpop.permute.xlu2 %1540 }
 0x114   : > { %1173 = vmatmul.bf16.gmra.mxu1 %v715_v12  ;;  %1262 = vmatmul.bf16.gmra.mxu2 %v716_v13  ;;  %v720_v12 = vpack.c.bf16 %v640_v60, %v636_v59 }
 0x115   : > { %v1676_v29 = vmul.f32 %v1531_v28, %v1310_v18  ;;  %v2369_v18 = vunpack.c.h.bf16 %v2423_v6 }
 0x117   : > { %1351 = vmatmul.bf16.gmra.mxu3 %v717_v15  ;;  %v1772_v35 = vadd.f32 %v2365_v20, %v1676_v29  ;;  %v1223_v36 = vpop.f32.mrf.mxu2  ;;  %v1050_v20 = vpop.f32.mrf.mxu0  ;;  %v411_v29 = vld [vmem:[%s2726_s18 + $0xc8] sm:$0xff] }
 0x118   : > { %v1224_v55 = vadd.f32 %v1223_v36, %v1135_v31  ;;  %v412_v31 = vld [vmem:[%s2726_s18 + $0xd0] sm:$0xff] }
 0x119   : > { %v1802_v41 = vpack.c.bf16 %v1772_v35, %v1771_v24  ;;  %v1136_v50 = vpop.f32.mrf.mxu1  ;;  %v516_v44 = vunpack.c.0.s8 %v412_v31 }
 0x11a   : > { %v1312_v40 = vpop.f32.mrf.mxu3  ;;  %v1137_v61 = vadd.f32 %v1136_v50, %v1047_v46  ;;  %v520_v46 = vunpack.c.1.s8 %v412_v31 }
 0x11b   : > { %1898 = vmatmul.bf16.gmra.mxu0 %v1802_v41  ;;  %v1313_v5 = vadd.f32 %v1312_v40, %v1224_v55  ;;  %v515_v41 = vunpack.c.0.s8 %v411_v29  ;;  %v644_v59 = vcvt.s32.f32 %v516_v44 }
 0x11c   : > { %v648_v60 = vcvt.s32.f32 %v520_v46  ;;  %v524_v46 = vunpack.c.2.s8 %v412_v31 }
 0x11d   : > { %v1677_v14 = vmul.f32 %v1536_v38, %v1313_v5  ;;  %v519_v38 = vunpack.c.1.s8 %v411_v29  ;;  %v643_v56 = vcvt.s32.f32 %v515_v41  ;;  %v649_v5 = vcvt.s32.f32 %v521_v47 }
 0x11e   : > { %v523_v41 = vunpack.c.2.s8 %v411_v29  ;;  %v525_v47 = vunpack.c.2.s8 %v413_v37 }
 0x11f   : > { %v1225_v23 = vpop.f32.mrf.mxu2  ;;  %v1773_v35 = vadd.f32 %v2368_v17, %v1677_v14  ;;  %v647_v58 = vcvt.s32.f32 %v519_v38  ;;  %v1052_v62 = vpop.f32.mrf.mxu0 }
 0x120   : > { %v1226_v7 = vadd.f32 %v1225_v23, %v1137_v61 }
 0x121   : > { %v1139_v13 = vpop.f32.mrf.mxu1 }
 0x122   : > { %v1314_v25 = vpop.f32.mrf.mxu3  ;;  %v1140_v24 = vadd.f32 %v1139_v13, %v1050_v20  ;;  %v724_v13 = vpack.c.bf16 %v648_v60, %v644_v59  ;;  %v652_v60 = vcvt.s32.f32 %v524_v46 }
 0x123   : > { %v1315_v15 = vadd.f32 %v1314_v25, %v1226_v7  ;;  %v2424_v7 = vld [vmem:[%s2974_s8 + $0x18] sm:$0xff]  }
 0x124   : > { %1178 = vmatmul.bf16.gmra.mxu1 %v719_v8  ;;  %1267 = vmatmul.bf16.gmra.mxu2 %v720_v12  ;;  %v723_v12 = vpack.c.bf16 %v647_v58, %v643_v56  ;;  %v2373_v20 = vunpack.c.h.bf16 %v2424_v7  ;;  %v651_v58 = vcvt.s32.f32 %v523_v41 }
 0x125   : > { %v1678_v28 = vmul.f32 %v1541_v19, %v1315_v15  ;;  %v725_v15 = vpack.c.bf16 %v649_v5, %v645_v2  ;;  %v2372_v19 = vunpack.c.l.bf16 %v2424_v7  ;;  %v653_v2 = vcvt.s32.f32 %v525_v47 }
 0x127   : > { %1356 = vmatmul.bf16.gmra.mxu3 %v721_v32  ;;  %v1774_v36 = vadd.f32 %v2369_v18, %v1678_v28  ;;  %v1228_v40 = vpop.f32.mrf.mxu2  ;;  %v1546_v32 = vpop.permute.xlu0 %1545 }
 0x128   : > { %v1229_v55 = vadd.f32 %v1228_v40, %v1140_v24  ;;  %v1551_v28 = vpop.permute.xlu1 %1550 }
 0x129   : > { %v1803_v43 = vpack.c.bf16 %v1774_v36, %v1773_v35  ;;  %v1141_v50 = vpop.f32.mrf.mxu1 }
 0x12a   : > { %v1317_v42 = vpop.f32.mrf.mxu3  ;;  %v1142_v23 = vadd.f32 %v1141_v50, %v1052_v62  ;;  %v528_v50 = vunpack.c.3.s8 %v412_v31 }
 0x12b   : > { %1903 = vmatmul.bf16.gmra.mxu0 %v1803_v43  ;;  %v1318_v61 = vadd.f32 %v1317_v42, %v1229_v55  ;;  %v527_v42 = vunpack.c.3.s8 %v411_v29  ;;  %v529_v55 = vunpack.c.3.s8 %v413_v37  ;;  %v1556_v37 = vpop.permute.xlu2 %1555 }
 0x12c   : > { %v656_v62 = vcvt.s32.f32 %v528_v50 }
 0x12d   : > { %v1679_v17 = vmul.f32 %v1546_v32, %v1318_v61  ;;  %v655_v59 = vcvt.s32.f32 %v527_v42  ;;  %v657_v5 = vcvt.s32.f32 %v529_v55 }
 0x12f   : > { %v1230_v6 = vpop.f32.mrf.mxu2  ;;  %v1775_v35 = vadd.f32 %v2372_v19, %v1679_v17  ;;  %v727_v31 = vpack.c.bf16 %v655_v59, %v651_v58  ;;  %v1561_v17 = vpop.permute.xlu0 %1560  ;;  %v416_v19 = vld [vmem:[%s2726_s18 + $0xf0] sm:$0xff] }
 0x130   : > { %v1231_v25 = vadd.f32 %v1230_v6, %v1142_v23  ;;  %v2425_v23 = vld [vmem:[%s2974_s8 + $0x20] sm:$0xff]  }
 0x131   : > { %v1144_v14 = vpop.f32.mrf.mxu1 }
 0x132   : > { %v1319_v8 = vpop.f32.mrf.mxu3  ;;  %v1145_v43 = vadd.f32 %v1144_v14, %v2895_v45  ;;  %v2376_v14 = vunpack.c.l.bf16 %v2425_v23 }
 0x133   : > { %v1320_v18 = vadd.f32 %v1319_v8, %v1231_v25  ;;  %v728_v25 = vpack.c.bf16 %v656_v62, %v652_v60 }
 0x134   : > { %1183 = vmatmul.bf16.gmra.mxu1 %v723_v12  ;;  %1272 = vmatmul.bf16.gmra.mxu2 %v724_v13  ;;  %v729_v12 = vpack.c.bf16 %v657_v5, %v653_v2 }
 0x135   : > { %v1680_v24 = vmul.f32 %v1551_v28, %v1320_v18 }
 0x137   : > { %1361 = vmatmul.bf16.gmra.mxu3 %v725_v15  ;;  %v1776_v36 = vadd.f32 %v2373_v20, %v1680_v24  ;;  %v1233_v40 = vpop.f32.mrf.mxu2  ;;  %v2377_v15 = vunpack.c.h.bf16 %v2425_v23  ;;  %v417_v24 = vld [vmem:[%s2726_s18 + $0xf8] sm:$0xff] }
 0x138   : > { %v1234_v56 = vadd.f32 %v1233_v40, %v1145_v43  ;;  %v533_v50 = vunpack.c.0.s8 %v417_v24 }
 0x139   : > { %v1804_v44 = vpack.c.bf16 %v1776_v36, %v1775_v35  ;;  %v1146_v51 = vpop.f32.mrf.mxu1 }
 0x13a   : > { %v1322_v38 = vpop.f32.mrf.mxu3  ;;  %v1147_v29 = vadd.f32 %v1146_v51, %v2904_v54  ;;  %v415_v54 = vld [vmem:[%s2726_s18 + $0xe8] sm:$0xff]  ;;  %v537_v51 = vunpack.c.1.s8 %v417_v24  ;;  %v661_v60 = vcvt.s32.f32 %v533_v50  ;;  %s2143_s18 = sshll.u32 %s316_s14, 8 }
 0x13b   : > { %1908 = vmatmul.bf16.gmra.mxu0 %v1804_v44  ;;  %v1323_v61 = vadd.f32 %v1322_v38, %v1234_v56  ;;  %v531_v36 = vunpack.c.0.s8 %v415_v54  ;;  %v535_v40 = vunpack.c.1.s8 %v415_v54  ;;  %v532_v38 = vunpack.c.0.s8 %v416_v19  ;;  %s3026_s15 = scalar_lea.vmem [#allocation3], %s2143_s18 }
 0x13c   : > { %v536_v44 = vunpack.c.1.s8 %v416_v19  ;;  %v665_v62 = vcvt.s32.f32 %v537_v51  ;;  %s2019_s19 = sshll.u32 %s3026_s15, 4  ;;  %s2020_s19 = int_to_ptr.vmem [resolvable:$true] %s2019_s19 }
 0x13d   : > { %v1681_v13 = vmul.f32 %v1556_v37, %v1323_v61  ;;  %v659_v55 = vcvt.s32.f32 %v531_v36  ;;  %v663_v56 = vcvt.s32.f32 %v535_v40  ;;  %v660_v58 = vcvt.s32.f32 %v532_v38  ;;  %v2426_v61 = vld [vmem:[%s2974_s8 + $0x28] sm:$0xff]  }
 0x13e   : > { %v664_v59 = vcvt.s32.f32 %v536_v44  ;;  %v540_v40 = vunpack.c.2.s8 %v416_v19  ;;  %v545_v38 = vunpack.c.3.s8 %v417_v24 }
 0x13f   : > { %v1235_v45 = vpop.f32.mrf.mxu2  ;;  %v1777_v20 = vadd.f32 %v2376_v14, %v1681_v13  ;;  %v731_v23 = vpack.c.bf16 %v663_v56, %v659_v55  ;;  %v2381_v13 = vunpack.c.h.bf16 %v2426_v61 }
 0x140   : > { %v1236_v6 = vadd.f32 %v1235_v45, %v1147_v29  ;;  %v668_v51 = vcvt.s32.f32 %v540_v40  ;;  %v673_v56 = vcvt.s32.f32 %v545_v38 }
 0x141   : > { %v1149_v8 = vpop.f32.mrf.mxu1 }
 0x142   : > { %v1324_v7 = vpop.f32.mrf.mxu3  ;;  %v1150_v41 = vadd.f32 %v1149_v8, %v2913_v4 }
 0x143   : > { %v1325_v32 = vadd.f32 %v1324_v7, %v1236_v6  ;;  %v732_v6 = vpack.c.bf16 %v664_v59, %v660_v58  ;;  %v1566_v7 = vpop.permute.xlu1 %1565  ;;  %v2427_v59 = vld [vmem:[%s2974_s8 + $0x30] sm:$0xff]  }
 0x144   : > { %1188 = vmatmul.bf16.gmra.mxu1 %v727_v31  ;;  %1277 = vmatmul.bf16.gmra.mxu2 %v728_v25  ;;  %v733_v25 = vpack.c.bf16 %v665_v62, %v661_v60 }
 0x145   : > { %v1682_v18 = vmul.f32 %v1561_v17, %v1325_v32  ;;  %v1571_v32 = vpop.permute.xlu2 %1570 }
 0x147   : > { %1366 = vmatmul.bf16.gmra.mxu3 %v729_v12  ;;  %v1778_v28 = vadd.f32 %v2377_v15, %v1682_v18  ;;  %v1238_v35 = vpop.f32.mrf.mxu2  ;;  %v2380_v12 = vunpack.c.l.bf16 %v2426_v61  ;;  %v539_v18 = vunpack.c.2.s8 %v415_v54 }
 0x148   : > { %v1239_v47 = vadd.f32 %v1238_v35, %v1150_v41  ;;  %v544_v41 = vunpack.c.3.s8 %v416_v19 }
 0x149   : > { %v1805_v43 = vpack.c.bf16 %v1778_v28, %v1777_v20  ;;  %v1151_v46 = vpop.f32.mrf.mxu1  ;;  %v543_v20 = vunpack.c.3.s8 %v415_v54 }
 0x14a   : > { %v1327_v42 = vpop.f32.mrf.mxu3  ;;  %v1152_v5 = vadd.f32 %v1151_v46, %v2925_v16  ;;  %v667_v46 = vcvt.s32.f32 %v539_v18 }
 0x14b   : > { %1913 = vmatmul.bf16.gmra.mxu0 %v1805_v43  ;;  %v1328_v2 = vadd.f32 %v1327_v42, %v1239_v47  ;;  %v541_v43 = vunpack.c.2.s8 %v417_v24  ;;  %v671_v50 = vcvt.s32.f32 %v543_v20  ;;  %v672_v47 = vcvt.s32.f32 %v544_v41 }
 0x14d   : > { %v1683_v37 = vmul.f32 %v1566_v7, %v1328_v2  ;;  %v669_v55 = vcvt.s32.f32 %v541_v43  ;;  %v735_v2 = vpack.c.bf16 %v671_v50, %v667_v46  ;;  %v736_v19 = vpack.c.bf16 %v672_v47, %v668_v51 }
 0x14f   : > { %v1240_v4 = vpop.f32.mrf.mxu2  ;;  %v1779_v15 = vadd.f32 %v2380_v12, %v1683_v37  ;;  %v737_v24 = vpack.c.bf16 %v673_v56, %v669_v55 }
 0x150   : > { %v1241_v29 = vadd.f32 %v1240_v4, %v1152_v5  ;;  %v1576_v5 = vpop.permute.xlu0 %1575 }
 0x151   : > { %v1154_v31 = vpop.f32.mrf.mxu1 }
 0x152   : > { %v1329_v45 = vpop.f32.mrf.mxu3  ;;  %v1155_v28 = vadd.f32 %v1154_v31, %v2934_v30 }
 0x153   : > { %v1330_v8 = vadd.f32 %v1329_v45, %v1241_v29  ;;  %v2384_v45 = vunpack.c.l.bf16 %v2427_v59 }
 0x154   : > { %1193 = vmatmul.bf16.gmra.mxu1 %v731_v23  ;;  %1282 = vmatmul.bf16.gmra.mxu2 %v732_v6  ;;  %v2385_v23 = vunpack.c.h.bf16 %v2427_v59  ;;  %v1581_v6 = vpop.permute.xlu1 %1580 }
 0x155   : > { %v1684_v14 = vmul.f32 %v1571_v32, %v1330_v8 }
 0x157   : > { %1371 = vmatmul.bf16.gmra.mxu3 %v733_v25  ;;  %v1780_v16 = vadd.f32 %v2381_v13, %v1684_v14  ;;  %v1243_v17 = vpop.f32.mrf.mxu2 }
 0x158   : > { %v1244_v44 = vadd.f32 %v1243_v17, %v1155_v28  ;;  %v2428_v17 = vld [vmem:[%s2974_s8 + $0x38] sm:$0xff]   ;;  %v1586_v28 = vpop.permute.xlu2 %1585 }
 0x159   : > { %v1806_v36 = vpack.c.bf16 %v1780_v16, %v1779_v15  ;;  %v1156_v42 = vpop.f32.mrf.mxu1  ;;  %v2388_v41 = vunpack.c.l.bf16 %v2428_v17 }
 0x15a   : > { %v1332_v35 = vpop.f32.mrf.mxu3  ;;  %v1157_v54 = vadd.f32 %v1156_v42, %v2943_v39  ;;  %v2389_v42 = vunpack.c.h.bf16 %v2428_v17 }
 0x15b   : > { %1918 = vmatmul.bf16.gmra.mxu0 %v1806_v36  ;;  %v1333_v58 = vadd.f32 %v1332_v35, %v1244_v44 }
 0x15d   : > { %v1685_v61 = vmul.f32 %v1576_v5, %v1333_v58 }
 0x15f   : > { %v1245_v30 = vpop.f32.mrf.mxu2  ;;  %v1781_v39 = vadd.f32 %v2384_v45, %v1685_v61 }
 0x160   : > { %v1246_v60 = vadd.f32 %v1245_v30, %v1157_v54  ;;  %v2429_v54 = vld [vmem:[%s2974_s8 + $0x40] sm:$0xff]  }
 0x161   : > { %v1159_v4 = vpop.f32.mrf.mxu1  ;;  %v2392_v5 = vunpack.c.l.bf16 %v2429_v54 }
 0x162   : > { %v1334_v62 = vpop.f32.mrf.mxu3  ;;  %v1160_v37 = vadd.f32 %v1159_v4, %v2952_v57  ;;  %v1591_v57 = vpop.permute.xlu0 %1590 }
 0x163   : > { %v1335_v29 = vadd.f32 %v1334_v62, %v1246_v60  ;;  %v1596_v62 = vpop.permute.xlu1 %1595 }
 0x164   : > { %1198 = vmatmul.bf16.gmra.mxu1 %v735_v2  ;;  %1287 = vmatmul.bf16.gmra.mxu2 %v736_v19 }
 0x165   : > { %v1686_v7 = vmul.f32 %v1581_v6, %v1335_v29  ;;  %v3022_v29 = vld [vmem:[%s3155_s5] ss:$0 sm:$0xff] }
 0x167   : > { %1376 = vmatmul.bf16.gmra.mxu3 %v737_v24  ;;  %v1782_v31 = vadd.f32 %v2385_v23, %v1686_v7  ;;  %v1248_v25 = vpop.f32.mrf.mxu2  ;;  %v1601_v24 = vpop.permute.xlu2 %1600 }
 0x168   : > { %v1249_v32 = vadd.f32 %v1248_v25, %v1160_v37 }
 0x169   : > { %v1807_v12 = vpack.c.bf16 %v1782_v31, %v1781_v39  ;;  %v1161_v13 = vpop.f32.mrf.mxu1 }
 0x16a   : > { %v1337_v8 = vpop.f32.mrf.mxu3  ;;  %v1162_v15 = vadd.f32 %v1161_v13, %v2964_v9 }
 0x16b   : > { %1923 = vmatmul.bf16.gmra.mxu0 %v1807_v12  ;;  %v1338_v14 = vadd.f32 %v1337_v8, %v1249_v32  ;;  %v2430_v32 = vld [vmem:[%s2974_s8 + $0x48] sm:$0xff]  }
 0x16d   : > { %v1687_v36 = vmul.f32 %v1586_v28, %v1338_v14 }
 0x16f   : > { %v1250_v16 = vpop.f32.mrf.mxu2  ;;  %v1783_v38 = vadd.f32 %v2388_v41, %v1687_v36  ;;  %v1611_v41 = vpop.permute.xlu1 %1610 }
 0x170   : > { %v1251_v18 = vadd.f32 %v1250_v16, %v1162_v15 }
 0x171   : > { %v1164_v35 = vpop.f32.mrf.mxu1 }
 0x172   : > { %v1339_v20 = vpop.f32.mrf.mxu3  ;;  %v1165_v50 = vadd.f32 %v1164_v35, %v2900_v48  ;;  %v2393_v48 = vunpack.c.h.bf16 %v2429_v54  ;;  %v2396_v35 = vunpack.c.l.bf16 %v2430_v32 }
 0x173   : > { %v1340_v40 = vadd.f32 %v1339_v20, %v1251_v18  ;;  %v1606_v18 = vpop.permute.xlu0 %1605 }
 0x175   : > { %v1688_v43 = vmul.f32 %v1591_v57, %v1340_v40  ;;  %v2397_v40 = vunpack.c.h.bf16 %v2430_v32 }
 0x177   : > { %v1784_v44 = vadd.f32 %v2389_v42, %v1688_v43  ;;  %v1253_v46 = vpop.f32.mrf.mxu2 }
 0x178   : > { %v1254_v55 = vadd.f32 %v1253_v46, %v1165_v50 }
 0x179   : > { %v1808_v51 = vpack.c.bf16 %v1784_v44, %v1783_v38  ;;  %v1166_v47 = vpop.f32.mrf.mxu1 }
 0x17a   : > { %v1342_v9 = vpop.f32.mrf.mxu3  ;;  %v1167_v58 = vadd.f32 %v1166_v47, %v2909_v0 }
 0x17b   : > { %1928 = vmatmul.bf16.gmra.mxu0 %v1808_v51  ;;  %v1343_v56 = vadd.f32 %v1342_v9, %v1254_v55 }
 0x17d   : > { %v1689_v19 = vmul.f32 %v1596_v62, %v1343_v56 }
 0x17f   : > { %v1255_v30 = vpop.f32.mrf.mxu2  ;;  %v1785_v0 = vadd.f32 %v2392_v5, %v1689_v19 }
 0x180   : > { %v1256_v59 = vadd.f32 %v1255_v30, %v1167_v58  ;;  %v2431_v58 = vld [vmem:[%s2974_s8 + $0x50] sm:$0xff]  }
 0x181   : > { %v1169_v2 = vpop.f32.mrf.mxu1  ;;  %v2400_v5 = vunpack.c.l.bf16 %v2431_v58 }
 0x182   : > { %v1344_v60 = vpop.f32.mrf.mxu3  ;;  %v1170_v7 = vadd.f32 %v1169_v2, %v2921_v10 }
 0x183   : > { %v1345_v4 = vadd.f32 %v1344_v60, %v1256_v59 }
 0x185   : > { %v1690_v61 = vmul.f32 %v1601_v24, %v1345_v4  ;;  %v1621_v24 = vpop.permute.xlu0 %1620 }
 0x187   : > { %v1786_v45 = vadd.f32 %v2393_v48, %v1690_v61  ;;  %v1258_v23 = vpop.f32.mrf.mxu2  ;;  %v2401_v48 = vunpack.c.h.bf16 %v2431_v58 }
 0x188   : > { %v1894_v6 = vpop.f32.mrf.mxu0  ;;  %v1259_v8 = vadd.f32 %v1258_v23, %v1170_v7 }
 0x189   : > { %v1895_v31 = vadd.f32 %v3022_v29, %v1894_v6  ;;  %v1809_v25 = vpack.c.bf16 %v1786_v45, %v1785_v0  ;;  %v1171_v37 = vpop.f32.mrf.mxu1 }
 0x18a   : > { %v1347_v39 = vpop.f32.mrf.mxu3  ;;  %v1172_v13 = vadd.f32 %v1171_v37, %v2930_v26 }
 0x18b   : > { %1974 = vst [vmem:[%s3026_s15] sm:$0xff] %v1895_v31  ;;  %1933 = vmatmul.bf16.gmra.mxu0 %v1809_v25  ;;  %v1348_v12 = vadd.f32 %v1347_v39, %v1259_v8 }
 0x18d   : > { %v1691_v28 = vmul.f32 %v1606_v18, %v1348_v12 }
 0x18f   : > { %v1260_v14 = vpop.f32.mrf.mxu2  ;;  %v1787_v57 = vadd.f32 %v2396_v35, %v1691_v28 }
 0x190   : > { %v1896_v15 = vpop.f32.mrf.mxu0  ;;  %v1261_v16 = vadd.f32 %v1260_v14, %v1172_v13  ;;  %v2432_v13 = vld [vmem:[%s2974_s8 + $0x58] sm:$0xff]  }
 0x191   : > { %v1897_v17 = vadd.f32 %v3022_v29, %v1896_v15  ;;  %v1174_v20 = vpop.f32.mrf.mxu1  ;;  %v2405_v35 = vunpack.c.h.bf16 %v2432_v13 }
 0x192   : > { %v1349_v10 = vpop.f32.mrf.mxu3  ;;  %v1175_v44 = vadd.f32 %v1174_v20, %v2939_v33  ;;  %v1616_v33 = vpop.permute.xlu2 %1615  ;;  %v2404_v20 = vunpack.c.l.bf16 %v2432_v13 }
 0x193   : > { %v1350_v36 = vadd.f32 %v1349_v10, %v1261_v16  ;;  %1975 = vst [vmem:[%s3026_s15 + $0x8] sm:$0xff] %v1897_v17 }
 0x195   : > { %v1692_v42 = vmul.f32 %v1611_v41, %v1350_v36 }
 0x197   : > { %v1788_v26 = vadd.f32 %v2397_v40, %v1692_v42  ;;  %v1263_v43 = vpop.f32.mrf.mxu2 }
 0x198   : > { %v1899_v38 = vpop.f32.mrf.mxu0  ;;  %v1264_v47 = vadd.f32 %v1263_v43, %v1175_v44 }
 0x199   : > { %v1900_v50 = vadd.f32 %v3022_v29, %v1899_v38  ;;  %v1810_v9 = vpack.c.bf16 %v1788_v26, %v1787_v57  ;;  %v1176_v51 = vpop.f32.mrf.mxu1 }
 0x19a   : > { %v1352_v46 = vpop.f32.mrf.mxu3  ;;  %v1177_v56 = vadd.f32 %v1176_v51, %v2948_v52  ;;  %v1631_v36 = vpop.permute.xlu2 %1630 }
 0x19b   : > { %1976 = vst [vmem:[%s3026_s15 + $0x10] sm:$0xff] %v1900_v50  ;;  %1938 = vmatmul.bf16.gmra.mxu0 %v1810_v9  ;;  %v1353_v55 = vadd.f32 %v1352_v46, %v1264_v47  ;;  %v2433_v47 = vld [vmem:[%s2974_s8 + $0x60] sm:$0xff]  }
 0x19d   : > { %v1693_v19 = vmul.f32 %v1616_v33, %v1353_v55 }
 0x19f   : > { %v1265_v54 = vpop.f32.mrf.mxu2  ;;  %v1789_v0 = vadd.f32 %v2400_v5, %v1693_v19 }
 0x1a0   : > { %v1901_v30 = vpop.f32.mrf.mxu0  ;;  %v1266_v59 = vadd.f32 %v1265_v54, %v1177_v56 }
 0x1a1   : > { %v1902_v62 = vadd.f32 %v3022_v29, %v1901_v30  ;;  %v1179_v2 = vpop.f32.mrf.mxu1 }
 0x1a2   : > { %v1354_v60 = vpop.f32.mrf.mxu3  ;;  %v1180_v6 = vadd.f32 %v1179_v2, %v2960_v63  ;;  %v1626_v63 = vpop.permute.xlu1 %1625  ;;  %v2409_v2 = vunpack.c.h.bf16 %v2433_v47 }
 0x1a3   : > { %v1355_v4 = vadd.f32 %v1354_v60, %v1266_v59  ;;  %1977 = vst [vmem:[%s3026_s15 + $0x18] sm:$0xff] %v1902_v62  ;;  %v2408_v62 = vunpack.c.l.bf16 %v2433_v47 }
 0x1a5   : > { %v1694_v61 = vmul.f32 %v1621_v24, %v1355_v4 }
 0x1a7   : > { %v1790_v52 = vadd.f32 %v2401_v48, %v1694_v61  ;;  %v1268_v45 = vpop.f32.mrf.mxu2 }
 0x1a8   : > { %v1904_v23 = vpop.f32.mrf.mxu0  ;;  %v1269_v37 = vadd.f32 %v1268_v45, %v1180_v6 }
 0x1a9   : > { %v1905_v39 = vadd.f32 %v3022_v29, %v1904_v23  ;;  %v1811_v31 = vpack.c.bf16 %v1790_v52, %v1789_v0  ;;  %v1181_v25 = vpop.f32.mrf.mxu1 }
 0x1aa   : > { %v1357_v7 = vpop.f32.mrf.mxu3  ;;  %v1182_v12 = vadd.f32 %v1181_v25, %v2966_v21  ;;  %v1641_v19 = vpop.permute.xlu1 %1640 }
 0x1ab   : > { %1978 = vst [vmem:[%s3026_s15 + $0x20] sm:$0xff] %v1905_v39  ;;  %1943 = vmatmul.bf16.gmra.mxu0 %v1811_v31  ;;  %v1358_v8 = vadd.f32 %v1357_v7, %v1269_v37  ;;  %v2434_v31 = vld [vmem:[%s2974_s8 + $0x68] sm:$0xff]  }
 0x1ad   : > { %v1695_v18 = vmul.f32 %v1626_v63, %v1358_v8 }
 0x1af   : > { %v1270_v32 = vpop.f32.mrf.mxu2  ;;  %v1791_v41 = vadd.f32 %v2404_v20, %v1695_v18 }
 0x1b0   : > { %v1906_v14 = vpop.f32.mrf.mxu0  ;;  %v1271_v15 = vadd.f32 %v1270_v32, %v1182_v12 }
 0x1b1   : > { %v1907_v10 = vadd.f32 %v3022_v29, %v1906_v14  ;;  %v1184_v17 = vpop.f32.mrf.mxu1 }
 0x1b2   : > { %v1359_v16 = vpop.f32.mrf.mxu3  ;;  %v1185_v26 = vadd.f32 %v1184_v17, %v2902_v49  ;;  %v1636_v49 = vpop.permute.xlu0 %1635 }
 0x1b3   : > { %v1360_v28 = vadd.f32 %v1359_v16, %v1271_v15  ;;  %1979 = vst [vmem:[%s3026_s15 + $0x28] sm:$0xff] %v1907_v10  ;;  %v2412_v15 = vunpack.c.l.bf16 %v2434_v31  ;;  %v2413_v10 = vunpack.c.h.bf16 %v2434_v31 }
 0x1b5   : > { %v1696_v40 = vmul.f32 %v1631_v36, %v1360_v28 }
 0x1b7   : > { %v1792_v21 = vadd.f32 %v2405_v35, %v1696_v40  ;;  %v1273_v42 = vpop.f32.mrf.mxu2 }
 0x1b8   : > { %v1909_v57 = vpop.f32.mrf.mxu0  ;;  %v1274_v50 = vadd.f32 %v1273_v42, %v1185_v26 }
 0x1b9   : > { %v1910_v38 = vadd.f32 %v3022_v29, %v1909_v57  ;;  %v1812_v44 = vpack.c.bf16 %v1792_v21, %v1791_v41  ;;  %v1186_v46 = vpop.f32.mrf.mxu1 }
 0x1ba   : > { %v1362_v43 = vpop.f32.mrf.mxu3  ;;  %v1187_v51 = vadd.f32 %v1186_v46, %v2911_v1  ;;  %v1651_v63 = vpop.permute.xlu0 %1650 }
 0x1bb   : > { %1980 = vst [vmem:[%s3026_s15 + $0x30] sm:$0xff] %v1910_v38  ;;  %1948 = vmatmul.bf16.gmra.mxu0 %v1812_v44  ;;  %v1363_v9 = vadd.f32 %v1362_v43, %v1274_v50  ;;  %v2435_v43 = vld [vmem:[%s2974_s8 + $0x70] sm:$0xff]  }
 0x1bd   : > { %v1697_v60 = vmul.f32 %v1636_v49, %v1363_v9 }
 0x1bf   : > { %v1275_v55 = vpop.f32.mrf.mxu2  ;;  %v1793_v4 = vadd.f32 %v2408_v62, %v1697_v60 }
 0x1c0   : > { %v1911_v56 = vpop.f32.mrf.mxu0  ;;  %v1276_v58 = vadd.f32 %v1275_v55, %v1187_v51  ;;  %v2416_v55 = vunpack.c.l.bf16 %v2435_v43 }
 0x1c1   : > { %v1912_v30 = vadd.f32 %v3022_v29, %v1911_v56  ;;  %v1189_v59 = vpop.f32.mrf.mxu1 }
 0x1c2   : > { %v1364_v54 = vpop.f32.mrf.mxu3  ;;  %v1190_v61 = vadd.f32 %v1189_v59, %v2923_v11  ;;  %v1646_v11 = vpop.permute.xlu2 %1645 }
 0x1c3   : > { %v1365_v33 = vadd.f32 %v1364_v54, %v1276_v58  ;;  %1981 = vst [vmem:[%s3026_s15 + $0x38] sm:$0xff] %v1912_v30  ;;  %v2417_v58 = vunpack.c.h.bf16 %v2435_v43 }
 0x1c5   : > { %v1698_v5 = vmul.f32 %v1641_v19, %v1365_v33 }
 0x1c7   : > { %v1794_v1 = vadd.f32 %v2409_v2, %v1698_v5  ;;  %v1278_v48 = vpop.f32.mrf.mxu2 }
 0x1c8   : > { %v1914_v24 = vpop.f32.mrf.mxu0  ;;  %v1279_v6 = vadd.f32 %v1278_v48, %v1190_v61 }
 0x1c9   : > { %v1915_v52 = vadd.f32 %v3022_v29, %v1914_v24  ;;  %v1813_v45 = vpack.c.bf16 %v1794_v1, %v1793_v4  ;;  %v1191_v23 = vpop.f32.mrf.mxu1  ;;  %v2436_v24 = vld [vmem:[%s2974_s8 + $0x78] sm:$0xff]  }
 0x1ca   : > { %v1367_v0 = vpop.f32.mrf.mxu3  ;;  %v1192_v39 = vadd.f32 %v1191_v23, %v2932_v27  ;;  %v1661_v54 = vpop.permute.xlu2 %1660  ;;  %v2421_v31 = vunpack.c.h.bf16 %v2436_v24 }
 0x1cb   : > { %1982 = vst [vmem:[%s3026_s15 + $0x40] sm:$0xff] %v1915_v52  ;;  %1953 = vmatmul.bf16.gmra.mxu0 %v1813_v45  ;;  %v1368_v7 = vadd.f32 %v1367_v0, %v1279_v6 }
 0x1cd   : > { %v1699_v14 = vmul.f32 %v1646_v11, %v1368_v7  ;;  %v2420_v7 = vunpack.c.l.bf16 %v2436_v24 }
 0x1cf   : > { %v1280_v25 = vpop.f32.mrf.mxu2  ;;  %v1795_v18 = vadd.f32 %v2412_v15, %v1699_v14 }
 0x1d0   : > { %v1916_v37 = vpop.f32.mrf.mxu0  ;;  %v1281_v8 = vadd.f32 %v1280_v25, %v1192_v39 }
 0x1d1   : > { %v1917_v13 = vadd.f32 %v3022_v29, %v1916_v37  ;;  %v1194_v32 = vpop.f32.mrf.mxu1 }
 0x1d2   : > { %v1369_v12 = vpop.f32.mrf.mxu3  ;;  %v1195_v35 = vadd.f32 %v1194_v32, %v2941_v34  ;;  %v1656_v34 = vpop.permute.xlu1 %1655 }
 0x1d3   : > { %v1370_v16 = vadd.f32 %v1369_v12, %v1281_v8  ;;  %1983 = vst [vmem:[%s3026_s15 + $0x48] sm:$0xff] %v1917_v13 }
 0x1d5   : > { %v1700_v17 = vmul.f32 %v1651_v63, %v1370_v16 }
 0x1d7   : > { %v1796_v27 = vadd.f32 %v2413_v10, %v1700_v17  ;;  %v1283_v20 = vpop.f32.mrf.mxu2 }
 0x1d8   : > { %v1919_v28 = vpop.f32.mrf.mxu0  ;;  %v1284_v42 = vadd.f32 %v1283_v20, %v1195_v35 }
 0x1d9   : > { %v1920_v40 = vadd.f32 %v3022_v29, %v1919_v28  ;;  %v1814_v41 = vpack.c.bf16 %v1796_v27, %v1795_v18  ;;  %v1196_v21 = vpop.f32.mrf.mxu1 }
 0x1da   : > { %v1372_v36 = vpop.f32.mrf.mxu3  ;;  %v1197_v26 = vadd.f32 %v1196_v21, %v2950_v53  ;;  %v1671_v25 = vpop.permute.xlu1 %1670 }
 0x1db   : > { %1984 = vst [vmem:[%s3026_s15 + $0x50] sm:$0xff] %v1920_v40  ;;  %1958 = vmatmul.bf16.gmra.mxu0 %v1814_v41  ;;  %v1373_v57 = vadd.f32 %v1372_v36, %v1284_v42 }
 0x1dd   : > { %v1701_v47 = vmul.f32 %v1656_v34, %v1373_v57 }
 0x1df   : > { %v1285_v38 = vpop.f32.mrf.mxu2  ;;  %v1797_v49 = vadd.f32 %v2416_v55, %v1701_v47 }
 0x1e0   : > { %v1921_v44 = vpop.f32.mrf.mxu0  ;;  %v1286_v46 = vadd.f32 %v1285_v38, %v1197_v26 }
 0x1e1   : > { %v1922_v9 = vadd.f32 %v3022_v29, %v1921_v44  ;;  %v1199_v51 = vpop.f32.mrf.mxu1 }
 0x1e2   : > { %v1374_v50 = vpop.f32.mrf.mxu3  ;;  %v1200_v62 = vadd.f32 %v1199_v51, %v2962_v3  ;;  %v1666_v3 = vpop.permute.xlu0 %1665 }
 0x1e3   : > { %v1375_v56 = vadd.f32 %v1374_v50, %v1286_v46  ;;  %1985 = vst [vmem:[%s3026_s15 + $0x58] sm:$0xff] %v1922_v9 }
 0x1e5   : > { %v1702_v30 = vmul.f32 %v1661_v54, %v1375_v56 }
 0x1e7   : > { %v1798_v53 = vadd.f32 %v2417_v58, %v1702_v30  ;;  %v1288_v59 = vpop.f32.mrf.mxu2 }
 0x1e8   : > { %v1924_v60 = vpop.f32.mrf.mxu0  ;;  %v1289_v5 = vadd.f32 %v1288_v59, %v1200_v62 }
 0x1e9   : > { %v1925_v2 = vadd.f32 %v3022_v29, %v1924_v60  ;;  %v1815_v19 = vpack.c.bf16 %v1798_v53, %v1797_v49  ;;  %v1201_v4 = vpop.f32.mrf.mxu1 }
 0x1ea   : > { %v1377_v33 = vpop.f32.mrf.mxu3  ;;  %v1202_v48 = vadd.f32 %v1201_v4, %v2968_v22 }
 0x1eb   : > { %1986 = vst [vmem:[%s3026_s15 + $0x60] sm:$0xff] %v1925_v2  ;;  %1963 = vmatmul.bf16.gmra.mxu0 %v1815_v19  ;;  %v1378_v1 = vadd.f32 %v1377_v33, %v1289_v5 }
 0x1ed   : > { %v1703_v6 = vmul.f32 %v1666_v3, %v1378_v1 }
 0x1ef   : > { %v1290_v61 = vpop.f32.mrf.mxu2  ;;  %v1799_v22 = vadd.f32 %v2420_v7, %v1703_v6 }
 0x1f0   : > { %v1926_v0 = vpop.f32.mrf.mxu0  ;;  %v1291_v52 = vadd.f32 %v1290_v61, %v1202_v48 }
 0x1f1   : > { %v1927_v45 = vadd.f32 %v3022_v29, %v1926_v0 }
 0x1f2   : > { %v1379_v23 = vpop.f32.mrf.mxu3 }
 0x1f3   : > { %v1380_v39 = vadd.f32 %v1379_v23, %v1291_v52  ;;  %1987 = vst [vmem:[%s3026_s15 + $0x68] sm:$0xff] %v1927_v45 }
 0x1f5   : > { %v1704_v37 = vmul.f32 %v1671_v25, %v1380_v39 }
 0x1f7   : > { %v1800_v8 = vadd.f32 %v2421_v31, %v1704_v37 }
 0x1f8   : > { %v1929_v12 = vpop.f32.mrf.mxu0 }
 0x1f9   : > { %v1930_v13 = vadd.f32 %v3022_v29, %v1929_v12  ;;  %v1816_v11 = vpack.c.bf16 %v1800_v8, %v1799_v22 }
 0x1fb   : > { %1988 = vst [vmem:[%s3026_s15 + $0x70] sm:$0xff] %v1930_v13  ;;  %1968 = vmatmul.bf16.gmra.mxu0 %v1816_v11 }
 0x200   : > { %v1931_v32 = vpop.f32.mrf.mxu0 }
 0x201   : > { %v1932_v14 = vadd.f32 %v3022_v29, %v1931_v32 }
 0x203   : > { %1989 = vst [vmem:[%s3026_s15 + $0x78] sm:$0xff] %v1932_v14 }
 0x208   : > { %v1934_v15 = vpop.f32.mrf.mxu0 }
 0x209   : > { %v1935_v16 = vadd.f32 %v3022_v29, %v1934_v15 }
 0x20b   : > { %1990 = vst [vmem:[%s3026_s15 + $0x80] sm:$0xff] %v1935_v16 }
 0x210   : > { %v1936_v10 = vpop.f32.mrf.mxu0 }
 0x211   : > { %v1937_v63 = vadd.f32 %v3022_v29, %v1936_v10 }
 0x213   : > { %1991 = vst [vmem:[%s3026_s15 + $0x88] sm:$0xff] %v1937_v63 }
 0x218   : > { %v1939_v17 = vpop.f32.mrf.mxu0 }
 0x219   : > { %v1940_v18 = vadd.f32 %v3022_v29, %v1939_v17 }
 0x21b   : > { %1992 = vst [vmem:[%s3026_s15 + $0x90] sm:$0xff] %v1940_v18 }
 0x220   : > { %v1941_v27 = vpop.f32.mrf.mxu0 }
 0x221   : > { %v1942_v20 = vadd.f32 %v3022_v29, %v1941_v27 }
 0x223   : > { %1993 = vst [vmem:[%s3026_s15 + $0x98] sm:$0xff] %v1942_v20 }
 0x228   : > { %v1944_v28 = vpop.f32.mrf.mxu0 }
 0x229   : > { %v1945_v35 = vadd.f32 %v3022_v29, %v1944_v28 }
 0x22b   : > { %1994 = vst [vmem:[%s3026_s15 + $0xa0] sm:$0xff] %v1945_v35 }
 0x230   : > { %v1946_v36 = vpop.f32.mrf.mxu0 }
 0x231   : > { %v1947_v40 = vadd.f32 %v3022_v29, %v1946_v36 }
 0x233   : > { %1995 = vst [vmem:[%s3026_s15 + $0xa8] sm:$0xff] %v1947_v40 }
 0x238   : > { %v1949_v41 = vpop.f32.mrf.mxu0 }
 0x239   : > { %v1950_v21 = vadd.f32 %v3022_v29, %v1949_v41 }
 0x23b   : > { %1996 = vst [vmem:[%s3026_s15 + $0xb0] sm:$0xff] %v1950_v21 }
 0x240   : > { %v1951_v42 = vpop.f32.mrf.mxu0 }
 0x241   : > { %v1952_v57 = vadd.f32 %v3022_v29, %v1951_v42 }
 0x243   : > { %1997 = vst [vmem:[%s3026_s15 + $0xb8] sm:$0xff] %v1952_v57 }
 0x248   : > { %v1954_v26 = vpop.f32.mrf.mxu0 }
 0x249   : > { %v1955_v43 = vadd.f32 %v3022_v29, %v1954_v26 }
 0x24b   : > { %1998 = vst [vmem:[%s3026_s15 + $0xc0] sm:$0xff] %v1955_v43 }
 0x250   : > { %v1956_v38 = vpop.f32.mrf.mxu0 }
 0x251   : > { %v1957_v44 = vadd.f32 %v3022_v29, %v1956_v38 }
 0x253   : > { %1999 = vst [vmem:[%s3026_s15 + $0xc8] sm:$0xff] %v1957_v44 }
 0x258   : > { %v1959_v46 = vpop.f32.mrf.mxu0 }
 0x259   : > { %v1960_v50 = vadd.f32 %v3022_v29, %v1959_v46 }
 0x25b   : > { %2000 = vst [vmem:[%s3026_s15 + $0xd0] sm:$0xff] %v1960_v50 }
 0x260   : > { %v1961_v9 = vpop.f32.mrf.mxu0 }
 0x261   : > { %v1962_v34 = vadd.f32 %v3022_v29, %v1961_v9 }
 0x263   : > { %2001 = vst [vmem:[%s3026_s15 + $0xd8] sm:$0xff] %v1962_v34 }
 0x268   : > { %v1964_v51 = vpop.f32.mrf.mxu0 }
 0x269   : > { %v1965_v47 = vadd.f32 %v3022_v29, %v1964_v51 }
 0x26b   : > { %2002 = vst [vmem:[%s3026_s15 + $0xe0] sm:$0xff] %v1965_v47 }
 0x270   : > { %v1966_v55 = vpop.f32.mrf.mxu0 }
 0x271   : > { %v1967_v56 = vadd.f32 %v3022_v29, %v1966_v55 }
 0x273   : > { %2003 = vst [vmem:[%s3026_s15 + $0xe8] sm:$0xff] %v1967_v56 }
 0x278   : > { %v1969_v58 = vpop.f32.mrf.mxu0 }
 0x279   : > { %v1970_v54 = vadd.f32 %v3022_v29, %v1969_v58 }
 0x27b   : > { %2004 = vst [vmem:[%s3026_s15 + $0xf0] sm:$0xff] %v1970_v54 }
 0x280   : > { %v1971_v30 = vpop.f32.mrf.mxu0 }
 0x281   : > { %v1972_v49 = vadd.f32 %v3022_v29, %v1971_v30 }
 0x283   : > { %2005 = vst [vmem:[%s3026_s15 + $0xf8] sm:$0xff] %v1972_v49 }
 0x284   : > { %2550 = shalt.err (!%p2547_p6)
}
 0x285   : > { %s2604_s14 = smov 128   ;;  %s2605_s15 = smov 8  }
 0x286   : > { %2461 = dma.vmem_to_hbm [thread:$0]  (%p2681_p4), %s2020_s19, 4096, %s2022_s20, %s2007_s27, %s2604_s14, %s2604_s14, %s2605_s15  }
 0x287 PF: > { %p2467_p7 = scmp.ge.s32.totalorder %s2601_s26, 2  ;;  %s2036_s17 = sand.u32 1, %s2581_s21  }
 0x288   : > { %s2037_s13 = scalar_lea.sflag [#allocation4], %s2036_s17 }
 0x289   : > { %p2464_p9 = pnand %p2467_p7, %p2688_p8 }
 0x28b   : > { %p2465_p10 = pneg %p2464_p9 }
 0x28d   : > { %2576 = dma.done.wait (%p2465_p10), %s2037_s13, 4096  }
 0x28e   : > { %2578 = vsyncadd (%p2465_p10), %s2037_s13, 4294963200  ;;  %s19_s26 = sadd.s32 1, %s2601_s26   ;;  %s3159_s21 = smov %s2585_s22 }
 0x28f   : > { %p16_p11 = scmp.ge.s32.totalorder %s19_s26, 4   ;;  %s3160_s22 = smov %s2589_s23 }
 0x290   : > { %s3161_s23 = smov %s2694_s10  ;;  %s3162_s24 = smov %s2597_s25 }
 0x291   : > { %s3163_s25 = smov %s3165_s29  ;;  %18 = sbr.rel (!%p16_p11) target bundleno = 4 (0x4), region = 96 }
 0x296   :  { %2043 = vsyncpa [#allocation4], 1 }
 0x297   :  { %2045 = vsyncpa [#allocation4 + $0x1], 1 }

// kernel: ginemb_forward_prepared.3
= control target key start
LH: loop header
LB: loop body
LE: loop exit
PB: predicated region body
PF: predicated region fallthrough
CT: control target
= control target key end

     0   :  { %11 = vsyncpa [#allocation4], 0  ;;  %s3281_s0 = inlined_call_operand.hbm [shape: s8[512,512], index: 0, kind: input, shape index: {}]   ;;  %s3282_s1 = inlined_call_operand.vmem [shape: bf16[512,128], index: 1, kind: input, shape index: {}, may-alias: {1,2}]   ;;  %s3283_s2 = inlined_call_operand.vmem [shape: bf16[512,128], index: 2, kind: input, shape index: {}, may-alias: {1,2}]   ;;  %s3284_s3 = inlined_call_operand.vmem [shape: f32[512,1], index: 3, kind: input, shape index: {}]   ;;  %s3285_s4 = inlined_call_operand.vmem [shape: bf16[128,128], index: 4, kind: input, shape index: {}]   ;;  %s3286_s5 = inlined_call_operand.vmem [shape: f32[1,128], index: 5, kind: input, shape index: {}]   ;;  %s3287_s6 = inlined_call_operand.vmem [shape: bf16[512,128], index: 6, kind: output, shape index: {}]  }
   0x1   :  { %13 = vsyncpa [#allocation4 + $0x1], 0  ;;  %s2799_s21 = smov 0   ;;  %s2801_s22 = smov 0  }
   0x2   :  { %s2803_s23 = smov 0   ;;  %s2805_s24 = smov 0  }
   0x3   :  { %s2807_s25 = smov 0   ;;  %s2809_s26 = smov 0  }
   0x4 LB: > { %s2198_s27 = sadd.s32 4294967295, %s2759_s26   ;;  %s31_s28 = sadd.s32 1, %s2755_s25  ;;  %s2759_s26 = sphi %s2809_s26, %s19_s26   ;;  %s2755_s25 = sphi %s2807_s25, %s3294_s25   ;;  %s2751_s24 = sphi %s2805_s24, %s3293_s24   ;;  %s2747_s23 = sphi %s2803_s23, %s3292_s23   ;;  %s2743_s22 = sphi %s2801_s22, %s3291_s22   ;;  %s2739_s21 = sphi %s2799_s21, %s3290_s21  }
   0x5   : > { %p33_p0 = scmp.ge.s32.totalorder %s31_s28, 2  ;;  %s40_s29 = sadd.s32 1, %s2747_s23 }
   0x6   : > { %p47_p1 = scmp.ne.s32.totalorder %s2747_s23, %s2743_s22  ;;  %p48_p2 = scmp.eq.s32.totalorder %s2759_s26, 0 }
   0x7   : > { %s3296_s28 = smov (%p33_p0, %s31_s28), 0  ;;  %p53_p4 = scmp.ne.s32.totalorder %s2743_s22, %s2739_s21 }
   0x8   : > { %p2835_p3 = por %p48_p2, %p47_p1  ;;  %s35_s7 = ssub.s32 %s2755_s25, %s3296_s28 }
   0x9   : > { %p54_p5 = scmp.eq.s32.totalorder %s2198_s27, 0  ;;  %p38_p6 = scmp.eq.s32.totalorder %s35_s7, 0 }
   0xa   : > { %p2623_p8 = scmp.lt.s32.totalorder %s2759_s26, 2  ;;  %s238_s10 = sand.u32 1, %s2747_s23  }
   0xb   : > { %p2842_p7 = por %p54_p5, %p53_p4  ;;  %s2378_s11 = sshll.u32 %s2755_s25, 8 }
   0xc   : > { %s2848_s9 = scalar_select %p38_p6, %s2747_s23, %s40_s29  }
   0xd   : > { %s2203_s12 = sshll.u32 %s238_s10, 8  ;;  %s250_s15 = scalar_lea.hbm %s3281_s0, %s2378_s11 }
   0xe   : > { %s251_s16 = sshll.u32 %s250_s15, 4  ;;  %s242_s17 = scalar_lea.vmem [#allocation3], %s2203_s12  ;;  %s252_s16 = int_to_ptr.hbm [resolvable:$true] %s251_s16 }
   0xf   : > { %s253_s18 = sshll.u32 %s242_s17, 4  ;;  %p2620_p9 = pnand %p2623_p8, %p2835_p3  ;;  %s254_s18 = int_to_ptr.vmem [resolvable:$true] %s253_s18 }
  0x10   : > { %p2207_p10 = scmp.ge.s32.totalorder %s2759_s26, 1  ;;  %p279_p11 = scmp.lt.s32.totalorder %s2759_s26, 3 }
  0x11   : > { %s239_s19 = scalar_lea.sflag [#allocation4], %s238_s10  ;;  %s2761_s20 = smov 512  }
  0x12   : > { %s2762_s21 = smov 32   ;;  %p280_p12 = pnand %p2207_p10, %p279_p11 }
  0x13   : > { %2622 = dma.hbm_to_vmem [thread:$0]  (!%p2620_p9), %s252_s16, 4096, %s254_s18, %s239_s19, %s2761_s20, %s2761_s20, %s2762_s21  }
  0x14   : > { %283 = sbr.rel (%p280_p12) target bundleno = 654 (0x28e), region = 44  ;;  %s285_s27 = sand.u32 (!%p280_p12), 1, %s2743_s22  }
  0x15   : > { %s2208_s29 = sshll.u32 (!%p280_p12), %s285_s27, 8  ;;  %s286_s7 = scalar_lea.sflag (!%p280_p12), [#allocation4], %s285_s27 }
  0x16   : > { %s2860_s11 = scalar_lea.vmem (!%p280_p12), [#allocation3], %s2208_s29 }
  0x19   : > { %2734 = dma.done.wait (%p2842_p7), %s286_s7, 4096  }
  0x1a   : > { %2736 = vsyncadd (%p2842_p7), %s286_s7, 4294963200  ;;  %s2209_s30 = sshll.u32 %s2751_s24, 5  ;;  %v2386_v0 = vld [vmem:[%s3282_s1 + $0x38] sm:$0xff]  ;;  %v2385_v1 = vld [vmem:[%s3282_s1 + $0x30] sm:$0xff]  ;;  %v2763_v2 = vmov 0  }
  0x1b   : > { %p343_p13 = scmp.lt.s32.totalorder %s2209_s30, 63  ;;  %2593 = vmatpush.bf16.msra.mxu1 %v2386_v0  ;;  %2594 = vmatpush.bf16.msra.mxu2 %v2386_v0  ;;  %v2384_v4 = vld [vmem:[%s3282_s1 + $0x28] sm:$0xff]  ;;  %v2383_v5 = vld [vmem:[%s3282_s1 + $0x20] sm:$0xff]  ;;  %v2382_v7 = vld [vmem:[%s3282_s1 + $0x18] sm:$0xff] }
  0x1c   : > { %2595 = vmatpush.bf16.msra.mxu3 %v2386_v0  ;;  %2675 = vset.pattern.permute.xlu0 %v2763_v2  ;;  %v2381_v8 = vld [vmem:[%s3282_s1 + $0x10] sm:$0xff]  ;;  %v2896_v9 = vld [vmem:[%s2860_s11 + $0x40] sm:$0xff]  ;;  %v2380_v18 = vld [vmem:[%s3282_s1 + $0x8] sm:$0xff] }
  0x1d   : > { %s3298_s30 = smov (!%p343_p13, %s2209_s30), 63  ;;  %2676 = vset.pattern.permute.xlu1 %v2763_v2  ;;  %1036 = vmatpush.bf16.msra.mxu0 %v2386_v0  ;;  %v2899_v10 = vld [vmem:[%s2860_s11 + $0x80] sm:$0xff]  ;;  %v460_v14 = vunpack.c.0.s8 %v2896_v9  ;;  %v464_v15 = vunpack.c.1.s8 %v2896_v9  ;;  %v2402_v30 = vld [vmem:[%s3282_s1 + $0xb8] sm:$0xff]  ;;  %v2401_v36 = vld [vmem:[%s3282_s1 + $0xb0] sm:$0xff]  ;;  %v468_v44 = vunpack.c.2.s8 %v2896_v9  ;;  %v472_v45 = vunpack.c.3.s8 %v2896_v9 }
  0x1e   : > { %s2212_s10 = sshll.u32 %s3298_s30, 3  ;;  %2677 = vset.pattern.permute.xlu2 %v2763_v2  ;;  %v2902_v11 = vld [vmem:[%s2860_s11 + $0xc0] sm:$0xff]  ;;  %v492_v16 = vunpack.c.0.s8 %v2899_v10  ;;  %v496_v17 = vunpack.c.1.s8 %v2899_v10  ;;  %v2410_v31 = vld [vmem:[%s3282_s1 + $0xf8] sm:$0xff]  ;;  %v2409_v37 = vld [vmem:[%s3282_s1 + $0xf0] sm:$0xff]  ;;  %v500_v46 = vunpack.c.2.s8 %v2899_v10  ;;  %v504_v47 = vunpack.c.3.s8 %v2899_v10  ;;  %s2210_s24 = sshll.u32 %s3298_s30, 2 }
  0x1f   : > { %s2876_s16 = scalar_lea.vmem %s3284_s3, %s2212_s10  ;;  %2596 = vmatpush.bf16.msra.mxu1 %v2385_v1  ;;  %2597 = vmatpush.bf16.msra.mxu2 %v2385_v1  ;;  %v524_v19 = vunpack.c.0.s8 %v2902_v11  ;;  %v528_v20 = vunpack.c.1.s8 %v2902_v11  ;;  %v588_v21 = vcvt.s32.f32 %v460_v14  ;;  %v592_v22 = vcvt.s32.f32 %v464_v15  ;;  %v2379_v26 = vld [vmem:[%s3282_s1] sm:$0xff]  ;;  %v2394_v32 = vld [vmem:[%s3282_s1 + $0x78] sm:$0xff]  ;;  %v2393_v38 = vld [vmem:[%s3282_s1 + $0x70] sm:$0xff]  ;;  %s3140_s19 = scalar_lea.vmem %s3283_s2, %s2210_s24 }
  0x20   : > { %v1459_v3 = vld [vmem:[%s2876_s16] sm:$0xff]  ;;  %2598 = vmatpush.bf16.msra.mxu3 %v2385_v1  ;;  %v1460_v6 = vld [vmem:[%s2876_s16 + $0x8] sm:$0xff]  ;;  %v1461_v12 = vld [vmem:[%s2876_s16 + $0x10] sm:$0xff]  ;;  %v620_v23 = vcvt.s32.f32 %v492_v16  ;;  %v624_v24 = vcvt.s32.f32 %v496_v17  ;;  %v532_v48 = vunpack.c.2.s8 %v2902_v11  ;;  %v536_v49 = vunpack.c.3.s8 %v2902_v11  ;;  %s3197_s29 = scalar_lea.vmem %s3287_s6, %s2210_s24 }
  0x21   : > { %1525 = vperm.xlu0 %2675, %v1459_v3   ;;  %1037 = vmatpush.bf16.msra.mxu0 %v2385_v1  ;;  %v1465_v13 = vld [vmem:[%s2876_s16 + $0x30] sm:$0xff]  ;;  %v1462_v25 = vld [vmem:[%s2876_s16 + $0x18] sm:$0xff]  ;;  %v652_v27 = vcvt.s32.f32 %v524_v19  ;;  %v656_v28 = vcvt.s32.f32 %v528_v20  ;;  %v1468_v29 = vld [vmem:[%s2876_s16 + $0x48] sm:$0xff]  ;;  %v700_v33 = vpack.c.bf16 %v592_v22, %v588_v21  ;;  %v596_v53 = vcvt.s32.f32 %v468_v44 }
  0x22   : > { %1535 = vperm.xlu1 %2676, %v1461_v12   ;;  %v716_v34 = vpack.c.bf16 %v624_v24, %v620_v23  ;;  %v2400_v39 = vld [vmem:[%s3282_s1 + $0xa8] sm:$0xff]  ;;  %v1466_v40 = vld [vmem:[%s2876_s16 + $0x38] sm:$0xff]  ;;  %v1471_v41 = vld [vmem:[%s2876_s16 + $0x60] sm:$0xff]  ;;  %v600_v54 = vcvt.s32.f32 %v472_v45  ;;  %v628_v55 = vcvt.s32.f32 %v500_v46  ;;  %v632_v56 = vcvt.s32.f32 %v504_v47 }
  0x23   : > { %2599 = vmatpush.bf16.msra.mxu1 %v2384_v4  ;;  %2600 = vmatpush.bf16.msra.mxu2 %v2384_v4  ;;  %v732_v35 = vpack.c.bf16 %v656_v28, %v652_v27  ;;  %v2408_v42 = vld [vmem:[%s3282_s1 + $0xe8] sm:$0xff]  ;;  %v2399_v50 = vld [vmem:[%s3282_s1 + $0xa0] sm:$0xff]  ;;  %v660_v57 = vcvt.s32.f32 %v532_v48  ;;  %v664_v58 = vcvt.s32.f32 %v536_v49  ;;  %v1469_v59 = vld [vmem:[%s2876_s16 + $0x50] sm:$0xff] }
  0x24   : > { %2601 = vmatpush.bf16.msra.mxu3 %v2384_v4  ;;  %v2392_v43 = vld [vmem:[%s3282_s1 + $0x68] sm:$0xff]  ;;  %v2407_v51 = vld [vmem:[%s3282_s1 + $0xe0] sm:$0xff]  ;;  %v1474_v60 = vld [vmem:[%s2876_s16 + $0x78] sm:$0xff]  ;;  %v704_v0 = vpack.c.bf16 %v600_v54, %v596_v53  ;;  %v720_v1 = vpack.c.bf16 %v632_v56, %v628_v55 }
  0x25   : > { %1038 = vmatpush.bf16.msra.mxu0 %v2384_v4  ;;  %v2391_v52 = vld [vmem:[%s3282_s1 + $0x60] sm:$0xff]  ;;  %v2398_v61 = vld [vmem:[%s3282_s1 + $0x98] sm:$0xff]  ;;  %v736_v2 = vpack.c.bf16 %v664_v58, %v660_v57  ;;  %v2397_v3 = vld [vmem:[%s3282_s1 + $0x90] sm:$0xff] }
  0x26   : > { %v2406_v62 = vld [vmem:[%s3282_s1 + $0xd8] sm:$0xff]  ;;  %v2405_v4 = vld [vmem:[%s3282_s1 + $0xd0] sm:$0xff]  ;;  %v2396_v9 = vld [vmem:[%s3282_s1 + $0x88] sm:$0xff] }
  0x27   : > { %2602 = vmatpush.bf16.msra.mxu1 %v2383_v5  ;;  %2603 = vmatpush.bf16.msra.mxu2 %v2383_v5  ;;  %v2390_v63 = vld [vmem:[%s3282_s1 + $0x58] sm:$0xff]  ;;  %v1472_v10 = vld [vmem:[%s2876_s16 + $0x68] sm:$0xff]  ;;  %v1477_v11 = vld [vmem:[%s2876_s16 + $0x90] sm:$0xff] }
  0x28   : > { %2604 = vmatpush.bf16.msra.mxu3 %v2383_v5  ;;  %v2404_v14 = vld [vmem:[%s3282_s1 + $0xc8] sm:$0xff]  ;;  %v396_v16 = vld [vmem:[%s2860_s11] sm:$0xff] }
  0x29   : > { %1530 = vperm.xlu0 %2675, %v1460_v6   ;;  %1039 = vmatpush.bf16.msra.mxu0 %v2383_v5  ;;  %v2389_v5 = vld [vmem:[%s3282_s1 + $0x50] sm:$0xff]  ;;  %v2985_v6 = vld [vmem:[%s2860_s11 + $0x60] sm:$0xff]  ;;  %v2388_v15 = vld [vmem:[%s3282_s1 + $0x48] sm:$0xff]  ;;  %v428_v19 = vunpack.c.0.s8 %v396_v16  ;;  %v432_v20 = vunpack.c.1.s8 %v396_v16  ;;  %v440_v44 = vunpack.c.3.s8 %v396_v16 }
  0x2a   : > { %1540 = vperm.xlu1 %2676, %v1462_v25   ;;  %v476_v12 = vunpack.c.0.s8 %v2985_v6  ;;  %v2395_v23 = vld [vmem:[%s3282_s1 + $0x80] sm:$0xff]  ;;  %v484_v47 = vunpack.c.2.s8 %v2985_v6  ;;  %v488_v48 = vunpack.c.3.s8 %v2985_v6  ;;  %v1464_v54 = vld [vmem:[%s2876_s16 + $0x28] sm:$0xff] }
  0x2b   : > { %2605 = vmatpush.bf16.msra.mxu1 %v2382_v7  ;;  %2606 = vmatpush.bf16.msra.mxu2 %v2382_v7  ;;  %v556_v24 = vcvt.s32.f32 %v428_v19  ;;  %v560_v25 = vcvt.s32.f32 %v432_v20  ;;  %v2403_v27 = vld [vmem:[%s3282_s1 + $0xc0] sm:$0xff]  ;;  %v568_v46 = vcvt.s32.f32 %v440_v44  ;;  %v1470_v20 = vld [vmem:[%s2876_s16 + $0x58] sm:$0xff]  ;;  %v1476_v44 = vld [vmem:[%s2876_s16 + $0x88] sm:$0xff] }
  0x2c   : > { %2607 = vmatpush.bf16.msra.mxu3 %v2382_v7  ;;  %v2387_v28 = vld [vmem:[%s3282_s1 + $0x40] sm:$0xff]  ;;  %v612_v55 = vcvt.s32.f32 %v484_v47  ;;  %v616_v56 = vcvt.s32.f32 %v488_v48 }
  0x2d   : > { %1040 = vmatpush.bf16.msra.mxu0 %v2382_v7  ;;  %v2988_v7 = vld [vmem:[%s2860_s11 + $0xa0] sm:$0xff] }
  0x2e   : > { %v508_v17 = vunpack.c.0.s8 %v2988_v7  ;;  %v516_v49 = vunpack.c.2.s8 %v2988_v7 }
  0x2f   : > { %2608 = vmatpush.bf16.msra.mxu1 %v2381_v8  ;;  %2609 = vmatpush.bf16.msra.mxu2 %v2381_v8 }
  0x30   : > { %2610 = vmatpush.bf16.msra.mxu3 %v2381_v8  ;;  %v644_v57 = vcvt.s32.f32 %v516_v49 }
  0x31   : > { %1555 = vperm.xlu0 %2675, %v1465_v13   ;;  %1041 = vmatpush.bf16.msra.mxu0 %v2381_v8  ;;  %v2991_v8 = vld [vmem:[%s2860_s11 + $0xe0] sm:$0xff]  ;;  %v480_v13 = vunpack.c.1.s8 %v2985_v6  ;;  %v1489_v6 = vld [vmem:[%s2876_s16 + $0xf0] sm:$0xff] }
  0x32   : > { %1560 = vperm.xlu1 %2676, %v1466_v40   ;;  %v540_v21 = vunpack.c.0.s8 %v2991_v8  ;;  %v544_v22 = vunpack.c.1.s8 %v2991_v8  ;;  %v1463_v40 = vld [vmem:[%s2876_s16 + $0x20] sm:$0xff] }
  0x33   : > { %2611 = vmatpush.bf16.msra.mxu1 %v2380_v18  ;;  %2612 = vmatpush.bf16.msra.mxu2 %v2380_v18 }
  0x34   : > { %2613 = vmatpush.bf16.msra.mxu3 %v2380_v18  ;;  %1545 = vperm.xlu2 %2677, %v1463_v40  }
  0x35   : > { %1042 = vmatpush.bf16.msra.mxu0 %v2380_v18  ;;  %v512_v18 = vunpack.c.1.s8 %v2988_v7 }
  0x37   : > { %2614 = vmatpush.bf16.msra.mxu1 %v2379_v26  ;;  %2615 = vmatpush.bf16.msra.mxu2 %v2379_v26 }
  0x38   : > { %2616 = vmatpush.bf16.msra.mxu3 %v2379_v26 }
  0x39   : > { %1570 = vperm.xlu0 %2675, %v1468_v29   ;;  %1043 = vmatpush.bf16.msra.mxu0 %v2379_v26  ;;  %v604_v26 = vcvt.s32.f32 %v476_v12  ;;  %v608_v29 = vcvt.s32.f32 %v480_v13 }
  0x3a   : > { %1064 = vmatmul.bf16.vlgmr.msra.gmra.mxu1 %v700_v33  ;;  %1084 = vmatmul.bf16.vlgmr.msra.gmra.mxu2 %v716_v34  ;;  %v668_v33 = vcvt.s32.f32 %v540_v21  ;;  %v672_v34 = vcvt.s32.f32 %v544_v22 }
  0x3b   : > { %1214 = vmatpush.bf16.msrb.mxu2 %v2402_v30  ;;  %1125 = vmatpush.bf16.msrb.mxu1 %v2394_v32  ;;  %v636_v30 = vcvt.s32.f32 %v508_v17  ;;  %v684_v32 = vpack.c.bf16 %v560_v25, %v556_v24 }
  0x3c   : > { %1303 = vmatpush.bf16.msrb.mxu3 %v2410_v31  ;;  %1575 = vperm.xlu1 %2676, %v1469_v59   ;;  %v640_v31 = vcvt.s32.f32 %v512_v18 }
  0x3d   : > { %1104 = vmatmul.bf16.vlgmr.msra.gmra.mxu3 %v732_v35  ;;  %v1475_v35 = vld [vmem:[%s2876_s16 + $0x80] sm:$0xff]  ;;  %1044 = vmatmul.bf16.vlgmr.msra.gmra.mxu0 %v684_v32  ;;  %v1490_v32 = vld [vmem:[%s2876_s16 + $0xf8] sm:$0xff] }
  0x3e   : > { %1550 = vperm.xlu2 %2677, %v1464_v54   ;;  %v401_v54 = vld [vmem:[%s2860_s11 + $0x28] sm:$0xff] }
  0x3f   : > { %1215 = vmatpush.bf16.msrb.mxu2 %v2401_v36  ;;  %1126 = vmatpush.bf16.msrb.mxu1 %v2393_v38  ;;  %v1480_v36 = vld [vmem:[%s2876_s16 + $0xa8] sm:$0xff]  ;;  %v724_v38 = vpack.c.bf16 %v640_v31, %v636_v30  ;;  %v1473_v31 = vld [vmem:[%s2876_s16 + $0x70] sm:$0xff] }
  0x40   : > { %1304 = vmatpush.bf16.msrb.mxu3 %v2409_v37  ;;  %v708_v37 = vpack.c.bf16 %v608_v29, %v604_v26 }
  0x41   : > { %1585 = vperm.xlu0 %2675, %v1471_v41   ;;  %v1478_v41 = vld [vmem:[%s2876_s16 + $0x98] sm:$0xff] }
  0x43   : > { %1216 = vmatpush.bf16.msrb.mxu2 %v2400_v39  ;;  %1127 = vmatpush.bf16.msrb.mxu1 %v2392_v43  ;;  %v740_v39 = vpack.c.bf16 %v672_v34, %v668_v33  ;;  %v436_v43 = vunpack.c.2.s8 %v396_v16 }
  0x44   : > { %1305 = vmatpush.bf16.msrb.mxu3 %v2408_v42  ;;  %1590 = vperm.xlu1 %2676, %v1472_v10   ;;  %v1483_v42 = vld [vmem:[%s2876_s16 + $0xc0] sm:$0xff] }
  0x45   : > { %v564_v45 = vcvt.s32.f32 %v436_v43 }
  0x47   : > { %1217 = vmatpush.bf16.msrb.mxu2 %v2399_v50  ;;  %1128 = vmatpush.bf16.msrb.mxu1 %v2391_v52  ;;  %v520_v50 = vunpack.c.3.s8 %v2988_v7  ;;  %v552_v52 = vunpack.c.3.s8 %v2991_v8  ;;  %v688_v53 = vpack.c.bf16 %v568_v46, %v564_v45  ;;  %v399_v7 = vld [vmem:[%s2860_s11 + $0x18] sm:$0xff] }
  0x48   : > { %1306 = vmatpush.bf16.msrb.mxu3 %v2407_v51  ;;  %v548_v51 = vunpack.c.2.s8 %v2991_v8  ;;  %v400_v8 = vld [vmem:[%s2860_s11 + $0x20] sm:$0xff]  ;;  %v435_v16 = vunpack.c.1.s8 %v399_v7 }
  0x49   : > { %1600 = vperm.xlu0 %2675, %v1474_v60   ;;  %v648_v58 = vcvt.s32.f32 %v520_v50  ;;  %v680_v60 = vcvt.s32.f32 %v552_v52  ;;  %v448_v10 = vunpack.c.1.s8 %v400_v8  ;;  %v452_v33 = vunpack.c.2.s8 %v400_v8 }
  0x4a   : > { %1069 = vmatmul.bf16.gmra.mxu1 %v704_v0  ;;  %1089 = vmatmul.bf16.gmra.mxu2 %v720_v1  ;;  %v676_v59 = vcvt.s32.f32 %v548_v51  ;;  %v563_v26 = vcvt.s32.f32 %v435_v16  ;;  %v456_v34 = vunpack.c.3.s8 %v400_v8 }
  0x4b   : > { %1218 = vmatpush.bf16.msrb.mxu2 %v2398_v61  ;;  %1129 = vmatpush.bf16.msrb.mxu1 %v2390_v63  ;;  %v1481_v61 = vld [vmem:[%s2876_s16 + $0xb0] sm:$0xff]  ;;  %v712_v63 = vpack.c.bf16 %v616_v56, %v612_v55  ;;  %v728_v0 = vpack.c.bf16 %v648_v58, %v644_v57  ;;  %v576_v18 = vcvt.s32.f32 %v448_v10  ;;  %v1479_v56 = vld [vmem:[%s2876_s16 + $0xa0] sm:$0xff]  ;;  %v403_v57 = vld [vmem:[%s2860_s11 + $0x38] sm:$0xff]  ;;  %v445_v58 = vunpack.c.0.s8 %v401_v54 }
  0x4c   : > { %1307 = vmatpush.bf16.msrb.mxu3 %v2406_v62  ;;  %1605 = vperm.xlu1 %2676, %v1475_v35   ;;  %v1486_v62 = vld [vmem:[%s2876_s16 + $0xd8] sm:$0xff]  ;;  %v744_v1 = vpack.c.bf16 %v680_v60, %v676_v59  ;;  %v580_v35 = vcvt.s32.f32 %v452_v33  ;;  %v402_v55 = vld [vmem:[%s2860_s11 + $0x30] sm:$0xff]  ;;  %v449_v59 = vunpack.c.1.s8 %v401_v54  ;;  %v453_v10 = vunpack.c.2.s8 %v401_v54 }
  0x4d   : > { %1109 = vmatmul.bf16.gmra.mxu3 %v736_v2  ;;  %1049 = vmatmul.bf16.gmra.mxu0 %v688_v53  ;;  %v397_v2 = vld [vmem:[%s2860_s11 + $0x8] sm:$0xff]  ;;  %v446_v60 = vunpack.c.0.s8 %v402_v55  ;;  %v459_v16 = vunpack.c.3.s8 %v403_v57 }
  0x4e   : > { %v433_v12 = vunpack.c.1.s8 %v397_v2 }
  0x4f   : > { %1219 = vmatpush.bf16.msrb.mxu2 %v2397_v3  ;;  %1130 = vmatpush.bf16.msrb.mxu1 %v2389_v5  ;;  %v398_v3 = vld [vmem:[%s2860_s11 + $0x10] sm:$0xff]  ;;  %v1484_v5 = vld [vmem:[%s2876_s16 + $0xc8] sm:$0xff] }
  0x50   : > { %1308 = vmatpush.bf16.msrb.mxu3 %v2405_v4  ;;  %v1467_v4 = vld [vmem:[%s2876_s16 + $0x40] sm:$0xff]  ;;  %v430_v13 = vunpack.c.0.s8 %v398_v3  ;;  %v561_v22 = vcvt.s32.f32 %v433_v12  ;;  %v442_v40 = vunpack.c.3.s8 %v398_v3  ;;  %v454_v12 = vunpack.c.2.s8 %v402_v55 }
  0x51   : > { %1615 = vperm.xlu0 %2675, %v1477_v11   ;;  %1565 = vperm.xlu2 %2677, %v1467_v4   ;;  %v429_v11 = vunpack.c.0.s8 %v397_v2 }
  0x52   : > { %v570_v48 = vcvt.s32.f32 %v442_v40 }
  0x53   : > { %1220 = vmatpush.bf16.msrb.mxu2 %v2396_v9  ;;  %1131 = vmatpush.bf16.msrb.mxu1 %v2388_v15  ;;  %v444_v9 = vunpack.c.0.s8 %v400_v8  ;;  %v431_v15 = vunpack.c.0.s8 %v399_v7  ;;  %v557_v21 = vcvt.s32.f32 %v429_v11  ;;  %v457_v11 = vunpack.c.3.s8 %v401_v54 }
  0x54   : > { %1309 = vmatpush.bf16.msrb.mxu3 %v2404_v14  ;;  %1620 = vperm.xlu1 %2676, %v1478_v41   ;;  %v434_v14 = vunpack.c.1.s8 %v398_v3  ;;  %v439_v41 = vunpack.c.2.s8 %v399_v7 }
  0x55   : > { %v572_v17 = vcvt.s32.f32 %v444_v9  ;;  %v559_v25 = vcvt.s32.f32 %v431_v15  ;;  %v455_v15 = vunpack.c.2.s8 %v403_v57 }
  0x56   : > { %v562_v24 = vcvt.s32.f32 %v434_v14  ;;  %v567_v49 = vcvt.s32.f32 %v439_v41  ;;  %v1485_v14 = vld [vmem:[%s2876_s16 + $0xd0] sm:$0xff] }
  0x57   : > { %1221 = vmatpush.bf16.msrb.mxu2 %v2395_v23  ;;  %1132 = vmatpush.bf16.msrb.mxu1 %v2387_v28  ;;  %v692_v19 = vpack.c.bf16 %v576_v18, %v572_v17  ;;  %v558_v23 = vcvt.s32.f32 %v430_v13  ;;  %v685_v28 = vpack.c.bf16 %v561_v22, %v557_v21  ;;  %v687_v30 = vpack.c.bf16 %v563_v26, %v559_v25  ;;  %v1488_v25 = vld [vmem:[%s2876_s16 + $0xe8] sm:$0xff] }
  0x58   : > { %1310 = vmatpush.bf16.msrb.mxu3 %v2403_v27  ;;  %v1487_v27 = vld [vmem:[%s2876_s16 + $0xe0] sm:$0xff]  ;;  %v458_v13 = vunpack.c.3.s8 %v402_v55  ;;  %v581_v17 = vcvt.s32.f32 %v453_v10  ;;  %v585_v18 = vcvt.s32.f32 %v457_v11  ;;  %v583_v21 = vcvt.s32.f32 %v455_v15 }
  0x59   : > { %1630 = vperm.xlu0 %2675, %v1480_v36   ;;  %1580 = vperm.xlu2 %2677, %v1470_v20   ;;  %v686_v29 = vpack.c.bf16 %v562_v24, %v558_v23  ;;  %v584_v36 = vcvt.s32.f32 %v456_v34  ;;  %v587_v22 = vcvt.s32.f32 %v459_v16 }
  0x5a   : > { %1074 = vmatmul.bf16.gmra.mxu1 %v708_v37  ;;  %1094 = vmatmul.bf16.gmra.mxu2 %v724_v38  ;;  %v437_v37 = vunpack.c.2.s8 %v397_v2  ;;  %v441_v38 = vunpack.c.3.s8 %v397_v2  ;;  %v577_v2 = vcvt.s32.f32 %v449_v59  ;;  %v586_v20 = vcvt.s32.f32 %v458_v13 }
  0x5b   : > { %v696_v43 = vpack.c.bf16 %v584_v36, %v580_v35  ;;  %v697_v23 = vpack.c.bf16 %v585_v18, %v581_v17  ;;  %v699_v26 = vpack.c.bf16 %v587_v22, %v583_v21  ;;  %v2418_v36 = vld [vmem:[%s3285_s4 + $0x38] sm:$0xff] }
  0x5c   : > { %1635 = vperm.xlu1 %2676, %v1481_v61   ;;  %v565_v45 = vcvt.s32.f32 %v437_v37  ;;  %v569_v46 = vcvt.s32.f32 %v441_v38  ;;  %v450_v61 = vunpack.c.1.s8 %v402_v55  ;;  %1895 = vmatpush.bf16.msrb.mxu0 %v2418_v36 }
  0x5d   : > { %1114 = vmatmul.bf16.gmra.mxu3 %v740_v39  ;;  %1054 = vmatmul.bf16.gmra.mxu0 %v692_v19  ;;  %v438_v39 = vunpack.c.2.s8 %v398_v3  ;;  %v574_v3 = vcvt.s32.f32 %v446_v60  ;;  %v582_v19 = vcvt.s32.f32 %v454_v12 }
  0x5e   : > { %v689_v51 = vpack.c.bf16 %v569_v46, %v565_v45  ;;  %v578_v4 = vcvt.s32.f32 %v450_v61 }
  0x5f   : > { %v566_v47 = vcvt.s32.f32 %v438_v39  ;;  %v698_v24 = vpack.c.bf16 %v586_v20, %v582_v19  ;;  %v2414_v19 = vld [vmem:[%s3285_s4 + $0x18] sm:$0xff] }
  0x60   : > { %v694_v8 = vpack.c.bf16 %v578_v4, %v574_v3 }
  0x61   : > { %1645 = vperm.xlu0 %2675, %v1483_v42   ;;  %1595 = vperm.xlu2 %2677, %v1473_v31   ;;  %v443_v42 = vunpack.c.3.s8 %v399_v7  ;;  %v690_v52 = vpack.c.bf16 %v570_v48, %v566_v47  ;;  %v2417_v47 = vld [vmem:[%s3285_s4 + $0x30] sm:$0xff] }
  0x62   : > { %1896 = vmatpush.bf16.msrb.mxu0 %v2417_v47 }
  0x63   : > { %v571_v50 = vcvt.s32.f32 %v443_v42 }
  0x64   : > { %1650 = vperm.xlu1 %2676, %v1484_v5  }
  0x65   : > { %v691_v53 = vpack.c.bf16 %v571_v50, %v567_v49 }
  0x69   : > { %1660 = vperm.xlu0 %2675, %v1486_v62   ;;  %1610 = vperm.xlu2 %2677, %v1476_v44   ;;  %v447_v62 = vunpack.c.0.s8 %v403_v57 }
  0x6a   : > { %1079 = vmatmul.bf16.gmra.mxu1 %v712_v63  ;;  %1099 = vmatmul.bf16.gmra.mxu2 %v728_v0  ;;  %v451_v63 = vunpack.c.1.s8 %v403_v57  ;;  %v1482_v0 = vld [vmem:[%s2876_s16 + $0xb8] sm:$0xff]  ;;  %v2416_v57 = vld [vmem:[%s3285_s4 + $0x28] sm:$0xff] }
  0x6b   : > { %v575_v5 = vcvt.s32.f32 %v447_v62  ;;  %1897 = vmatpush.bf16.msrb.mxu0 %v2416_v57 }
  0x6c   : > { %1665 = vperm.xlu1 %2676, %v1487_v27   ;;  %v405_v27 = vld [vmem:[%s2860_s11 + $0x48] sm:$0xff] }
  0x6d   : > { %1119 = vmatmul.bf16.gmra.mxu3 %v744_v1  ;;  %1059 = vmatmul.bf16.gmra.mxu0 %v696_v43  ;;  %v573_v1 = vcvt.s32.f32 %v445_v58  ;;  %v465_v31 = vunpack.c.1.s8 %v405_v27  ;;  %v469_v50 = vunpack.c.2.s8 %v405_v27 }
  0x6f   : > { %v693_v7 = vpack.c.bf16 %v577_v2, %v573_v1  ;;  %v593_v38 = vcvt.s32.f32 %v465_v31  ;;  %v597_v58 = vcvt.s32.f32 %v469_v50 }
  0x71   : > { %1675 = vperm.xlu0 %2675, %v1489_v6   ;;  %1625 = vperm.xlu2 %2677, %v1479_v56   ;;  %v579_v6 = vcvt.s32.f32 %v451_v63 }
  0x73   : > { %v695_v9 = vpack.c.bf16 %v579_v6, %v575_v5  ;;  %v2415_v6 = vld [vmem:[%s3285_s4 + $0x20] sm:$0xff] }
  0x74   : > { %1680 = vperm.xlu1 %2676, %v1490_v32   ;;  %1898 = vmatpush.bf16.msrb.mxu0 %v2415_v6 }
  0x78   : > { %1899 = vmatpush.bf16.msrb.mxu0 %v2414_v19 }
  0x79   : > { %1640 = vperm.xlu2 %2677, %v1482_v0  }
  0x7a   : > { %1133 = vmatmul.bf16.vlgmr.msrb.gmra.mxu1 %v685_v28  ;;  %1222 = vmatmul.bf16.vlgmr.msrb.gmra.mxu2 %v686_v29  ;;  %v406_v28 = vld [vmem:[%s2860_s11 + $0x50] sm:$0xff]  ;;  %v407_v29 = vld [vmem:[%s2860_s11 + $0x58] sm:$0xff] }
  0x7b   : > { %v462_v32 = vunpack.c.0.s8 %v406_v28  ;;  %v466_v33 = vunpack.c.1.s8 %v406_v28  ;;  %v463_v34 = vunpack.c.0.s8 %v407_v29  ;;  %v467_v35 = vunpack.c.1.s8 %v407_v29 }
  0x7c   : > { %v471_v55 = vunpack.c.2.s8 %v407_v29  ;;  %v475_v56 = vunpack.c.3.s8 %v407_v29 }
  0x7d   : > { %1311 = vmatmul.bf16.vlgmr.msrb.gmra.mxu3 %v687_v30  ;;  %v461_v30 = vunpack.c.0.s8 %v405_v27  ;;  %v590_v39 = vcvt.s32.f32 %v462_v32  ;;  %v594_v40 = vcvt.s32.f32 %v466_v33  ;;  %v591_v41 = vcvt.s32.f32 %v463_v34  ;;  %v2413_v32 = vld [vmem:[%s3285_s4 + $0x10] sm:$0xff] }
  0x7e   : > { %v595_v42 = vcvt.s32.f32 %v467_v35  ;;  %v599_v62 = vcvt.s32.f32 %v471_v55  ;;  %v603_v63 = vcvt.s32.f32 %v475_v56  ;;  %1900 = vmatpush.bf16.msrb.mxu0 %v2413_v32 }
  0x7f   : > { %v589_v37 = vcvt.s32.f32 %v461_v30  ;;  %v702_v44 = vpack.c.bf16 %v594_v40, %v590_v39 }
  0x80   : > { %v703_v46 = vpack.c.bf16 %v595_v42, %v591_v41  ;;  %v707_v5 = vpack.c.bf16 %v603_v63, %v599_v62  ;;  %v2411_v62 = vld [vmem:[%s3285_s4] sm:$0xff] }
  0x81   : > { %1655 = vperm.xlu2 %2677, %v1485_v14   ;;  %v701_v43 = vpack.c.bf16 %v593_v38, %v589_v37 }
  0x89   : > { %1670 = vperm.xlu2 %2677, %v1488_v25  }
  0x8a   : > { %1138 = vmatmul.bf16.gmra.mxu1 %v689_v51  ;;  %1227 = vmatmul.bf16.gmra.mxu2 %v690_v52  ;;  %v473_v51 = vunpack.c.3.s8 %v405_v27  ;;  %v470_v52 = vunpack.c.2.s8 %v406_v28 }
  0x8c   : > { %v601_v59 = vcvt.s32.f32 %v473_v51  ;;  %v598_v60 = vcvt.s32.f32 %v470_v52  ;;  %v2412_v51 = vld [vmem:[%s3285_s4 + $0x8] sm:$0xff] }
  0x8d   : > { %1316 = vmatmul.bf16.gmra.mxu3 %v691_v53  ;;  %v474_v53 = vunpack.c.3.s8 %v406_v28  ;;  %1901 = vmatpush.bf16.msrb.mxu0 %v2412_v51 }
  0x8e   : > { %v705_v2 = vpack.c.bf16 %v601_v59, %v597_v58  ;;  %v413_v59 = vld [vmem:[%s2860_s11 + $0x88] sm:$0xff] }
  0x8f   : > { %v602_v61 = vcvt.s32.f32 %v474_v53  ;;  %v497_v6 = vunpack.c.1.s8 %v413_v59 }
  0x91   : > { %v706_v3 = vpack.c.bf16 %v602_v61, %v598_v60  ;;  %v414_v60 = vld [vmem:[%s2860_s11 + $0x90] sm:$0xff]  ;;  %v415_v61 = vld [vmem:[%s2860_s11 + $0x98] sm:$0xff]  ;;  %1902 = vmatpush.bf16.msrb.mxu0 %v2411_v62 }
  0x9a   : > { %1143 = vmatmul.bf16.gmra.mxu1 %v693_v7  ;;  %1232 = vmatmul.bf16.gmra.mxu2 %v694_v8  ;;  %v409_v7 = vld [vmem:[%s2860_s11 + $0x68] sm:$0xff]  ;;  %v410_v8 = vld [vmem:[%s2860_s11 + $0x70] sm:$0xff] }
  0x9b   : > { %v477_v12 = vunpack.c.0.s8 %v409_v7  ;;  %v481_v13 = vunpack.c.1.s8 %v409_v7  ;;  %v478_v14 = vunpack.c.0.s8 %v410_v8  ;;  %v482_v15 = vunpack.c.1.s8 %v410_v8 }
  0x9c   : > { %v485_v35 = vunpack.c.2.s8 %v409_v7  ;;  %v489_v36 = vunpack.c.3.s8 %v409_v7  ;;  %v486_v37 = vunpack.c.2.s8 %v410_v8  ;;  %v490_v38 = vunpack.c.3.s8 %v410_v8 }
  0x9d   : > { %1321 = vmatmul.bf16.gmra.mxu3 %v695_v9  ;;  %v411_v9 = vld [vmem:[%s2860_s11 + $0x78] sm:$0xff]  ;;  %v605_v20 = vcvt.s32.f32 %v477_v12  ;;  %v609_v21 = vcvt.s32.f32 %v481_v13  ;;  %v606_v22 = vcvt.s32.f32 %v478_v14  ;;  %v494_v7 = vunpack.c.0.s8 %v414_v60 }
  0x9e   : > { %v479_v17 = vunpack.c.0.s8 %v411_v9  ;;  %v483_v18 = vunpack.c.1.s8 %v411_v9  ;;  %v487_v40 = vunpack.c.2.s8 %v411_v9  ;;  %v491_v41 = vunpack.c.3.s8 %v411_v9 }
  0x9f   : > { %v709_v28 = vpack.c.bf16 %v609_v21, %v605_v20  ;;  %v613_v42 = vcvt.s32.f32 %v485_v35  ;;  %v498_v8 = vunpack.c.1.s8 %v414_v60  ;;  %v495_v12 = vunpack.c.0.s8 %v415_v61 }
  0xa0   : > { %v611_v25 = vcvt.s32.f32 %v483_v18  ;;  %v615_v47 = vcvt.s32.f32 %v487_v40  ;;  %v619_v50 = vcvt.s32.f32 %v491_v41  ;;  %v499_v13 = vunpack.c.1.s8 %v415_v61  ;;  %v1526_v41 = vpop.permute.xlu0 %1525 }
  0xa1   : > { %v626_v18 = vcvt.s32.f32 %v498_v8  ;;  %v623_v19 = vcvt.s32.f32 %v495_v12  ;;  %v506_v40 = vunpack.c.3.s8 %v414_v60 }
  0xa2   : > { %v715_v58 = vpack.c.bf16 %v619_v50, %v615_v47  ;;  %v627_v20 = vcvt.s32.f32 %v499_v13 }
  0xaa   : > { %1148 = vmatmul.bf16.gmra.mxu1 %v697_v23  ;;  %1237 = vmatmul.bf16.gmra.mxu2 %v698_v24  ;;  %v610_v23 = vcvt.s32.f32 %v482_v15  ;;  %v607_v24 = vcvt.s32.f32 %v479_v17  ;;  %v625_v15 = vcvt.s32.f32 %v497_v6  ;;  %v622_v17 = vcvt.s32.f32 %v494_v7 }
  0xac   : > { %v710_v29 = vpack.c.bf16 %v610_v23, %v606_v22  ;;  %v711_v31 = vpack.c.bf16 %v611_v25, %v607_v24  ;;  %v718_v24 = vpack.c.bf16 %v626_v18, %v622_v17 }
  0xad   : > { %1326 = vmatmul.bf16.gmra.mxu3 %v699_v26 }
  0xb7   : > { %v3059_v45 = vpop.f32.mrf.mxu1 }
  0xba   : > { %1153 = vmatmul.bf16.gmra.mxu1 %v701_v43  ;;  %1242 = vmatmul.bf16.gmra.mxu2 %v702_v44  ;;  %v617_v43 = vcvt.s32.f32 %v489_v36  ;;  %v614_v44 = vcvt.s32.f32 %v486_v37  ;;  %v501_v36 = vunpack.c.2.s8 %v413_v59  ;;  %v505_v37 = vunpack.c.3.s8 %v413_v59 }
  0xbc   : > { %v713_v55 = vpack.c.bf16 %v617_v43, %v613_v42  ;;  %v503_v43 = vunpack.c.2.s8 %v415_v61  ;;  %v629_v50 = vcvt.s32.f32 %v501_v36  ;;  %v633_v51 = vcvt.s32.f32 %v505_v37 }
  0xbd   : > { %1331 = vmatmul.bf16.gmra.mxu3 %v703_v46  ;;  %v3064_v48 = vpop.f32.mrf.mxu2  ;;  %v618_v46 = vcvt.s32.f32 %v490_v38  ;;  %v502_v38 = vunpack.c.2.s8 %v414_v60 }
  0xbe   : > { %v721_v7 = vpack.c.bf16 %v633_v51, %v629_v50 }
  0xbf   : > { %v3068_v54 = vpop.f32.mrf.mxu1  ;;  %v714_v56 = vpack.c.bf16 %v618_v46, %v614_v44  ;;  %v507_v44 = vunpack.c.3.s8 %v415_v61 }
  0xc0   : > { %v3066_v49 = vpop.f32.mrf.mxu3 }
  0xc5   : > { %v3073_v0 = vpop.f32.mrf.mxu2 }
  0xc7   : > { %v3077_v4 = vpop.f32.mrf.mxu1 }
  0xc8   : > { %v3075_v1 = vpop.f32.mrf.mxu3 }
  0xca   : > { %1158 = vmatmul.bf16.gmra.mxu1 %v705_v2  ;;  %1247 = vmatmul.bf16.gmra.mxu2 %v706_v3  ;;  %v1045_v2 = vpop.f32.mrf.mxu0 }
  0xcd   : > { %1336 = vmatmul.bf16.gmra.mxu3 %v707_v5  ;;  %v3085_v10 = vpop.f32.mrf.mxu2  ;;  %v493_v5 = vunpack.c.0.s8 %v413_v59  ;;  %v635_v59 = vcvt.s32.f32 %v507_v44 }
  0xcf   : > { %v3089_v16 = vpop.f32.mrf.mxu1  ;;  %v621_v14 = vcvt.s32.f32 %v493_v5 }
  0xd0   : > { %v3087_v11 = vpop.f32.mrf.mxu3 }
  0xd1   : > { %v717_v23 = vpack.c.bf16 %v625_v15, %v621_v14 }
  0xd5   : > { %v3094_v26 = vpop.f32.mrf.mxu2 }
  0xd7   : > { %v3098_v30 = vpop.f32.mrf.mxu1 }
  0xd8   : > { %v3096_v27 = vpop.f32.mrf.mxu3 }
  0xda   : > { %1163 = vmatmul.bf16.gmra.mxu1 %v709_v28  ;;  %1252 = vmatmul.bf16.gmra.mxu2 %v710_v29  ;;  %v719_v28 = vpack.c.bf16 %v627_v20, %v623_v19  ;;  %v1047_v29 = vpop.f32.mrf.mxu0  ;;  %v1531_v19 = vpop.permute.xlu0 %1530 }
  0xdd   : > { %1341 = vmatmul.bf16.gmra.mxu3 %v711_v31  ;;  %v3103_v33 = vpop.f32.mrf.mxu2 }
  0xdf   : > { %v3107_v39 = vpop.f32.mrf.mxu1 }
  0xe0   : > { %v3105_v34 = vpop.f32.mrf.mxu3 }
  0xe2   : > { %v1050_v47 = vpop.f32.mrf.mxu0 }
  0xe5   : > { %v3112_v52 = vpop.f32.mrf.mxu2 }
  0xe7   : > { %v3116_v57 = vpop.f32.mrf.mxu1 }
  0xe8   : > { %v3114_v53 = vpop.f32.mrf.mxu3 }
  0xea   : > { %1168 = vmatmul.bf16.gmra.mxu1 %v713_v55  ;;  %1257 = vmatmul.bf16.gmra.mxu2 %v714_v56  ;;  %v630_v55 = vcvt.s32.f32 %v502_v38  ;;  %v634_v56 = vcvt.s32.f32 %v506_v40 }
  0xec   : > { %v722_v8 = vpack.c.bf16 %v634_v56, %v630_v55 }
  0xed   : > { %1346 = vmatmul.bf16.gmra.mxu3 %v715_v58  ;;  %v3124_v63 = vpop.f32.mrf.mxu2  ;;  %v631_v58 = vcvt.s32.f32 %v503_v43  ;;  %v1536_v43 = vpop.permute.xlu1 %1535 }
  0xef   : > { %v3128_v9 = vpop.f32.mrf.mxu1  ;;  %v723_v13 = vpack.c.bf16 %v635_v59, %v631_v58 }
  0xf0   : > { %v3126_v3 = vpop.f32.mrf.mxu3 }
  0xf5   : > { %v3130_v21 = vpop.f32.mrf.mxu2 }
  0xf7   : > { %v1134_v25 = vpop.f32.mrf.mxu1 }
  0xf8   : > { %v3132_v22 = vpop.f32.mrf.mxu3  ;;  %v1135_v31 = vadd.f32 %v1134_v25, %v1045_v2  ;;  %v2420_v2 = vld [vmem:[%s3140_s19] sm:$0xff]   ;;  %v3147_v25 = vld [vmem:[%s2860_s11 + $0xb0] sm:$0xff] }
  0xf9   : > { %v2421_v15 = vunpack.c.l.bf16 %v2420_v2  ;;  %v2422_v18 = vunpack.c.h.bf16 %v2420_v2 }
  0xfa   : > { %1173 = vmatmul.bf16.gmra.mxu1 %v717_v23  ;;  %1262 = vmatmul.bf16.gmra.mxu2 %v718_v24  ;;  %v3144_v23 = vld [vmem:[%s2860_s11 + $0xa8] sm:$0xff]  ;;  %v1052_v24 = vpop.f32.mrf.mxu0 }
  0xfb   : > { %v509_v36 = vunpack.c.0.s8 %v3144_v23  ;;  %v513_v40 = vunpack.c.1.s8 %v3144_v23 }
  0xfd   : > { %1351 = vmatmul.bf16.gmra.mxu3 %v719_v28  ;;  %v1223_v32 = vpop.f32.mrf.mxu2  ;;  %v641_v55 = vcvt.s32.f32 %v513_v40 }
  0xfe   : > { %v1224_v46 = vadd.f32 %v1223_v32, %v1135_v31  ;;  %v419_v32 = vld [vmem:[%s2860_s11 + $0xb8] sm:$0xff] }
  0xff   : > { %v1136_v42 = vpop.f32.mrf.mxu1  ;;  %v515_v50 = vunpack.c.1.s8 %v419_v32 }
 0x100   : > { %v1312_v35 = vpop.f32.mrf.mxu3  ;;  %v1137_v62 = vadd.f32 %v1136_v42, %v1047_v29  ;;  %v514_v42 = vunpack.c.1.s8 %v3147_v25 }
 0x101   : > { %v1313_v60 = vadd.f32 %v1312_v35, %v1224_v46  ;;  %v511_v46 = vunpack.c.0.s8 %v419_v32 }
 0x102   : > { %v642_v58 = vcvt.s32.f32 %v514_v42  ;;  %v521_v42 = vunpack.c.3.s8 %v3144_v23 }
 0x103   : > { %v1683_v14 = vmul.f32 %v1526_v41, %v1313_v60  ;;  %v510_v41 = vunpack.c.0.s8 %v3147_v25  ;;  %v639_v59 = vcvt.s32.f32 %v511_v46  ;;  %v643_v60 = vcvt.s32.f32 %v515_v50 }
 0x105   : > { %v1225_v61 = vpop.f32.mrf.mxu2  ;;  %v1779_v28 = vadd.f32 %v2421_v15, %v1683_v14  ;;  %v638_v56 = vcvt.s32.f32 %v510_v41  ;;  %v727_v15 = vpack.c.bf16 %v643_v60, %v639_v59 }
 0x106   : > { %v1226_v5 = vadd.f32 %v1225_v61, %v1137_v62  ;;  %v1055_v61 = vpop.f32.mrf.mxu0 }
 0x107   : > { %v1139_v12 = vpop.f32.mrf.mxu1 }
 0x108   : > { %v1314_v6 = vpop.f32.mrf.mxu3  ;;  %v1140_v31 = vadd.f32 %v1139_v12, %v1050_v47  ;;  %v637_v47 = vcvt.s32.f32 %v509_v36 }
 0x109   : > { %v1315_v17 = vadd.f32 %v1314_v6, %v1226_v5  ;;  %v2563_v6 = vld [vmem:[%s3140_s19 + $0x8] sm:$0xff]  }
 0x10a   : > { %1178 = vmatmul.bf16.gmra.mxu1 %v721_v7  ;;  %1267 = vmatmul.bf16.gmra.mxu2 %v722_v8  ;;  %v725_v12 = vpack.c.bf16 %v641_v55, %v637_v47  ;;  %v523_v47 = vunpack.c.3.s8 %v419_v32 }
 0x10b   : > { %v1684_v20 = vmul.f32 %v1531_v19, %v1315_v17  ;;  %v2425_v19 = vunpack.c.l.bf16 %v2563_v6 }
 0x10d   : > { %1356 = vmatmul.bf16.gmra.mxu3 %v723_v13  ;;  %v1780_v29 = vadd.f32 %v2422_v18, %v1684_v20  ;;  %v1228_v35 = vpop.f32.mrf.mxu2  ;;  %v726_v13 = vpack.c.bf16 %v642_v58, %v638_v56  ;;  %v2426_v20 = vunpack.c.h.bf16 %v2563_v6  ;;  %v649_v58 = vcvt.s32.f32 %v521_v42  ;;  %v2564_v6 = vld [vmem:[%s3140_s19 + $0x10] sm:$0xff]  }
 0x10e   : > { %v1229_v51 = vadd.f32 %v1228_v35, %v1140_v31  ;;  %v1057_v46 = vpop.f32.mrf.mxu0 }
 0x10f   : > { %v1811_v38 = vpack.c.bf16 %v1780_v29, %v1779_v28  ;;  %v1141_v44 = vpop.f32.mrf.mxu1  ;;  %v1541_v28 = vpop.permute.xlu1 %1540 }
 0x110   : > { %v1317_v37 = vpop.f32.mrf.mxu3  ;;  %v1142_v2 = vadd.f32 %v1141_v44, %v1052_v24  ;;  %v522_v44 = vunpack.c.3.s8 %v3147_v25 }
 0x111   : > { %1903 = vmatmul.bf16.vlgmr.msrb.gmra.mxu0 %v1811_v38  ;;  %v1318_v62 = vadd.f32 %v1317_v37, %v1229_v51  ;;  %v517_v37 = vunpack.c.2.s8 %v3144_v23  ;;  %v1546_v38 = vpop.permute.xlu2 %1545  ;;  %v519_v51 = vunpack.c.2.s8 %v419_v32 }
 0x112   : > { %v650_v60 = vcvt.s32.f32 %v522_v44 }
 0x113   : > { %v1685_v17 = vmul.f32 %v1536_v43, %v1318_v62  ;;  %v518_v43 = vunpack.c.2.s8 %v3147_v25  ;;  %v645_v56 = vcvt.s32.f32 %v517_v37  ;;  %v647_v62 = vcvt.s32.f32 %v519_v51  ;;  %v423_v37 = vld [vmem:[%s2860_s11 + $0xd8] sm:$0xff] }
 0x114   : > { %v527_v51 = vunpack.c.0.s8 %v423_v37 }
 0x115   : > { %v1230_v5 = vpop.f32.mrf.mxu2  ;;  %v1781_v24 = vadd.f32 %v2425_v19, %v1685_v17  ;;  %v646_v59 = vcvt.s32.f32 %v518_v43  ;;  %v2429_v17 = vunpack.c.l.bf16 %v2564_v6 }
 0x116   : > { %v1231_v7 = vadd.f32 %v1230_v5, %v1142_v2  ;;  %v651_v2 = vcvt.s32.f32 %v523_v47  ;;  %v531_v47 = vunpack.c.1.s8 %v423_v37 }
 0x117   : > { %v1144_v14 = vpop.f32.mrf.mxu1 }
 0x118   : > { %v1319_v8 = vpop.f32.mrf.mxu3  ;;  %v1145_v31 = vadd.f32 %v1144_v14, %v1055_v61  ;;  %v731_v32 = vpack.c.bf16 %v651_v2, %v647_v62  ;;  %v655_v2 = vcvt.s32.f32 %v527_v51 }
 0x119   : > { %v1320_v18 = vadd.f32 %v1319_v8, %v1231_v7  ;;  %v729_v8 = vpack.c.bf16 %v649_v58, %v645_v56  ;;  %v1551_v19 = vpop.permute.xlu2 %1550 }
 0x11a   : > { %1183 = vmatmul.bf16.gmra.mxu1 %v725_v12  ;;  %1272 = vmatmul.bf16.gmra.mxu2 %v726_v13  ;;  %v730_v12 = vpack.c.bf16 %v650_v60, %v646_v59 }
 0x11b   : > { %v1686_v29 = vmul.f32 %v1541_v28, %v1320_v18  ;;  %v2430_v18 = vunpack.c.h.bf16 %v2564_v6 }
 0x11d   : > { %1361 = vmatmul.bf16.gmra.mxu3 %v727_v15  ;;  %v1782_v35 = vadd.f32 %v2426_v20, %v1686_v29  ;;  %v1233_v36 = vpop.f32.mrf.mxu2  ;;  %v1060_v20 = vpop.f32.mrf.mxu0  ;;  %v421_v29 = vld [vmem:[%s2860_s11 + $0xc8] sm:$0xff] }
 0x11e   : > { %v1234_v55 = vadd.f32 %v1233_v36, %v1145_v31  ;;  %v422_v31 = vld [vmem:[%s2860_s11 + $0xd0] sm:$0xff] }
 0x11f   : > { %v1812_v41 = vpack.c.bf16 %v1782_v35, %v1781_v24  ;;  %v1146_v50 = vpop.f32.mrf.mxu1  ;;  %v526_v44 = vunpack.c.0.s8 %v422_v31 }
 0x120   : > { %v1322_v40 = vpop.f32.mrf.mxu3  ;;  %v1147_v5 = vadd.f32 %v1146_v50, %v1057_v46  ;;  %v530_v46 = vunpack.c.1.s8 %v422_v31 }
 0x121   : > { %1908 = vmatmul.bf16.gmra.mxu0 %v1812_v41  ;;  %v1323_v61 = vadd.f32 %v1322_v40, %v1234_v55  ;;  %v525_v41 = vunpack.c.0.s8 %v421_v29  ;;  %v654_v59 = vcvt.s32.f32 %v526_v44 }
 0x122   : > { %v658_v60 = vcvt.s32.f32 %v530_v46  ;;  %v534_v46 = vunpack.c.2.s8 %v422_v31 }
 0x123   : > { %v1687_v14 = vmul.f32 %v1546_v38, %v1323_v61  ;;  %v529_v38 = vunpack.c.1.s8 %v421_v29  ;;  %v653_v56 = vcvt.s32.f32 %v525_v41  ;;  %v659_v61 = vcvt.s32.f32 %v531_v47 }
 0x124   : > { %v533_v41 = vunpack.c.2.s8 %v421_v29  ;;  %v535_v47 = vunpack.c.2.s8 %v423_v37 }
 0x125   : > { %v1235_v23 = vpop.f32.mrf.mxu2  ;;  %v1783_v35 = vadd.f32 %v2429_v17, %v1687_v14  ;;  %v657_v58 = vcvt.s32.f32 %v529_v38  ;;  %v1062_v62 = vpop.f32.mrf.mxu0 }
 0x126   : > { %v1236_v7 = vadd.f32 %v1235_v23, %v1147_v5 }
 0x127   : > { %v1149_v13 = vpop.f32.mrf.mxu1 }
 0x128   : > { %v1324_v25 = vpop.f32.mrf.mxu3  ;;  %v1150_v24 = vadd.f32 %v1149_v13, %v1060_v20  ;;  %v734_v13 = vpack.c.bf16 %v658_v60, %v654_v59  ;;  %v662_v60 = vcvt.s32.f32 %v534_v46 }
 0x129   : > { %v1325_v15 = vadd.f32 %v1324_v25, %v1236_v7  ;;  %v2565_v7 = vld [vmem:[%s3140_s19 + $0x18] sm:$0xff]  }
 0x12a   : > { %1188 = vmatmul.bf16.gmra.mxu1 %v729_v8  ;;  %1277 = vmatmul.bf16.gmra.mxu2 %v730_v12  ;;  %v733_v12 = vpack.c.bf16 %v657_v58, %v653_v56  ;;  %v2434_v20 = vunpack.c.h.bf16 %v2565_v7  ;;  %v661_v58 = vcvt.s32.f32 %v533_v41 }
 0x12b   : > { %v1688_v28 = vmul.f32 %v1551_v19, %v1325_v15  ;;  %v735_v15 = vpack.c.bf16 %v659_v61, %v655_v2  ;;  %v2433_v19 = vunpack.c.l.bf16 %v2565_v7  ;;  %v663_v2 = vcvt.s32.f32 %v535_v47 }
 0x12d   : > { %1366 = vmatmul.bf16.gmra.mxu3 %v731_v32  ;;  %v1784_v36 = vadd.f32 %v2430_v18, %v1688_v28  ;;  %v1238_v40 = vpop.f32.mrf.mxu2  ;;  %v1556_v32 = vpop.permute.xlu0 %1555 }
 0x12e   : > { %v1239_v55 = vadd.f32 %v1238_v40, %v1150_v24  ;;  %v1561_v28 = vpop.permute.xlu1 %1560 }
 0x12f   : > { %v1813_v43 = vpack.c.bf16 %v1784_v36, %v1783_v35  ;;  %v1151_v50 = vpop.f32.mrf.mxu1 }
 0x130   : > { %v1327_v42 = vpop.f32.mrf.mxu3  ;;  %v1152_v23 = vadd.f32 %v1151_v50, %v1062_v62  ;;  %v538_v50 = vunpack.c.3.s8 %v422_v31 }
 0x131   : > { %1913 = vmatmul.bf16.gmra.mxu0 %v1813_v43  ;;  %v1328_v5 = vadd.f32 %v1327_v42, %v1239_v55  ;;  %v537_v42 = vunpack.c.3.s8 %v421_v29  ;;  %v539_v55 = vunpack.c.3.s8 %v423_v37  ;;  %v1566_v37 = vpop.permute.xlu2 %1565 }
 0x132   : > { %v666_v62 = vcvt.s32.f32 %v538_v50 }
 0x133   : > { %v1689_v17 = vmul.f32 %v1556_v32, %v1328_v5  ;;  %v665_v59 = vcvt.s32.f32 %v537_v42  ;;  %v667_v61 = vcvt.s32.f32 %v539_v55 }
 0x135   : > { %v1240_v6 = vpop.f32.mrf.mxu2  ;;  %v1785_v35 = vadd.f32 %v2433_v19, %v1689_v17  ;;  %v737_v31 = vpack.c.bf16 %v665_v59, %v661_v58  ;;  %v1571_v17 = vpop.permute.xlu0 %1570  ;;  %v426_v19 = vld [vmem:[%s2860_s11 + $0xf0] sm:$0xff] }
 0x136   : > { %v1241_v25 = vadd.f32 %v1240_v6, %v1152_v23  ;;  %v2566_v23 = vld [vmem:[%s3140_s19 + $0x20] sm:$0xff]  }
 0x137   : > { %v1154_v14 = vpop.f32.mrf.mxu1 }
 0x138   : > { %v1329_v8 = vpop.f32.mrf.mxu3  ;;  %v1155_v43 = vadd.f32 %v1154_v14, %v3059_v45  ;;  %v2437_v14 = vunpack.c.l.bf16 %v2566_v23 }
 0x139   : > { %v1330_v18 = vadd.f32 %v1329_v8, %v1241_v25  ;;  %v738_v25 = vpack.c.bf16 %v666_v62, %v662_v60 }
 0x13a   : > { %1193 = vmatmul.bf16.gmra.mxu1 %v733_v12  ;;  %1282 = vmatmul.bf16.gmra.mxu2 %v734_v13  ;;  %v739_v12 = vpack.c.bf16 %v667_v61, %v663_v2 }
 0x13b   : > { %v1690_v24 = vmul.f32 %v1561_v28, %v1330_v18 }
 0x13d   : > { %1371 = vmatmul.bf16.gmra.mxu3 %v735_v15  ;;  %v1786_v36 = vadd.f32 %v2434_v20, %v1690_v24  ;;  %v1243_v40 = vpop.f32.mrf.mxu2  ;;  %v2438_v15 = vunpack.c.h.bf16 %v2566_v23  ;;  %v427_v24 = vld [vmem:[%s2860_s11 + $0xf8] sm:$0xff] }
 0x13e   : > { %v1244_v56 = vadd.f32 %v1243_v40, %v1155_v43  ;;  %v543_v50 = vunpack.c.0.s8 %v427_v24 }
 0x13f   : > { %v1814_v44 = vpack.c.bf16 %v1786_v36, %v1785_v35  ;;  %v1156_v51 = vpop.f32.mrf.mxu1 }
 0x140   : > { %v1332_v38 = vpop.f32.mrf.mxu3  ;;  %v1157_v29 = vadd.f32 %v1156_v51, %v3068_v54  ;;  %v425_v54 = vld [vmem:[%s2860_s11 + $0xe8] sm:$0xff]  ;;  %v547_v51 = vunpack.c.1.s8 %v427_v24  ;;  %v671_v60 = vcvt.s32.f32 %v543_v50 }
 0x141   : > { %1918 = vmatmul.bf16.gmra.mxu0 %v1814_v44  ;;  %v1333_v5 = vadd.f32 %v1332_v38, %v1244_v56  ;;  %v541_v36 = vunpack.c.0.s8 %v425_v54  ;;  %v545_v40 = vunpack.c.1.s8 %v425_v54  ;;  %v542_v38 = vunpack.c.0.s8 %v426_v19 }
 0x142   : > { %v546_v44 = vunpack.c.1.s8 %v426_v19  ;;  %v675_v62 = vcvt.s32.f32 %v547_v51 }
 0x143   : > { %v1691_v13 = vmul.f32 %v1566_v37, %v1333_v5  ;;  %v669_v55 = vcvt.s32.f32 %v541_v36  ;;  %v673_v56 = vcvt.s32.f32 %v545_v40  ;;  %v670_v58 = vcvt.s32.f32 %v542_v38  ;;  %v2567_v5 = vld [vmem:[%s3140_s19 + $0x28] sm:$0xff]  }
 0x144   : > { %v674_v59 = vcvt.s32.f32 %v546_v44  ;;  %v550_v40 = vunpack.c.2.s8 %v426_v19  ;;  %v555_v38 = vunpack.c.3.s8 %v427_v24 }
 0x145   : > { %v1245_v45 = vpop.f32.mrf.mxu2  ;;  %v1787_v20 = vadd.f32 %v2437_v14, %v1691_v13  ;;  %v741_v23 = vpack.c.bf16 %v673_v56, %v669_v55  ;;  %v2442_v13 = vunpack.c.h.bf16 %v2567_v5 }
 0x146   : > { %v1246_v6 = vadd.f32 %v1245_v45, %v1157_v29  ;;  %v678_v51 = vcvt.s32.f32 %v550_v40  ;;  %v683_v56 = vcvt.s32.f32 %v555_v38 }
 0x147   : > { %v1159_v8 = vpop.f32.mrf.mxu1 }
 0x148   : > { %v1334_v7 = vpop.f32.mrf.mxu3  ;;  %v1160_v41 = vadd.f32 %v1159_v8, %v3077_v4 }
 0x149   : > { %v1335_v32 = vadd.f32 %v1334_v7, %v1246_v6  ;;  %v742_v6 = vpack.c.bf16 %v674_v59, %v670_v58  ;;  %v1576_v7 = vpop.permute.xlu1 %1575  ;;  %v2568_v59 = vld [vmem:[%s3140_s19 + $0x30] sm:$0xff]  }
 0x14a   : > { %1198 = vmatmul.bf16.gmra.mxu1 %v737_v31  ;;  %1287 = vmatmul.bf16.gmra.mxu2 %v738_v25  ;;  %v743_v25 = vpack.c.bf16 %v675_v62, %v671_v60 }
 0x14b   : > { %v1692_v18 = vmul.f32 %v1571_v17, %v1335_v32  ;;  %v1581_v32 = vpop.permute.xlu2 %1580 }
 0x14d   : > { %1376 = vmatmul.bf16.gmra.mxu3 %v739_v12  ;;  %v1788_v28 = vadd.f32 %v2438_v15, %v1692_v18  ;;  %v1248_v35 = vpop.f32.mrf.mxu2  ;;  %v2441_v12 = vunpack.c.l.bf16 %v2567_v5  ;;  %v549_v18 = vunpack.c.2.s8 %v425_v54 }
 0x14e   : > { %v1249_v47 = vadd.f32 %v1248_v35, %v1160_v41  ;;  %v554_v41 = vunpack.c.3.s8 %v426_v19 }
 0x14f   : > { %v1815_v43 = vpack.c.bf16 %v1788_v28, %v1787_v20  ;;  %v1161_v46 = vpop.f32.mrf.mxu1  ;;  %v553_v20 = vunpack.c.3.s8 %v425_v54 }
 0x150   : > { %v1337_v42 = vpop.f32.mrf.mxu3  ;;  %v1162_v61 = vadd.f32 %v1161_v46, %v3089_v16  ;;  %v677_v46 = vcvt.s32.f32 %v549_v18 }
 0x151   : > { %1923 = vmatmul.bf16.gmra.mxu0 %v1815_v43  ;;  %v1338_v2 = vadd.f32 %v1337_v42, %v1249_v47  ;;  %v551_v43 = vunpack.c.2.s8 %v427_v24  ;;  %v681_v50 = vcvt.s32.f32 %v553_v20  ;;  %v682_v47 = vcvt.s32.f32 %v554_v41 }
 0x153   : > { %v1693_v37 = vmul.f32 %v1576_v7, %v1338_v2  ;;  %v679_v55 = vcvt.s32.f32 %v551_v43  ;;  %v745_v2 = vpack.c.bf16 %v681_v50, %v677_v46  ;;  %v746_v19 = vpack.c.bf16 %v682_v47, %v678_v51 }
 0x155   : > { %v1250_v4 = vpop.f32.mrf.mxu2  ;;  %v1789_v15 = vadd.f32 %v2441_v12, %v1693_v37  ;;  %v747_v24 = vpack.c.bf16 %v683_v56, %v679_v55 }
 0x156   : > { %v1251_v29 = vadd.f32 %v1250_v4, %v1162_v61  ;;  %v1586_v61 = vpop.permute.xlu0 %1585 }
 0x157   : > { %v1164_v31 = vpop.f32.mrf.mxu1 }
 0x158   : > { %v1339_v45 = vpop.f32.mrf.mxu3  ;;  %v1165_v28 = vadd.f32 %v1164_v31, %v3098_v30 }
 0x159   : > { %v1340_v8 = vadd.f32 %v1339_v45, %v1251_v29  ;;  %v2445_v45 = vunpack.c.l.bf16 %v2568_v59 }
 0x15a   : > { %1203 = vmatmul.bf16.gmra.mxu1 %v741_v23  ;;  %1292 = vmatmul.bf16.gmra.mxu2 %v742_v6  ;;  %v2446_v23 = vunpack.c.h.bf16 %v2568_v59  ;;  %v1591_v6 = vpop.permute.xlu1 %1590 }
 0x15b   : > { %v1694_v14 = vmul.f32 %v1581_v32, %v1340_v8 }
 0x15d   : > { %1381 = vmatmul.bf16.gmra.mxu3 %v743_v25  ;;  %v1790_v16 = vadd.f32 %v2442_v13, %v1694_v14  ;;  %v1253_v17 = vpop.f32.mrf.mxu2 }
 0x15e   : > { %v1254_v44 = vadd.f32 %v1253_v17, %v1165_v28  ;;  %v2569_v17 = vld [vmem:[%s3140_s19 + $0x38] sm:$0xff]   ;;  %v1596_v28 = vpop.permute.xlu2 %1595 }
 0x15f   : > { %v1816_v36 = vpack.c.bf16 %v1790_v16, %v1789_v15  ;;  %v1166_v42 = vpop.f32.mrf.mxu1  ;;  %v2449_v41 = vunpack.c.l.bf16 %v2569_v17 }
 0x160   : > { %v1342_v35 = vpop.f32.mrf.mxu3  ;;  %v1167_v54 = vadd.f32 %v1166_v42, %v3107_v39  ;;  %v2450_v42 = vunpack.c.h.bf16 %v2569_v17 }
 0x161   : > { %1928 = vmatmul.bf16.gmra.mxu0 %v1816_v36  ;;  %v1343_v58 = vadd.f32 %v1342_v35, %v1254_v44 }
 0x163   : > { %v1695_v5 = vmul.f32 %v1586_v61, %v1343_v58 }
 0x165   : > { %v1255_v30 = vpop.f32.mrf.mxu2  ;;  %v1791_v39 = vadd.f32 %v2445_v45, %v1695_v5 }
 0x166   : > { %v1256_v60 = vadd.f32 %v1255_v30, %v1167_v54  ;;  %v2570_v54 = vld [vmem:[%s3140_s19 + $0x40] sm:$0xff]  }
 0x167   : > { %v1169_v4 = vpop.f32.mrf.mxu1  ;;  %v2453_v61 = vunpack.c.l.bf16 %v2570_v54 }
 0x168   : > { %v1344_v62 = vpop.f32.mrf.mxu3  ;;  %v1170_v37 = vadd.f32 %v1169_v4, %v3116_v57  ;;  %v1601_v57 = vpop.permute.xlu0 %1600 }
 0x169   : > { %v1345_v29 = vadd.f32 %v1344_v62, %v1256_v60  ;;  %v1606_v62 = vpop.permute.xlu1 %1605 }
 0x16a   : > { %1208 = vmatmul.bf16.gmra.mxu1 %v745_v2  ;;  %1297 = vmatmul.bf16.gmra.mxu2 %v746_v19 }
 0x16b   : > { %v1696_v7 = vmul.f32 %v1591_v6, %v1345_v29 }
 0x16d   : > { %1386 = vmatmul.bf16.gmra.mxu3 %v747_v24  ;;  %v1792_v31 = vadd.f32 %v2446_v23, %v1696_v7  ;;  %v1258_v25 = vpop.f32.mrf.mxu2  ;;  %v2454_v24 = vunpack.c.h.bf16 %v2570_v54  ;;  %v2572_v54 = vld [vmem:[%s3140_s19 + $0x50] sm:$0xff]  }
 0x16e   : > { %v1259_v32 = vadd.f32 %v1258_v25, %v1170_v37  ;;  %v3186_v37 = vld [vmem:[%s3286_s5] ss:$0 sm:$0xff] }
 0x16f   : > { %v1817_v12 = vpack.c.bf16 %v1792_v31, %v1791_v39  ;;  %v1171_v13 = vpop.f32.mrf.mxu1 }
 0x170   : > { %v1347_v8 = vpop.f32.mrf.mxu3  ;;  %v1172_v15 = vadd.f32 %v1171_v13, %v3128_v9 }
 0x171   : > { %1933 = vmatmul.bf16.gmra.mxu0 %v1817_v12  ;;  %v1348_v14 = vadd.f32 %v1347_v8, %v1259_v32  ;;  %v2571_v12 = vld [vmem:[%s3140_s19 + $0x48] sm:$0xff]  }
 0x173   : > { %v1697_v36 = vmul.f32 %v1596_v28, %v1348_v14  ;;  %v2458_v28 = vunpack.c.h.bf16 %v2571_v12 }
 0x175   : > { %v1260_v16 = vpop.f32.mrf.mxu2  ;;  %v1793_v38 = vadd.f32 %v2449_v41, %v1697_v36 }
 0x176   : > { %v1261_v18 = vadd.f32 %v1260_v16, %v1172_v15 }
 0x177   : > { %v1174_v35 = vpop.f32.mrf.mxu1 }
 0x178   : > { %v1349_v20 = vpop.f32.mrf.mxu3  ;;  %v1175_v50 = vadd.f32 %v1174_v35, %v3064_v48  ;;  %v1611_v48 = vpop.permute.xlu2 %1610 }
 0x179   : > { %v1350_v40 = vadd.f32 %v1349_v20, %v1261_v18  ;;  %v1616_v18 = vpop.permute.xlu0 %1615  ;;  %v2457_v20 = vunpack.c.l.bf16 %v2571_v12 }
 0x17b   : > { %v1698_v43 = vmul.f32 %v1601_v57, %v1350_v40  ;;  %v1621_v57 = vpop.permute.xlu1 %1620 }
 0x17d   : > { %v1794_v44 = vadd.f32 %v2450_v42, %v1698_v43  ;;  %v1263_v46 = vpop.f32.mrf.mxu2 }
 0x17e   : > { %v1264_v55 = vadd.f32 %v1263_v46, %v1175_v50 }
 0x17f   : > { %v1818_v9 = vpack.c.bf16 %v1794_v44, %v1793_v38  ;;  %v1176_v47 = vpop.f32.mrf.mxu1 }
 0x180   : > { %v1352_v51 = vpop.f32.mrf.mxu3  ;;  %v1177_v58 = vadd.f32 %v1176_v47, %v3073_v0 }
 0x181   : > { %1938 = vmatmul.bf16.gmra.mxu0 %v1818_v9  ;;  %v1353_v56 = vadd.f32 %v1352_v51, %v1264_v55 }
 0x183   : > { %v1699_v19 = vmul.f32 %v1606_v62, %v1353_v56 }
 0x185   : > { %v1265_v30 = vpop.f32.mrf.mxu2  ;;  %v1795_v29 = vadd.f32 %v2453_v61, %v1699_v19 }
 0x186   : > { %v1266_v59 = vadd.f32 %v1265_v30, %v1177_v58 }
 0x187   : > { %v1179_v2 = vpop.f32.mrf.mxu1 }
 0x188   : > { %v1354_v60 = vpop.f32.mrf.mxu3  ;;  %v1180_v7 = vadd.f32 %v1179_v2, %v3085_v10 }
 0x189   : > { %v1355_v4 = vadd.f32 %v1354_v60, %v1266_v59 }
 0x18b   : > { %v1700_v5 = vmul.f32 %v1611_v48, %v1355_v4  ;;  %v1626_v4 = vpop.permute.xlu2 %1625 }
 0x18d   : > { %v1796_v45 = vadd.f32 %v2454_v24, %v1700_v5  ;;  %v1268_v23 = vpop.f32.mrf.mxu2  ;;  %v2462_v24 = vunpack.c.h.bf16 %v2572_v54 }
 0x18e   : > { %v1904_v6 = vpop.f32.mrf.mxu0  ;;  %v1269_v25 = vadd.f32 %v1268_v23, %v1180_v7 }
 0x18f   : > { %v1819_v39 = vpack.c.bf16 %v1796_v45, %v1795_v29  ;;  %v1181_v31 = vpop.f32.mrf.mxu1  ;;  %v1905_v13 = vadd.f32 %v3186_v37, %v1904_v6  ;;  %v1631_v6 = vpop.permute.xlu0 %1630 }
 0x190   : > { %v1357_v0 = vpop.f32.mrf.mxu3  ;;  %v1182_v32 = vadd.f32 %v1181_v31, %v3094_v26 }
 0x191   : > { %1943 = vmatmul.bf16.gmra.mxu0 %v1819_v39  ;;  %v1358_v8 = vadd.f32 %v1357_v0, %v1269_v25  ;;  %v1984_v40 = vmax.f32 %v1905_v13, 0.0 }
 0x193   : > { %v1701_v36 = vmul.f32 %v1616_v18, %v1358_v8 }
 0x195   : > { %v1270_v14 = vpop.f32.mrf.mxu2  ;;  %v1797_v38 = vadd.f32 %v2457_v20, %v1701_v36 }
 0x196   : > { %v1906_v15 = vpop.f32.mrf.mxu0  ;;  %v1271_v10 = vadd.f32 %v1270_v14, %v1182_v32 }
 0x197   : > { %v1907_v17 = vadd.f32 %v3186_v37, %v1906_v15  ;;  %v1184_v35 = vpop.f32.mrf.mxu1 }
 0x198   : > { %v1359_v16 = vpop.f32.mrf.mxu3  ;;  %v1185_v51 = vadd.f32 %v1184_v35, %v3103_v33  ;;  %v2461_v33 = vunpack.c.l.bf16 %v2572_v54 }
 0x199   : > { %v1360_v41 = vadd.f32 %v1359_v16, %v1271_v10  ;;  %v1985_v42 = vmax.f32 %v1907_v17, 0.0  ;;  %v2573_v10 = vld [vmem:[%s3140_s19 + $0x58] sm:$0xff]  }
 0x19b   : > { %v1702_v26 = vmul.f32 %v1621_v57, %v1360_v41  ;;  %v2486_v43 = vpack.c.bf16 %v1985_v42, %v1984_v40  ;;  %v1636_v40 = vpop.permute.xlu1 %1635  ;;  %v2466_v41 = vunpack.c.h.bf16 %v2573_v10 }
 0x19d   : > { %v1798_v44 = vadd.f32 %v2458_v28, %v1702_v26  ;;  %2487 = vst [vmem:[%s3197_s29] sm:$0xff] %v2486_v43   ;;  %v1273_v46 = vpop.f32.mrf.mxu2 }
 0x19e   : > { %v1909_v50 = vpop.f32.mrf.mxu0  ;;  %v1274_v56 = vadd.f32 %v1273_v46, %v1185_v51 }
 0x19f   : > { %v1820_v47 = vpack.c.bf16 %v1798_v44, %v1797_v38  ;;  %v1186_v55 = vpop.f32.mrf.mxu1  ;;  %v1910_v30 = vadd.f32 %v3186_v37, %v1909_v50  ;;  %v1641_v44 = vpop.permute.xlu2 %1640 }
 0x1a0   : > { %v1362_v9 = vpop.f32.mrf.mxu3  ;;  %v1187_v59 = vadd.f32 %v1186_v55, %v3112_v52 }
 0x1a1   : > { %1948 = vmatmul.bf16.gmra.mxu0 %v1820_v47  ;;  %v1363_v58 = vadd.f32 %v1362_v9, %v1274_v56  ;;  %v1986_v29 = vmax.f32 %v1910_v30, 0.0 }
 0x1a3   : > { %v1703_v5 = vmul.f32 %v1626_v4, %v1363_v58 }
 0x1a5   : > { %v1275_v60 = vpop.f32.mrf.mxu2  ;;  %v1799_v52 = vadd.f32 %v2461_v33, %v1703_v5 }
 0x1a6   : > { %v1911_v62 = vpop.f32.mrf.mxu0  ;;  %v1276_v2 = vadd.f32 %v1275_v60, %v1187_v59  ;;  %v2574_v60 = vld [vmem:[%s3140_s19 + $0x60] sm:$0xff]  }
 0x1a7   : > { %v1912_v61 = vadd.f32 %v3186_v37, %v1911_v62  ;;  %v1189_v48 = vpop.f32.mrf.mxu1  ;;  %v2470_v5 = vunpack.c.h.bf16 %v2574_v60 }
 0x1a8   : > { %v1364_v19 = vpop.f32.mrf.mxu3  ;;  %v1190_v8 = vadd.f32 %v1189_v48, %v3124_v63  ;;  %v2465_v63 = vunpack.c.l.bf16 %v2573_v10  ;;  %v1646_v48 = vpop.permute.xlu0 %1645 }
 0x1a9   : > { %v1365_v45 = vadd.f32 %v1364_v19, %v1276_v2  ;;  %v1987_v23 = vmax.f32 %v1912_v61, 0.0 }
 0x1ab   : > { %v1704_v7 = vmul.f32 %v1631_v6, %v1365_v45  ;;  %v2491_v0 = vpack.c.bf16 %v1987_v23, %v1986_v29 }
 0x1ad   : > { %v1800_v39 = vadd.f32 %v2462_v24, %v1704_v7  ;;  %2578 = vst [vmem:[%s3197_s29 + $0x8] sm:$0xff] %v2491_v0   ;;  %v1278_v31 = vpop.f32.mrf.mxu2  ;;  %v1651_v0 = vpop.permute.xlu1 %1650 }
 0x1ae   : > { %v1914_v25 = vpop.f32.mrf.mxu0  ;;  %v1279_v14 = vadd.f32 %v1278_v31, %v1190_v8 }
 0x1af   : > { %v1821_v13 = vpack.c.bf16 %v1800_v39, %v1799_v52  ;;  %v1191_v32 = vpop.f32.mrf.mxu1  ;;  %v1915_v16 = vadd.f32 %v3186_v37, %v1914_v25 }
 0x1b0   : > { %v1367_v12 = vpop.f32.mrf.mxu3  ;;  %v1192_v17 = vadd.f32 %v1191_v32, %v3130_v21 }
 0x1b1   : > { %1953 = vmatmul.bf16.gmra.mxu0 %v1821_v13  ;;  %v1368_v15 = vadd.f32 %v1367_v12, %v1279_v14  ;;  %v1988_v26 = vmax.f32 %v1915_v16, 0.0  ;;  %v2575_v16 = vld [vmem:[%s3140_s19 + $0x68] sm:$0xff]  }
 0x1b3   : > { %v1705_v57 = vmul.f32 %v1636_v40, %v1368_v15 }
 0x1b5   : > { %v1280_v18 = vpop.f32.mrf.mxu2  ;;  %v1801_v21 = vadd.f32 %v2465_v63, %v1705_v57  ;;  %v1656_v63 = vpop.permute.xlu2 %1655 }
 0x1b6   : > { %v1916_v20 = vpop.f32.mrf.mxu0  ;;  %v1281_v28 = vadd.f32 %v1280_v18, %v1192_v17 }
 0x1b7   : > { %v1917_v36 = vadd.f32 %v3186_v37, %v1916_v20  ;;  %v1194_v42 = vpop.f32.mrf.mxu1 }
 0x1b8   : > { %v1369_v35 = vpop.f32.mrf.mxu3  ;;  %v1195_v55 = vadd.f32 %v1194_v42, %v3066_v49  ;;  %v2469_v49 = vunpack.c.l.bf16 %v2574_v60 }
 0x1b9   : > { %v1370_v43 = vadd.f32 %v1369_v35, %v1281_v28  ;;  %v1989_v38 = vmax.f32 %v1917_v36, 0.0 }
 0x1bb   : > { %v1706_v46 = vmul.f32 %v1641_v44, %v1370_v43  ;;  %v2496_v50 = vpack.c.bf16 %v1989_v38, %v1988_v26  ;;  %v1661_v44 = vpop.permute.xlu0 %1660 }
 0x1bd   : > { %v1802_v51 = vadd.f32 %v2466_v41, %v1706_v46  ;;  %2579 = vst [vmem:[%s3197_s29 + $0x10] sm:$0xff] %v2496_v50   ;;  %v1283_v9 = vpop.f32.mrf.mxu2  ;;  %v2474_v41 = vunpack.c.h.bf16 %v2575_v16 }
 0x1be   : > { %v1919_v47 = vpop.f32.mrf.mxu0  ;;  %v1284_v30 = vadd.f32 %v1283_v9, %v1195_v55 }
 0x1bf   : > { %v1822_v58 = vpack.c.bf16 %v1802_v51, %v1801_v21  ;;  %v1196_v54 = vpop.f32.mrf.mxu1  ;;  %v1920_v62 = vadd.f32 %v3186_v37, %v1919_v47 }
 0x1c0   : > { %v1372_v56 = vpop.f32.mrf.mxu3  ;;  %v1197_v2 = vadd.f32 %v1196_v54, %v3075_v1 }
 0x1c1   : > { %1958 = vmatmul.bf16.gmra.mxu0 %v1822_v58  ;;  %v1373_v59 = vadd.f32 %v1372_v56, %v1284_v30  ;;  %v1990_v23 = vmax.f32 %v1920_v62, 0.0 }
 0x1c3   : > { %v1707_v45 = vmul.f32 %v1646_v48, %v1373_v59  ;;  %v2576_v59 = vld [vmem:[%s3140_s19 + $0x70] sm:$0xff]  }
 0x1c4   : > { %v2478_v48 = vunpack.c.h.bf16 %v2576_v59 }
 0x1c5   : > { %v1285_v19 = vpop.f32.mrf.mxu2  ;;  %v1803_v1 = vadd.f32 %v2469_v49, %v1707_v45 }
 0x1c6   : > { %v1921_v61 = vpop.f32.mrf.mxu0  ;;  %v1286_v4 = vadd.f32 %v1285_v19, %v1197_v2 }
 0x1c7   : > { %v1922_v24 = vadd.f32 %v3186_v37, %v1921_v61  ;;  %v1199_v29 = vpop.f32.mrf.mxu1 }
 0x1c8   : > { %v1374_v33 = vpop.f32.mrf.mxu3  ;;  %v1200_v12 = vadd.f32 %v1199_v29, %v3087_v11  ;;  %v2473_v11 = vunpack.c.l.bf16 %v2575_v16 }
 0x1c9   : > { %v1375_v6 = vadd.f32 %v1374_v33, %v1286_v4  ;;  %v1991_v7 = vmax.f32 %v1922_v24, 0.0  ;;  %v1666_v24 = vpop.permute.xlu1 %1665 }
 0x1cb   : > { %v1708_v52 = vmul.f32 %v1651_v0, %v1375_v6  ;;  %v2501_v39 = vpack.c.bf16 %v1991_v7, %v1990_v23  ;;  %v1671_v6 = vpop.permute.xlu2 %1670 }
 0x1cd   : > { %v1804_v31 = vadd.f32 %v2470_v5, %v1708_v52  ;;  %2580 = vst [vmem:[%s3197_s29 + $0x18] sm:$0xff] %v2501_v39   ;;  %v1288_v25 = vpop.f32.mrf.mxu2 }
 0x1ce   : > { %v1924_v8 = vpop.f32.mrf.mxu0  ;;  %v1289_v15 = vadd.f32 %v1288_v25, %v1200_v12 }
 0x1cf   : > { %v1823_v32 = vpack.c.bf16 %v1804_v31, %v1803_v1  ;;  %v1201_v14 = vpop.f32.mrf.mxu1  ;;  %v1925_v17 = vadd.f32 %v3186_v37, %v1924_v8 }
 0x1d0   : > { %v1377_v13 = vpop.f32.mrf.mxu3  ;;  %v1202_v18 = vadd.f32 %v1201_v14, %v3096_v27  ;;  %v2577_v14 = vld [vmem:[%s3140_s19 + $0x78] sm:$0xff]  }
 0x1d1   : > { %1963 = vmatmul.bf16.gmra.mxu0 %v1823_v32  ;;  %v1378_v10 = vadd.f32 %v1377_v13, %v1289_v15  ;;  %v1992_v26 = vmax.f32 %v1925_v17, 0.0 }
 0x1d3   : > { %v1709_v57 = vmul.f32 %v1656_v63, %v1378_v10 }
 0x1d5   : > { %v1290_v20 = vpop.f32.mrf.mxu2  ;;  %v1805_v27 = vadd.f32 %v2473_v11, %v1709_v57 }
 0x1d6   : > { %v1926_v28 = vpop.f32.mrf.mxu0  ;;  %v1291_v35 = vadd.f32 %v1290_v20, %v1202_v18 }
 0x1d7   : > { %v1927_v40 = vadd.f32 %v3186_v37, %v1926_v28  ;;  %v1204_v42 = vpop.f32.mrf.mxu1  ;;  %v1676_v28 = vpop.permute.xlu0 %1675 }
 0x1d8   : > { %v1379_v36 = vpop.f32.mrf.mxu3  ;;  %v1205_v47 = vadd.f32 %v1204_v42, %v3105_v34  ;;  %v2477_v34 = vunpack.c.l.bf16 %v2576_v59  ;;  %v1681_v42 = vpop.permute.xlu1 %1680 }
 0x1d9   : > { %v1380_v43 = vadd.f32 %v1379_v36, %v1291_v35  ;;  %v1993_v38 = vmax.f32 %v1927_v40, 0.0  ;;  %v2481_v35 = vunpack.c.l.bf16 %v2577_v14  ;;  %v2482_v36 = vunpack.c.h.bf16 %v2577_v14 }
 0x1db   : > { %v1710_v46 = vmul.f32 %v1661_v44, %v1380_v43  ;;  %v2506_v50 = vpack.c.bf16 %v1993_v38, %v1992_v26 }
 0x1dd   : > { %v1806_v21 = vadd.f32 %v2474_v41, %v1710_v46  ;;  %2581 = vst [vmem:[%s3197_s29 + $0x20] sm:$0xff] %v2506_v50   ;;  %v1293_v51 = vpop.f32.mrf.mxu2 }
 0x1de   : > { %v1929_v9 = vpop.f32.mrf.mxu0  ;;  %v1294_v54 = vadd.f32 %v1293_v51, %v1205_v47 }
 0x1df   : > { %v1824_v56 = vpack.c.bf16 %v1806_v21, %v1805_v27  ;;  %v1206_v58 = vpop.f32.mrf.mxu1  ;;  %v1930_v60 = vadd.f32 %v3186_v37, %v1929_v9 }
 0x1e0   : > { %v1382_v55 = vpop.f32.mrf.mxu3  ;;  %v1207_v62 = vadd.f32 %v1206_v58, %v3114_v53 }
 0x1e1   : > { %1968 = vmatmul.bf16.gmra.mxu0 %v1824_v56  ;;  %v1383_v30 = vadd.f32 %v1382_v55, %v1294_v54  ;;  %v1994_v29 = vmax.f32 %v1930_v60, 0.0 }
 0x1e3   : > { %v1711_v5 = vmul.f32 %v1666_v24, %v1383_v30 }
 0x1e5   : > { %v1295_v2 = vpop.f32.mrf.mxu2  ;;  %v1807_v53 = vadd.f32 %v2477_v34, %v1711_v5 }
 0x1e6   : > { %v1931_v19 = vpop.f32.mrf.mxu0  ;;  %v1296_v61 = vadd.f32 %v1295_v2, %v1207_v62 }
 0x1e7   : > { %v1932_v33 = vadd.f32 %v3186_v37, %v1931_v19  ;;  %v1209_v49 = vpop.f32.mrf.mxu1 }
 0x1e8   : > { %v1384_v4 = vpop.f32.mrf.mxu3  ;;  %v1210_v31 = vadd.f32 %v1209_v49, %v3126_v3 }
 0x1e9   : > { %v1385_v45 = vadd.f32 %v1384_v4, %v1296_v61  ;;  %v1995_v23 = vmax.f32 %v1932_v33, 0.0 }
 0x1eb   : > { %v1712_v7 = vmul.f32 %v1671_v6, %v1385_v45  ;;  %v2511_v0 = vpack.c.bf16 %v1995_v23, %v1994_v29 }
 0x1ed   : > { %v1808_v52 = vadd.f32 %v2478_v48, %v1712_v7  ;;  %2582 = vst [vmem:[%s3197_s29 + $0x28] sm:$0xff] %v2511_v0   ;;  %v1298_v39 = vpop.f32.mrf.mxu2 }
 0x1ee   : > { %v1934_v1 = vpop.f32.mrf.mxu0  ;;  %v1299_v12 = vadd.f32 %v1298_v39, %v1210_v31 }
 0x1ef   : > { %v1825_v8 = vpack.c.bf16 %v1808_v52, %v1807_v53  ;;  %v1211_v13 = vpop.f32.mrf.mxu1  ;;  %v1935_v15 = vadd.f32 %v3186_v37, %v1934_v1 }
 0x1f0   : > { %v1387_v25 = vpop.f32.mrf.mxu3  ;;  %v1212_v10 = vadd.f32 %v1211_v13, %v3132_v22 }
 0x1f1   : > { %1973 = vmatmul.bf16.gmra.mxu0 %v1825_v8  ;;  %v1388_v32 = vadd.f32 %v1387_v25, %v1299_v12  ;;  %v1996_v63 = vmax.f32 %v1935_v15, 0.0 }
 0x1f3   : > { %v1713_v40 = vmul.f32 %v1676_v28, %v1388_v32 }
 0x1f5   : > { %v1300_v16 = vpop.f32.mrf.mxu2  ;;  %v1809_v43 = vadd.f32 %v2481_v35, %v1713_v40 }
 0x1f6   : > { %v1936_v17 = vpop.f32.mrf.mxu0  ;;  %v1301_v18 = vadd.f32 %v1300_v16, %v1212_v10 }
 0x1f7   : > { %v1937_v20 = vadd.f32 %v3186_v37, %v1936_v17 }
 0x1f8   : > { %v1389_v3 = vpop.f32.mrf.mxu3 }
 0x1f9   : > { %v1390_v11 = vadd.f32 %v1389_v3, %v1301_v18  ;;  %v1997_v41 = vmax.f32 %v1937_v20, 0.0 }
 0x1fb   : > { %v1714_v57 = vmul.f32 %v1681_v42, %v1390_v11  ;;  %v2516_v26 = vpack.c.bf16 %v1997_v41, %v1996_v63 }
 0x1fd   : > { %v1810_v22 = vadd.f32 %v2482_v36, %v1714_v57  ;;  %2583 = vst [vmem:[%s3197_s29 + $0x30] sm:$0xff] %v2516_v26  }
 0x1fe   : > { %v1939_v38 = vpop.f32.mrf.mxu0 }
 0x1ff   : > { %v1826_v44 = vpack.c.bf16 %v1810_v22, %v1809_v43  ;;  %v1940_v46 = vadd.f32 %v3186_v37, %v1939_v38 }
 0x201   : > { %1978 = vmatmul.bf16.gmra.mxu0 %v1826_v44  ;;  %v1998_v21 = vmax.f32 %v1940_v46, 0.0 }
 0x206   : > { %v1941_v50 = vpop.f32.mrf.mxu0 }
 0x207   : > { %v1942_v27 = vadd.f32 %v3186_v37, %v1941_v50 }
 0x209   : > { %v1999_v51 = vmax.f32 %v1942_v27, 0.0 }
 0x20b   : > { %v2521_v9 = vpack.c.bf16 %v1999_v51, %v1998_v21 }
 0x20d   : > { %2584 = vst [vmem:[%s3197_s29 + $0x38] sm:$0xff] %v2521_v9  }
 0x20e   : > { %v1944_v47 = vpop.f32.mrf.mxu0 }
 0x20f   : > { %v1945_v55 = vadd.f32 %v3186_v37, %v1944_v47 }
 0x211   : > { %v2000_v54 = vmax.f32 %v1945_v55, 0.0 }
 0x216   : > { %v1946_v56 = vpop.f32.mrf.mxu0 }
 0x217   : > { %v1947_v58 = vadd.f32 %v3186_v37, %v1946_v56 }
 0x219   : > { %v2001_v30 = vmax.f32 %v1947_v58, 0.0 }
 0x21b   : > { %v2526_v59 = vpack.c.bf16 %v2001_v30, %v2000_v54 }
 0x21d   : > { %2585 = vst [vmem:[%s3197_s29 + $0x40] sm:$0xff] %v2526_v59  }
 0x21e   : > { %v1949_v60 = vpop.f32.mrf.mxu0 }
 0x21f   : > { %v1950_v62 = vadd.f32 %v3186_v37, %v1949_v60 }
 0x221   : > { %v2002_v61 = vmax.f32 %v1950_v62, 0.0 }
 0x226   : > { %v1951_v2 = vpop.f32.mrf.mxu0 }
 0x227   : > { %v1952_v19 = vadd.f32 %v3186_v37, %v1951_v2 }
 0x229   : > { %v2003_v4 = vmax.f32 %v1952_v19, 0.0 }
 0x22b   : > { %v2531_v33 = vpack.c.bf16 %v2003_v4, %v2002_v61 }
 0x22d   : > { %2586 = vst [vmem:[%s3197_s29 + $0x48] sm:$0xff] %v2531_v33  }
 0x22e   : > { %v1954_v24 = vpop.f32.mrf.mxu0 }
 0x22f   : > { %v1955_v34 = vadd.f32 %v3186_v37, %v1954_v24 }
 0x231   : > { %v2004_v5 = vmax.f32 %v1955_v34, 0.0 }
 0x236   : > { %v1956_v48 = vpop.f32.mrf.mxu0 }
 0x237   : > { %v1957_v49 = vadd.f32 %v3186_v37, %v1956_v48 }
 0x239   : > { %v2005_v29 = vmax.f32 %v1957_v49, 0.0 }
 0x23b   : > { %v2536_v45 = vpack.c.bf16 %v2005_v29, %v2004_v5 }
 0x23d   : > { %2587 = vst [vmem:[%s3197_s29 + $0x50] sm:$0xff] %v2536_v45  }
 0x23e   : > { %v1959_v23 = vpop.f32.mrf.mxu0 }
 0x23f   : > { %v1960_v6 = vadd.f32 %v3186_v37, %v1959_v23 }
 0x241   : > { %v2006_v53 = vmax.f32 %v1960_v6, 0.0 }
 0x246   : > { %v1961_v7 = vpop.f32.mrf.mxu0 }
 0x247   : > { %v1962_v0 = vadd.f32 %v3186_v37, %v1961_v7 }
 0x249   : > { %v2007_v52 = vmax.f32 %v1962_v0, 0.0 }
 0x24b   : > { %v2541_v39 = vpack.c.bf16 %v2007_v52, %v2006_v53 }
 0x24d   : > { %2588 = vst [vmem:[%s3197_s29 + $0x58] sm:$0xff] %v2541_v39  }
 0x24e   : > { %v1964_v1 = vpop.f32.mrf.mxu0 }
 0x24f   : > { %v1965_v31 = vadd.f32 %v3186_v37, %v1964_v1 }
 0x251   : > { %v2008_v12 = vmax.f32 %v1965_v31, 0.0 }
 0x256   : > { %v1966_v25 = vpop.f32.mrf.mxu0 }
 0x257   : > { %v1967_v8 = vadd.f32 %v3186_v37, %v1966_v25 }
 0x259   : > { %v2009_v13 = vmax.f32 %v1967_v8, 0.0 }
 0x25b   : > { %v2546_v32 = vpack.c.bf16 %v2009_v13, %v2008_v12 }
 0x25d   : > { %2589 = vst [vmem:[%s3197_s29 + $0x60] sm:$0xff] %v2546_v32  }
 0x25e   : > { %v1969_v14 = vpop.f32.mrf.mxu0 }
 0x25f   : > { %v1970_v15 = vadd.f32 %v3186_v37, %v1969_v14 }
 0x261   : > { %v2010_v17 = vmax.f32 %v1970_v15, 0.0 }
 0x266   : > { %v1971_v10 = vpop.f32.mrf.mxu0 }
 0x267   : > { %v1972_v16 = vadd.f32 %v3186_v37, %v1971_v10 }
 0x269   : > { %v2011_v18 = vmax.f32 %v1972_v16, 0.0 }
 0x26b   : > { %v2551_v20 = vpack.c.bf16 %v2011_v18, %v2010_v17 }
 0x26d   : > { %2590 = vst [vmem:[%s3197_s29 + $0x68] sm:$0xff] %v2551_v20  }
 0x26e   : > { %v1974_v28 = vpop.f32.mrf.mxu0 }
 0x26f   : > { %v1975_v35 = vadd.f32 %v3186_v37, %v1974_v28 }
 0x271   : > { %v2012_v40 = vmax.f32 %v1975_v35, 0.0 }
 0x276   : > { %v1976_v3 = vpop.f32.mrf.mxu0 }
 0x277   : > { %v1977_v36 = vadd.f32 %v3186_v37, %v1976_v3 }
 0x279   : > { %v2013_v63 = vmax.f32 %v1977_v36, 0.0 }
 0x27b   : > { %v2556_v11 = vpack.c.bf16 %v2013_v63, %v2012_v40 }
 0x27d   : > { %2591 = vst [vmem:[%s3197_s29 + $0x70] sm:$0xff] %v2556_v11  }
 0x27e   : > { %v1979_v41 = vpop.f32.mrf.mxu0 }
 0x27f   : > { %v1980_v42 = vadd.f32 %v3186_v37, %v1979_v41 }
 0x281   : > { %v2014_v43 = vmax.f32 %v1980_v42, 0.0 }
 0x286   : > { %v1981_v57 = vpop.f32.mrf.mxu0 }
 0x287   : > { %v1982_v26 = vadd.f32 %v3186_v37, %v1981_v57 }
 0x289   : > { %v2015_v22 = vmax.f32 %v1982_v26, 0.0 }
 0x28b   : > { %v2561_v38 = vpack.c.bf16 %v2015_v22, %v2014_v43 }
 0x28d   : > { %2592 = vst [vmem:[%s3197_s29 + $0x78] sm:$0xff] %v2561_v38  }
 0x28e PF: > { %s19_s26 = sadd.s32 1, %s2759_s26   ;;  %s3290_s21 = smov %s2743_s22 }
 0x28f   : > { %p16_p0 = scmp.ge.s32.totalorder %s19_s26, 4   ;;  %s3291_s22 = smov %s2747_s23 }
 0x290   : > { %s3292_s23 = smov %s2848_s9  ;;  %s3293_s24 = smov %s2755_s25 }
 0x291   : > { %s3294_s25 = smov %s3296_s28  ;;  %18 = sbr.rel (!%p16_p0) target bundleno = 4 (0x4), region = 101 }
 0x296   :  { %2102 = vsyncpa [#allocation4], 1 }
 0x297   :  { %2104 = vsyncpa [#allocation4 + $0x1], 1 }

</bundles_post_ra>
